<compile_context>
chip_gen: v7x
topology: tpu7x:2x2x1
jax: 0.10.0
libtpu: 0.0.40
codegen_flags: <defaults>
</compile_context>

<pallas_src>
import functools

import jax
import jax.numpy as jnp
from jax.experimental import pallas as pl
from jax.experimental.pallas import tpu as pltpu


# ----------------------------------------------------------------------------
# Shared epilogue math: per-token MLP + training-mode BatchNorm (+ optional ReLU)
# ----------------------------------------------------------------------------
def _mlp_bn(z, w1_ref, b1_ref, w2_ref, b2_ref, gamma_ref, beta_ref, g_ref,
            inv_count, apply_relu):
    # Per-token MLP as two full-width (F_out = 128-lane) matmuls.
    h1 = jnp.dot(z, w1_ref[...], preferred_element_type=jnp.float32) + b1_ref[...]
    h1 = jnp.maximum(h1, 0.0)
    f = jnp.dot(h1, w2_ref[...], preferred_element_type=jnp.float32) + b2_ref[...]
    # Training-mode BatchNorm1d over the PyTorch .view(N, emb, T) channels,
    # expressed in the output lane layout: channel(lane j) = j % emb, count = N*T.
    g = g_ref[...]
    mean = jnp.sum(jnp.dot(f, g, preferred_element_type=jnp.float32),
                   axis=0, keepdims=True) * inv_count
    c = f - mean
    var = jnp.sum(jnp.dot(c * c, g, preferred_element_type=jnp.float32),
                  axis=0, keepdims=True) * inv_count
    y = c * jax.lax.rsqrt(var + 1e-5) * gamma_ref[...] + beta_ref[...]
    if apply_relu:  # non-last layers (dropout with drop_ratio=0 is the identity)
        y = jnp.maximum(y, 0.0)
    return y


# ----------------------------------------------------------------------------
# Fused per-layer GIN kernel: aggregation + per-token MLP + BatchNorm(+ReLU)
# ----------------------------------------------------------------------------
def _gin_layer_kernel(a_ref, h_ref, w1_ref, b1_ref, w2_ref, b2_ref,
                      gamma_ref, beta_ref, g_ref, out_ref, z_acc,
                      *, inv_count, apply_relu):
    """Grid = (num_k_tiles,) over the source-node axis of the aggregation.

    a_ref : (N, TK) bf16 column tile of A_hat = A + I ;  h_ref : (TK, F_in) f32.
    Resident f32 weights: w1 (F_in,F_out), b1/b2/gamma/beta (1,F_out),
    w2 (F_out,F_out, columns pre-permuted to output layout), g (channel indicator).
    out_ref : (N, F_out) f32 lane-dense layer output ; z_acc : (N, F_in) f32 VMEM acc.
    """
    k = pl.program_id(0)

    @pl.when(k == 0)
    def _init():
        z_acc[...] = jnp.zeros_like(z_acc)

    # z += A_hat[:, k-block] @ H[k-block, :]  -- bf16 MXU operands, f32 accumulation.
    z_acc[...] += jnp.dot(a_ref[...], h_ref[...].astype(jnp.bfloat16),
                          preferred_element_type=jnp.float32)

    @pl.when(k == pl.num_programs(0) - 1)
    def _epilogue():
        out_ref[...] = _mlp_bn(z_acc[...], w1_ref, b1_ref, w2_ref, b2_ref,
                               gamma_ref, beta_ref, g_ref, inv_count, apply_relu)


def _gin_last_layer_kernel(a_ref, h_ref, w1_ref, b1_ref, w2_ref, b2_ref,
                           gamma_ref, beta_ref, g_ref, pool_ref, wp_ref, bp_ref,
                           out_ref, pred_ref, z_acc, *, inv_count):
    """Last layer: same as above (no trailing ReLU) + fused sum-pool and
    graph_pred_linear head written in the same epilogue."""
    k = pl.program_id(0)

    @pl.when(k == 0)
    def _init():
        z_acc[...] = jnp.zeros_like(z_acc)

    z_acc[...] += jnp.dot(a_ref[...], h_ref[...].astype(jnp.bfloat16),
                          preferred_element_type=jnp.float32)

    @pl.when(k == pl.num_programs(0) - 1)
    def _epilogue():
        y = _mlp_bn(z_acc[...], w1_ref, b1_ref, w2_ref, b2_ref,
                    gamma_ref, beta_ref, g_ref, inv_count, apply_relu=False)
        out_ref[...] = y
        pooled = jnp.dot(pool_ref[...], y, preferred_element_type=jnp.float32)
        pred_ref[...] = jnp.dot(pooled, wp_ref[...],
                                preferred_element_type=jnp.float32) + bp_ref[...]


def gin_layer(h, a_hat, w1bd, b1rep, w2p, b2p, gamma_o, beta_o, g_mat, *,
              tokens, apply_relu, head=None, block_k=128):
    """One fused GIN layer.  If `head=(pool_mat, Wp, bp2d)` is given (last layer),
    also returns the graph prediction computed in the same kernel."""
    n, f_in = h.shape
    f_out = w1bd.shape[1]
    block_k = min(block_k, n)
    assert n % block_k == 0, (n, block_k)
    nk = n // block_k
    inv_count = 1.0 / float(n * tokens)

    in_specs = [
        pl.BlockSpec((n, block_k), lambda k: (0, k)),      # A_hat: stream K tiles
        pl.BlockSpec((block_k, f_in), lambda k: (k, 0)),   # H:     stream K tiles
        pl.BlockSpec((f_in, f_out), lambda k: (0, 0)),     # resident weights below
        pl.BlockSpec((1, f_out), lambda k: (0, 0)),
        pl.BlockSpec((f_out, f_out), lambda k: (0, 0)),
        pl.BlockSpec((1, f_out), lambda k: (0, 0)),
        pl.BlockSpec((1, f_out), lambda k: (0, 0)),
        pl.BlockSpec((1, f_out), lambda k: (0, 0)),
        pl.BlockSpec((f_out, f_out), lambda k: (0, 0)),
    ]
    args = [a_hat, h, w1bd, b1rep, w2p, b2p, gamma_o, beta_o, g_mat]

    flops = (2 * n * n * f_in            # aggregation
             + 2 * n * f_in * f_out      # block-diag linear 1
             + 2 * n * f_out * f_out     # block-diag linear 2 (permuted)
             + 4 * n * f_out * f_out)    # BN group-sum matmuls
    bytes_accessed = (a_hat.size * a_hat.dtype.itemsize
                      + h.size * 4 + n * f_out * 4
                      + (w1bd.size + w2p.size + g_mat.size + 4 * f_out) * 4)

    if head is None:
        kernel = functools.partial(_gin_layer_kernel,
                                   inv_count=inv_count, apply_relu=apply_relu)
        out_shape = jax.ShapeDtypeStruct((n, f_out), jnp.float32)
        out_specs = pl.BlockSpec((n, f_out), lambda k: (0, 0))
    else:
        pool_mat, wp, bp2d = head
        g_graphs = pool_mat.shape[0]
        t = wp.shape[1]
        in_specs += [
            pl.BlockSpec((g_graphs, n), lambda k: (0, 0)),
            pl.BlockSpec((f_out, t), lambda k: (0, 0)),
            pl.BlockSpec((1, t), lambda k: (0, 0)),
        ]
        args += [pool_mat, wp, bp2d]
        kernel = functools.partial(_gin_last_layer_kernel, inv_count=inv_count)
        out_shape = (jax.ShapeDtypeStruct((n, f_out), jnp.float32),
                     jax.ShapeDtypeStruct((g_graphs, t), jnp.float32))
        out_specs = (pl.BlockSpec((n, f_out), lambda k: (0, 0)),
                     pl.BlockSpec((g_graphs, t), lambda k: (0, 0)))
        flops += 2 * g_graphs * n * f_out + 2 * g_graphs * f_out * t
        bytes_accessed += (pool_mat.size + wp.size + t + g_graphs * t) * 4

    return pl.pallas_call(
        kernel,
        out_shape=out_shape,
        grid=(nk,),
        in_specs=in_specs,
        out_specs=out_specs,
        scratch_shapes=[pltpu.VMEM((n, f_in), jnp.float32)],
        compiler_params=pltpu.CompilerParams(
            dimension_semantics=("arbitrary",),
            vmem_limit_bytes=32 * 1024 * 1024,
        ),
        cost_estimate=pl.CostEstimate(
            flops=int(flops), transcendentals=int(f_out),
            bytes_accessed=int(bytes_accessed)),
    )(*args)


# ----------------------------------------------------------------------------
# Host-side parameter folding (once per layer, tiny)
# ----------------------------------------------------------------------------
def prepare_layer_params(p, tokens, emb_dim):
    """Fold per-token weight sharing and PyTorch's .view/permute bookkeeping into
    dense matrices so the kernel needs no reshapes/transposes.

    MLP-output lane jM = t*emb + e ; BatchNorm views the flat buffer as (emb, T):
    channel c = jM // T, position p = jM % T ; after BN PyTorch permutes+flattens
    to output lane jO = p*emb + c.  src[jO] is the MLP lane feeding output lane jO.
    """
    eye_t = jnp.eye(tokens, dtype=jnp.float32)
    f_out = tokens * emb_dim
    j_o = jnp.arange(f_out)
    src = (j_o % emb_dim) * tokens + (j_o // emb_dim)

    w1bd = jnp.kron(eye_t, p["W1"])                   # (T*win, T*emb)
    b1rep = jnp.tile(p["b1"], tokens)[None, :]        # (1, T*emb)
    w2p = jnp.kron(eye_t, p["W2"])[:, src]            # columns pre-permuted
    b2p = jnp.tile(p["b2"], tokens)[src][None, :]
    gamma_o = jnp.tile(p["gamma"], tokens)[None, :]   # channel of lane j is j % emb
    beta_o = jnp.tile(p["beta"], tokens)[None, :]
    return w1bd, b1rep, w2p, b2p, gamma_o, beta_o


# ----------------------------------------------------------------------------
# GNN_graphpred forward
# ----------------------------------------------------------------------------
@functools.partial(jax.jit, static_argnames=("num_layer", "win_size", "emb_dim",
                                             "num_graphs", "block_k"))
def gnn_graphpred_forward(x, edge_index, batch, params, head, *,
                          num_layer, win_size, emb_dim, num_graphs, block_k=128):
    n = x.shape[0]
    h = x.reshape(n, -1).astype(jnp.float32)
    tokens = h.shape[1] // win_size
    f_out = tokens * emb_dim

    # GIN sum aggregation with the self loop folded in: z = (A + I) @ h  (eps = 0).
    a = jnp.zeros((n, n), jnp.float32).at[edge_index[1], edge_index[0]].add(1.0)
    a_hat = (a + jnp.eye(n, dtype=jnp.float32)).astype(jnp.bfloat16)  # small ints: exact

    # BN channel-group indicator in the output lane layout (shared by all layers).
    j = jnp.arange(f_out)
    g_mat = (j[:, None] % emb_dim == j[None, :] % emb_dim).astype(jnp.float32)

    # graph_pooling='sum' one-hot + graph_pred_linear weights (fused into last layer).
    pool_mat = (batch[None, :] == jnp.arange(num_graphs)[:, None]).astype(jnp.float32)
    head_args = (pool_mat, head["Wp"], head["bp"][None, :])

    pred = None
    for layer in range(num_layer):
        lp = prepare_layer_params(params[layer], tokens, emb_dim)
        last = layer == num_layer - 1
        out = gin_layer(h, a_hat, *lp, g_mat, tokens=tokens,
                        apply_relu=not last,
                        head=head_args if last else None,
                        block_k=block_k)
        if last:
            h, pred = out
        else:
            h = out

    node_rep = h.reshape(n, tokens, emb_dim)          # JK='last' node representation
    return node_rep, pred


# ----------------------------------------------------------------------------
# Pure-JAX reference (follows the PyTorch op order exactly)
# ----------------------------------------------------------------------------
def reference_forward(x, edge_index, params, *, num_layer, win_size, emb_dim):
    n = x.shape[0]
    x = x.reshape(n, -1).astype(jnp.float32)
    a = jnp.zeros((n, n), jnp.float32).at[edge_index[1], edge_index[0]].add(1.0)
    h = x
    win = win_size
    for layer in range(num_layer):
        p = params[layer]
        z = h + a @ h
        t = z.shape[1] // win
        zt = z.reshape(n, t, win)
        h1 = jax.nn.relu(jnp.einsum("ntw,we->nte", zt, p["W1"]) + p["b1"])
        h2 = jnp.einsum("nte,ef->ntf", h1, p["W2"]) + p["b2"]
        hc = h2.reshape(n, -1).reshape(n, emb_dim, -1)
        mean = hc.mean(axis=(0, 2), keepdims=True)
        var = ((hc - mean) ** 2).mean(axis=(0, 2), keepdims=True)
        hb = (hc - mean) / jnp.sqrt(var + 1e-5)
        hb = hb * p["gamma"][None, :, None] + p["beta"][None, :, None]
        hp = jnp.transpose(hb, (0, 2, 1))
        if layer == num_layer - 1:
            h = hp
        else:
            h = jax.nn.relu(hp.reshape(n, -1))
        win = emb_dim
    return h


def reference_graphpred(x, edge_index, batch, params, head, *,
                        num_layer, win_size, emb_dim, num_graphs):
    nodes = reference_forward(x, edge_index, params, num_layer=num_layer,
                              win_size=win_size, emb_dim=emb_dim)
    n = nodes.shape[0]
    flat = nodes.reshape(n, -1)
    pool_mat = (batch[None, :] == jnp.arange(num_graphs)[:, None]).astype(jnp.float32)
    pooled = pool_mat @ flat
    pred = pooled @ head["Wp"] + head["bp"]
    return nodes, pred


# ----------------------------------------------------------------------------
# Deterministic parameter init
# ----------------------------------------------------------------------------
def init_params(key, num_layer, win_size, emb_dim):
    params = []
    win = win_size
    for _ in range(num_layer):
        key, k1, k2, k3, k4, k5, k6 = jax.random.split(key, 7)
        params.append(
            dict(
                W1=jax.random.normal(k1, (win, emb_dim), jnp.float32) / jnp.sqrt(win),
                b1=0.1 * jax.random.normal(k2, (emb_dim,), jnp.float32),
                W2=jax.random.normal(k3, (emb_dim, emb_dim), jnp.float32) / jnp.sqrt(emb_dim),
                b2=0.1 * jax.random.normal(k4, (emb_dim,), jnp.float32),
                gamma=1.0 + 0.1 * jax.random.normal(k5, (emb_dim,), jnp.float32),
                beta=0.1 * jax.random.normal(k6, (emb_dim,), jnp.float32),
            )
        )
        win = emb_dim
    return params


if __name__ == "__main__":
    key = jax.random.PRNGKey(0)
    num_layer, win_size, emb_dim = 2, 64, 64
    n_nodes, n_tokens = 256, 2          # lane-dense: T*win = T*emb = 128
    num_graphs, num_tasks = 8, 12
    f0 = n_tokens * win_size
    n_edges = 1024

    kx, ke, kp, kw, kb = jax.random.split(key, 5)
    x = jax.random.normal(kx, (n_nodes, f0), jnp.float32)
    src = jax.random.randint(ke, (n_edges,), 0, n_nodes)
    dst = jax.random.randint(jax.random.fold_in(ke, 1), (n_edges,), 0, n_nodes)
    edge_index = jnp.stack([src, dst]).astype(jnp.int32)           # (2, E)
    batch = (jnp.arange(n_nodes) * num_graphs) // n_nodes          # contiguous graph ids

    params = init_params(kp, num_layer, win_size, emb_dim)
    head = dict(
        Wp=jax.random.normal(kw, (n_tokens * emb_dim, num_tasks), jnp.float32)
        / jnp.sqrt(float(n_tokens * emb_dim)),
        bp=0.1 * jax.random.normal(kb, (num_tasks,), jnp.float32),
    )

    node_rep, pred = gnn_graphpred_forward(
        x, edge_index, batch, params, head,
        num_layer=num_layer, win_size=win_size, emb_dim=emb_dim,
        num_graphs=num_graphs)
    node_rep, pred = jax.block_until_ready((node_rep, pred))

    ref_nodes, ref_pred = reference_graphpred(
        x, edge_index, batch, params, head,
        num_layer=num_layer, win_size=win_size, emb_dim=emb_dim,
        num_graphs=num_graphs)

    assert node_rep.shape == (n_nodes, n_tokens, emb_dim), node_rep.shape
    assert pred.shape == (num_graphs, num_tasks), pred.shape

    def rel_err(a, b):
        return float(jnp.max(jnp.abs(a - b)) / (jnp.max(jnp.abs(b)) + 1e-6))

    e_nodes = rel_err(node_rep, ref_nodes)
    e_pred = rel_err(pred, ref_pred)
    # bf16 MXU operands in the aggregation -> allow a small scaled error.
    assert e_nodes < 2e-2, f"node representation mismatch: {e_nodes}"
    assert e_pred < 3e-2, f"graph prediction mismatch: {e_pred}"
    print("KERNEL_OK")
</pallas_src>

<mosaic_0001>
module attributes {stable_mosaic.version = 11 : i64} {
  func.func private @main(%arg0: i32) attributes {dimension_semantics = [#tpu.dimension_semantics<core_parallel>], iteration_bounds = array<i64: 2>, tpu.core_type = #tpu.core_type<sc_scalar_subcore>, window_params = []} {
    return
  }
}

module attributes {stable_mosaic.version = 11 : i64} {
  func.func private @main(%arg0: i32) attributes {dimension_semantics = [#tpu.dimension_semantics<core_parallel>], iteration_bounds = array<i64: 2>, tpu.core_type = #tpu.core_type<sc_scalar_subcore>, window_params = []} {
    return
  }
}

module attributes {stable_mosaic.version = 11 : i64} {
  func.func @_gin_layer_kernel(%arg0: i32, %arg1: memref<256x128xbf16, #tpu.memory_space<vmem>>, %arg2: memref<128x128xf32, #tpu.memory_space<vmem>>, %arg3: memref<128x128xf32, #tpu.memory_space<vmem>>, %arg4: memref<1x128xf32, #tpu.memory_space<vmem>>, %arg5: memref<128x128xf32, #tpu.memory_space<vmem>>, %arg6: memref<1x128xf32, #tpu.memory_space<vmem>>, %arg7: memref<1x128xf32, #tpu.memory_space<vmem>>, %arg8: memref<1x128xf32, #tpu.memory_space<vmem>>, %arg9: memref<128x128xf32, #tpu.memory_space<vmem>>, %arg10: memref<256x128xf32, #tpu.memory_space<vmem>>, %arg11: memref<256x128xf32, #tpu.memory_space<vmem>>) attributes {dimension_semantics = [#tpu.dimension_semantics<arbitrary>], iteration_bounds = array<i64: 2>, scalar_prefetch = 0 : i64, scratch_operands = 1 : i64, tpu.core_type = #tpu.core_type<tc>, window_params = [{transform_indices = @transform_0, window_bounds = array<i64: 256, 128>}, {transform_indices = @transform_1, window_bounds = array<i64: 128, 128>}, {pipeline_mode = #tpu.pipeline_mode<synchronous>, transform_indices = @transform_2, window_bounds = array<i64: 128, 128>}, {pipeline_mode = #tpu.pipeline_mode<synchronous>, transform_indices = @transform_3, window_bounds = array<i64: 1, 128>}, {pipeline_mode = #tpu.pipeline_mode<synchronous>, transform_indices = @transform_4, window_bounds = array<i64: 128, 128>}, {pipeline_mode = #tpu.pipeline_mode<synchronous>, transform_indices = @transform_5, window_bounds = array<i64: 1, 128>}, {pipeline_mode = #tpu.pipeline_mode<synchronous>, transform_indices = @transform_6, window_bounds = array<i64: 1, 128>}, {pipeline_mode = #tpu.pipeline_mode<synchronous>, transform_indices = @transform_7, window_bounds = array<i64: 1, 128>}, {pipeline_mode = #tpu.pipeline_mode<synchronous>, transform_indices = @transform_8, window_bounds = array<i64: 128, 128>}, {pipeline_mode = #tpu.pipeline_mode<synchronous>, transform_indices = @transform_9, window_bounds = array<i64: 256, 128>}]} {
    %c0_i32 = arith.constant 0 : i32
    %0 = arith.cmpi eq, %arg0, %c0_i32 : i32
    %1 = arith.extui %0 : i1 to i32
    %c0_i32_0 = arith.constant 0 : i32
    %2 = arith.cmpi ne, %1, %c0_i32_0 : i32
    scf.if %2 {
      %cst_9 = arith.constant 0.000000e+00 : f32
      %13 = vector.broadcast %cst_9 : f32 to vector<256x128xf32>
      %c0_10 = arith.constant 0 : index
      %c0_11 = arith.constant 0 : index
      %14 = vector.load %arg11[%c0_10, %c0_11] : memref<256x128xf32, #tpu.memory_space<vmem>>, vector<256x128xf32>
      tpu.vector_store %arg11[%c0_10, %c0_11], %13 {strides = array<i32>} : memref<256x128xf32, #tpu.memory_space<vmem>>, vector<256x128xf32>,
    } else {
    }
    %c0 = arith.constant 0 : index
    %c0_1 = arith.constant 0 : index
    %3 = vector.load %arg11[%c0, %c0_1] : memref<256x128xf32, #tpu.memory_space<vmem>>, vector<256x128xf32>
    %c0_2 = arith.constant 0 : index
    %c0_3 = arith.constant 0 : index
    %4 = vector.load %arg1[%c0_2, %c0_3] : memref<256x128xbf16, #tpu.memory_space<vmem>>, vector<256x128xbf16>
    %c0_4 = arith.constant 0 : index
    %c0_5 = arith.constant 0 : index
    %5 = vector.load %arg2[%c0_4, %c0_5] : memref<128x128xf32, #tpu.memory_space<vmem>>, vector<128x128xf32>
    %6 = arith.truncf %5 : vector<128x128xf32> to vector<128x128xbf16>
    %cst = arith.constant dense<0.000000e+00> : vector<256x128xf32>
    %7 = tpu.matmul %4, %6, %cst {dimension_numbers = #tpu.dot_dimension_numbers<[1], [0], [0], [1], [0, 0, 1, 1], [], []>} : vector<256x128xbf16>, vector<128x128xbf16>, vector<256x128xf32> -> vector<256x128xf32>
    %8 = arith.addf %3, %7 : vector<256x128xf32>
    %c0_6 = arith.constant 0 : index
    %c0_7 = arith.constant 0 : index
    %9 = vector.load %arg11[%c0_6, %c0_7] : memref<256x128xf32, #tpu.memory_space<vmem>>, vector<256x128xf32>
    tpu.vector_store %arg11[%c0_6, %c0_7], %8 {strides = array<i32>} : memref<256x128xf32, #tpu.memory_space<vmem>>, vector<256x128xf32>,
    %c1_i32 = arith.constant 1 : i32
    %10 = arith.cmpi eq, %arg0, %c1_i32 : i32
    %11 = arith.extui %10 : i1 to i32
    %c0_i32_8 = arith.constant 0 : i32
    %12 = arith.cmpi ne, %11, %c0_i32_8 : i32
    scf.if %12 {
      %c0_9 = arith.constant 0 : index
      %c0_10 = arith.constant 0 : index
      %13 = vector.load %arg11[%c0_9, %c0_10] : memref<256x128xf32, #tpu.memory_space<vmem>>, vector<256x128xf32>
      %c0_11 = arith.constant 0 : index
      %c0_12 = arith.constant 0 : index
      %14 = vector.load %arg3[%c0_11, %c0_12] : memref<128x128xf32, #tpu.memory_space<vmem>>, vector<128x128xf32>
      %cst_13 = arith.constant dense<0.000000e+00> : vector<256x128xf32>
      %15 = tpu.matmul %13, %14, %cst_13 {dimension_numbers = #tpu.dot_dimension_numbers<[1], [0], [0], [1], [0, 0, 1, 1], [], []>} : vector<256x128xf32>, vector<128x128xf32>, vector<256x128xf32> -> vector<256x128xf32>
      %c0_14 = arith.constant 0 : index
      %c0_15 = arith.constant 0 : index
      %16 = vector.load %arg4[%c0_14, %c0_15] : memref<1x128xf32, #tpu.memory_space<vmem>>, vector<1x128xf32>
      %17 = vector.broadcast %16 : vector<1x128xf32> to vector<256x128xf32>
      %18 = arith.addf %15, %17 : vector<256x128xf32>
      %cst_16 = arith.constant 0.000000e+00 : f32
      %19 = vector.broadcast %cst_16 : f32 to vector<256x128xf32>
      %20 = arith.maximumf %18, %19 : vector<256x128xf32>
      %c0_17 = arith.constant 0 : index
      %c0_18 = arith.constant 0 : index
      %21 = vector.load %arg5[%c0_17, %c0_18] : memref<128x128xf32, #tpu.memory_space<vmem>>, vector<128x128xf32>
      %cst_19 = arith.constant dense<0.000000e+00> : vector<256x128xf32>
      %22 = tpu.matmul %20, %21, %cst_19 {dimension_numbers = #tpu.dot_dimension_numbers<[1], [0], [0], [1], [0, 0, 1, 1], [], []>} : vector<256x128xf32>, vector<128x128xf32>, vector<256x128xf32> -> vector<256x128xf32>
      %c0_20 = arith.constant 0 : index
      %c0_21 = arith.constant 0 : index
      %23 = vector.load %arg6[%c0_20, %c0_21] : memref<1x128xf32, #tpu.memory_space<vmem>>, vector<1x128xf32>
      %24 = vector.broadcast %23 : vector<1x128xf32> to vector<256x128xf32>
      %25 = arith.addf %22, %24 : vector<256x128xf32>
      %c0_22 = arith.constant 0 : index
      %c0_23 = arith.constant 0 : index
      %26 = vector.load %arg9[%c0_22, %c0_23] : memref<128x128xf32, #tpu.memory_space<vmem>>, vector<128x128xf32>
      %cst_24 = arith.constant dense<0.000000e+00> : vector<256x128xf32>
      %27 = tpu.matmul %25, %26, %cst_24 {dimension_numbers = #tpu.dot_dimension_numbers<[1], [0], [0], [1], [0, 0, 1, 1], [], []>} : vector<256x128xf32>, vector<128x128xf32>, vector<256x128xf32> -> vector<256x128xf32>
      %cst_25 = arith.constant dense<0.000000e+00> : vector<128xf32>
      %28 = vector.multi_reduction <add>, %27, %cst_25 [0] : vector<256x128xf32> to vector<128xf32>
      %29 = vector.shape_cast %28 : vector<128xf32> to vector<1x128xf32>
      %cst_26 = arith.constant 0.001953125 : f32
      %30 = vector.broadcast %cst_26 : f32 to vector<1x128xf32>
      %31 = arith.mulf %29, %30 : vector<1x128xf32>
      %32 = vector.broadcast %31 : vector<1x128xf32> to vector<256x128xf32>
      %33 = arith.subf %25, %32 : vector<256x128xf32>
      %34 = arith.mulf %33, %33 : vector<256x128xf32>
      %cst_27 = arith.constant dense<0.000000e+00> : vector<256x128xf32>
      %35 = tpu.matmul %34, %26, %cst_27 {dimension_numbers = #tpu.dot_dimension_numbers<[1], [0], [0], [1], [0, 0, 1, 1], [], []>} : vector<256x128xf32>, vector<128x128xf32>, vector<256x128xf32> -> vector<256x128xf32>
      %cst_28 = arith.constant dense<0.000000e+00> : vector<128xf32>
      %36 = vector.multi_reduction <add>, %35, %cst_28 [0] : vector<256x128xf32> to vector<128xf32>
      %37 = vector.shape_cast %36 : vector<128xf32> to vector<1x128xf32>
      %cst_29 = arith.constant 0.001953125 : f32
      %38 = vector.broadcast %cst_29 : f32 to vector<1x128xf32>
      %39 = arith.mulf %37, %38 : vector<1x128xf32>
      %cst_30 = arith.constant 9.99999974E-6 : f32
      %40 = vector.broadcast %cst_30 : f32 to vector<1x128xf32>
      %41 = arith.addf %39, %40 : vector<1x128xf32>
      %42 = math.rsqrt %41 : vector<1x128xf32>
      %43 = vector.broadcast %42 : vector<1x128xf32> to vector<256x128xf32>
      %44 = arith.mulf %33, %43 : vector<256x128xf32>
      %c0_31 = arith.constant 0 : index
      %c0_32 = arith.constant 0 : index
      %45 = vector.load %arg7[%c0_31, %c0_32] : memref<1x128xf32, #tpu.memory_space<vmem>>, vector<1x128xf32>
      %46 = vector.broadcast %45 : vector<1x128xf32> to vector<256x128xf32>
      %47 = arith.mulf %44, %46 : vector<256x128xf32>
      %c0_33 = arith.constant 0 : index
      %c0_34 = arith.constant 0 : index
      %48 = vector.load %arg8[%c0_33, %c0_34] : memref<1x128xf32, #tpu.memory_space<vmem>>, vector<1x128xf32>
      %49 = vector.broadcast %48 : vector<1x128xf32> to vector<256x128xf32>
      %50 = arith.addf %47, %49 : vector<256x128xf32>
      %cst_35 = arith.constant 0.000000e+00 : f32
      %51 = vector.broadcast %cst_35 : f32 to vector<256x128xf32>
      %52 = arith.maximumf %50, %51 : vector<256x128xf32>
      %c0_36 = arith.constant 0 : index
      %c0_37 = arith.constant 0 : index
      %53 = vector.load %arg10[%c0_36, %c0_37] : memref<256x128xf32, #tpu.memory_space<vmem>>, vector<256x128xf32>
      tpu.vector_store %arg10[%c0_36, %c0_37], %52 {strides = array<i32>} : memref<256x128xf32, #tpu.memory_space<vmem>>, vector<256x128xf32>,
    } else {
    }
    return
  }
  func.func @transform_0(%arg0: i32) -> (i32, i32) {
    %c0_i32 = arith.constant 0 : i32
    %c0_i32_0 = arith.constant 0 : i32
    return %c0_i32, %arg0 : i32, i32
  }
  func.func @transform_1(%arg0: i32) -> (i32, i32) {
    %c0_i32 = arith.constant 0 : i32
    %c0_i32_0 = arith.constant 0 : i32
    return %arg0, %c0_i32 : i32, i32
  }
  func.func @transform_2(%arg0: i32) -> (i32, i32) {
    %c0_i32 = arith.constant 0 : i32
    %c0_i32_0 = arith.constant 0 : i32
    %c0_i32_1 = arith.constant 0 : i32
    return %c0_i32, %c0_i32_0 : i32, i32
  }
  func.func @transform_3(%arg0: i32) -> (i32, i32) {
    %c0_i32 = arith.constant 0 : i32
    %c0_i32_0 = arith.constant 0 : i32
    %c0_i32_1 = arith.constant 0 : i32
    return %c0_i32, %c0_i32_0 : i32, i32
  }
  func.func @transform_4(%arg0: i32) -> (i32, i32) {
    %c0_i32 = arith.constant 0 : i32
    %c0_i32_0 = arith.constant 0 : i32
    %c0_i32_1 = arith.constant 0 : i32
    return %c0_i32, %c0_i32_0 : i32, i32
  }
  func.func @transform_5(%arg0: i32) -> (i32, i32) {
    %c0_i32 = arith.constant 0 : i32
    %c0_i32_0 = arith.constant 0 : i32
    %c0_i32_1 = arith.constant 0 : i32
    return %c0_i32, %c0_i32_0 : i32, i32
  }
  func.func @transform_6(%arg0: i32) -> (i32, i32) {
    %c0_i32 = arith.constant 0 : i32
    %c0_i32_0 = arith.constant 0 : i32
    %c0_i32_1 = arith.constant 0 : i32
    return %c0_i32, %c0_i32_0 : i32, i32
  }
  func.func @transform_7(%arg0: i32) -> (i32, i32) {
    %c0_i32 = arith.constant 0 : i32
    %c0_i32_0 = arith.constant 0 : i32
    %c0_i32_1 = arith.constant 0 : i32
    return %c0_i32, %c0_i32_0 : i32, i32
  }
  func.func @transform_8(%arg0: i32) -> (i32, i32) {
    %c0_i32 = arith.constant 0 : i32
    %c0_i32_0 = arith.constant 0 : i32
    %c0_i32_1 = arith.constant 0 : i32
    return %c0_i32, %c0_i32_0 : i32, i32
  }
  func.func @transform_9(%arg0: i32) -> (i32, i32) {
    %c0_i32 = arith.constant 0 : i32
    %c0_i32_0 = arith.constant 0 : i32
    %c0_i32_1 = arith.constant 0 : i32
    return %c0_i32, %c0_i32_0 : i32, i32
  }
}

module attributes {stable_mosaic.version = 11 : i64} {
  func.func @_gin_last_layer_kernel(%arg0: i32, %arg1: memref<256x128xbf16, #tpu.memory_space<vmem>>, %arg2: memref<128x128xf32, #tpu.memory_space<vmem>>, %arg3: memref<128x128xf32, #tpu.memory_space<vmem>>, %arg4: memref<1x128xf32, #tpu.memory_space<vmem>>, %arg5: memref<128x128xf32, #tpu.memory_space<vmem>>, %arg6: memref<1x128xf32, #tpu.memory_space<vmem>>, %arg7: memref<1x128xf32, #tpu.memory_space<vmem>>, %arg8: memref<1x128xf32, #tpu.memory_space<vmem>>, %arg9: memref<128x128xf32, #tpu.memory_space<vmem>>, %arg10: memref<8x256xf32, #tpu.memory_space<vmem>>, %arg11: memref<128x12xf32, #tpu.memory_space<vmem>>, %arg12: memref<1x12xf32, #tpu.memory_space<vmem>>, %arg13: memref<256x128xf32, #tpu.memory_space<vmem>>, %arg14: memref<8x12xf32, #tpu.memory_space<vmem>>, %arg15: memref<256x128xf32, #tpu.memory_space<vmem>>) attributes {dimension_semantics = [#tpu.dimension_semantics<arbitrary>], iteration_bounds = array<i64: 2>, scalar_prefetch = 0 : i64, scratch_operands = 1 : i64, tpu.core_type = #tpu.core_type<tc>, window_params = [{transform_indices = @transform_0, window_bounds = array<i64: 256, 128>}, {transform_indices = @transform_1, window_bounds = array<i64: 128, 128>}, {pipeline_mode = #tpu.pipeline_mode<synchronous>, transform_indices = @transform_2, window_bounds = array<i64: 128, 128>}, {pipeline_mode = #tpu.pipeline_mode<synchronous>, transform_indices = @transform_3, window_bounds = array<i64: 1, 128>}, {pipeline_mode = #tpu.pipeline_mode<synchronous>, transform_indices = @transform_4, window_bounds = array<i64: 128, 128>}, {pipeline_mode = #tpu.pipeline_mode<synchronous>, transform_indices = @transform_5, window_bounds = array<i64: 1, 128>}, {pipeline_mode = #tpu.pipeline_mode<synchronous>, transform_indices = @transform_6, window_bounds = array<i64: 1, 128>}, {pipeline_mode = #tpu.pipeline_mode<synchronous>, transform_indices = @transform_7, window_bounds = array<i64: 1, 128>}, {pipeline_mode = #tpu.pipeline_mode<synchronous>, transform_indices = @transform_8, window_bounds = array<i64: 128, 128>}, {pipeline_mode = #tpu.pipeline_mode<synchronous>, transform_indices = @transform_9, window_bounds = array<i64: 8, 256>}, {pipeline_mode = #tpu.pipeline_mode<synchronous>, transform_indices = @transform_10, window_bounds = array<i64: 128, 12>}, {pipeline_mode = #tpu.pipeline_mode<synchronous>, transform_indices = @transform_11, window_bounds = array<i64: 1, 12>}, {pipeline_mode = #tpu.pipeline_mode<synchronous>, transform_indices = @transform_12, window_bounds = array<i64: 256, 128>}, {pipeline_mode = #tpu.pipeline_mode<synchronous>, transform_indices = @transform_13, window_bounds = array<i64: 8, 12>}]} {
    %c0_i32 = arith.constant 0 : i32
    %0 = arith.cmpi eq, %arg0, %c0_i32 : i32
    %1 = arith.extui %0 : i1 to i32
    %c0_i32_0 = arith.constant 0 : i32
    %2 = arith.cmpi ne, %1, %c0_i32_0 : i32
    scf.if %2 {
      %cst_9 = arith.constant 0.000000e+00 : f32
      %13 = vector.broadcast %cst_9 : f32 to vector<256x128xf32>
      %c0_10 = arith.constant 0 : index
      %c0_11 = arith.constant 0 : index
      %14 = vector.load %arg15[%c0_10, %c0_11] : memref<256x128xf32, #tpu.memory_space<vmem>>, vector<256x128xf32>
      tpu.vector_store %arg15[%c0_10, %c0_11], %13 {strides = array<i32>} : memref<256x128xf32, #tpu.memory_space<vmem>>, vector<256x128xf32>,
    } else {
    }
    %c0 = arith.constant 0 : index
    %c0_1 = arith.constant 0 : index
    %3 = vector.load %arg15[%c0, %c0_1] : memref<256x128xf32, #tpu.memory_space<vmem>>, vector<256x128xf32>
    %c0_2 = arith.constant 0 : index
    %c0_3 = arith.constant 0 : index
    %4 = vector.load %arg1[%c0_2, %c0_3] : memref<256x128xbf16, #tpu.memory_space<vmem>>, vector<256x128xbf16>
    %c0_4 = arith.constant 0 : index
    %c0_5 = arith.constant 0 : index
    %5 = vector.load %arg2[%c0_4, %c0_5] : memref<128x128xf32, #tpu.memory_space<vmem>>, vector<128x128xf32>
    %6 = arith.truncf %5 : vector<128x128xf32> to vector<128x128xbf16>
    %cst = arith.constant dense<0.000000e+00> : vector<256x128xf32>
    %7 = tpu.matmul %4, %6, %cst {dimension_numbers = #tpu.dot_dimension_numbers<[1], [0], [0], [1], [0, 0, 1, 1], [], []>} : vector<256x128xbf16>, vector<128x128xbf16>, vector<256x128xf32> -> vector<256x128xf32>
    %8 = arith.addf %3, %7 : vector<256x128xf32>
    %c0_6 = arith.constant 0 : index
    %c0_7 = arith.constant 0 : index
    %9 = vector.load %arg15[%c0_6, %c0_7] : memref<256x128xf32, #tpu.memory_space<vmem>>, vector<256x128xf32>
    tpu.vector_store %arg15[%c0_6, %c0_7], %8 {strides = array<i32>} : memref<256x128xf32, #tpu.memory_space<vmem>>, vector<256x128xf32>,
    %c1_i32 = arith.constant 1 : i32
    %10 = arith.cmpi eq, %arg0, %c1_i32 : i32
    %11 = arith.extui %10 : i1 to i32
    %c0_i32_8 = arith.constant 0 : i32
    %12 = arith.cmpi ne, %11, %c0_i32_8 : i32
    scf.if %12 {
      %c0_9 = arith.constant 0 : index
      %c0_10 = arith.constant 0 : index
      %13 = vector.load %arg15[%c0_9, %c0_10] : memref<256x128xf32, #tpu.memory_space<vmem>>, vector<256x128xf32>
      %c0_11 = arith.constant 0 : index
      %c0_12 = arith.constant 0 : index
      %14 = vector.load %arg3[%c0_11, %c0_12] : memref<128x128xf32, #tpu.memory_space<vmem>>, vector<128x128xf32>
      %cst_13 = arith.constant dense<0.000000e+00> : vector<256x128xf32>
      %15 = tpu.matmul %13, %14, %cst_13 {dimension_numbers = #tpu.dot_dimension_numbers<[1], [0], [0], [1], [0, 0, 1, 1], [], []>} : vector<256x128xf32>, vector<128x128xf32>, vector<256x128xf32> -> vector<256x128xf32>
      %c0_14 = arith.constant 0 : index
      %c0_15 = arith.constant 0 : index
      %16 = vector.load %arg4[%c0_14, %c0_15] : memref<1x128xf32, #tpu.memory_space<vmem>>, vector<1x128xf32>
      %17 = vector.broadcast %16 : vector<1x128xf32> to vector<256x128xf32>
      %18 = arith.addf %15, %17 : vector<256x128xf32>
      %cst_16 = arith.constant 0.000000e+00 : f32
      %19 = vector.broadcast %cst_16 : f32 to vector<256x128xf32>
      %20 = arith.maximumf %18, %19 : vector<256x128xf32>
      %c0_17 = arith.constant 0 : index
      %c0_18 = arith.constant 0 : index
      %21 = vector.load %arg5[%c0_17, %c0_18] : memref<128x128xf32, #tpu.memory_space<vmem>>, vector<128x128xf32>
      %cst_19 = arith.constant dense<0.000000e+00> : vector<256x128xf32>
      %22 = tpu.matmul %20, %21, %cst_19 {dimension_numbers = #tpu.dot_dimension_numbers<[1], [0], [0], [1], [0, 0, 1, 1], [], []>} : vector<256x128xf32>, vector<128x128xf32>, vector<256x128xf32> -> vector<256x128xf32>
      %c0_20 = arith.constant 0 : index
      %c0_21 = arith.constant 0 : index
      %23 = vector.load %arg6[%c0_20, %c0_21] : memref<1x128xf32, #tpu.memory_space<vmem>>, vector<1x128xf32>
      %24 = vector.broadcast %23 : vector<1x128xf32> to vector<256x128xf32>
      %25 = arith.addf %22, %24 : vector<256x128xf32>
      %c0_22 = arith.constant 0 : index
      %c0_23 = arith.constant 0 : index
      %26 = vector.load %arg9[%c0_22, %c0_23] : memref<128x128xf32, #tpu.memory_space<vmem>>, vector<128x128xf32>
      %cst_24 = arith.constant dense<0.000000e+00> : vector<256x128xf32>
      %27 = tpu.matmul %25, %26, %cst_24 {dimension_numbers = #tpu.dot_dimension_numbers<[1], [0], [0], [1], [0, 0, 1, 1], [], []>} : vector<256x128xf32>, vector<128x128xf32>, vector<256x128xf32> -> vector<256x128xf32>
      %cst_25 = arith.constant dense<0.000000e+00> : vector<128xf32>
      %28 = vector.multi_reduction <add>, %27, %cst_25 [0] : vector<256x128xf32> to vector<128xf32>
      %29 = vector.shape_cast %28 : vector<128xf32> to vector<1x128xf32>
      %cst_26 = arith.constant 0.001953125 : f32
      %30 = vector.broadcast %cst_26 : f32 to vector<1x128xf32>
      %31 = arith.mulf %29, %30 : vector<1x128xf32>
      %32 = vector.broadcast %31 : vector<1x128xf32> to vector<256x128xf32>
      %33 = arith.subf %25, %32 : vector<256x128xf32>
      %34 = arith.mulf %33, %33 : vector<256x128xf32>
      %cst_27 = arith.constant dense<0.000000e+00> : vector<256x128xf32>
      %35 = tpu.matmul %34, %26, %cst_27 {dimension_numbers = #tpu.dot_dimension_numbers<[1], [0], [0], [1], [0, 0, 1, 1], [], []>} : vector<256x128xf32>, vector<128x128xf32>, vector<256x128xf32> -> vector<256x128xf32>
      %cst_28 = arith.constant dense<0.000000e+00> : vector<128xf32>
      %36 = vector.multi_reduction <add>, %35, %cst_28 [0] : vector<256x128xf32> to vector<128xf32>
      %37 = vector.shape_cast %36 : vector<128xf32> to vector<1x128xf32>
      %cst_29 = arith.constant 0.001953125 : f32
      %38 = vector.broadcast %cst_29 : f32 to vector<1x128xf32>
      %39 = arith.mulf %37, %38 : vector<1x128xf32>
      %cst_30 = arith.constant 9.99999974E-6 : f32
      %40 = vector.broadcast %cst_30 : f32 to vector<1x128xf32>
      %41 = arith.addf %39, %40 : vector<1x128xf32>
      %42 = math.rsqrt %41 : vector<1x128xf32>
      %43 = vector.broadcast %42 : vector<1x128xf32> to vector<256x128xf32>
      %44 = arith.mulf %33, %43 : vector<256x128xf32>
      %c0_31 = arith.constant 0 : index
      %c0_32 = arith.constant 0 : index
      %45 = vector.load %arg7[%c0_31, %c0_32] : memref<1x128xf32, #tpu.memory_space<vmem>>, vector<1x128xf32>
      %46 = vector.broadcast %45 : vector<1x128xf32> to vector<256x128xf32>
      %47 = arith.mulf %44, %46 : vector<256x128xf32>
      %c0_33 = arith.constant 0 : index
      %c0_34 = arith.constant 0 : index
      %48 = vector.load %arg8[%c0_33, %c0_34] : memref<1x128xf32, #tpu.memory_space<vmem>>, vector<1x128xf32>
      %49 = vector.broadcast %48 : vector<1x128xf32> to vector<256x128xf32>
      %50 = arith.addf %47, %49 : vector<256x128xf32>
      %c0_35 = arith.constant 0 : index
      %c0_36 = arith.constant 0 : index
      %51 = vector.load %arg13[%c0_35, %c0_36] : memref<256x128xf32, #tpu.memory_space<vmem>>, vector<256x128xf32>
      tpu.vector_store %arg13[%c0_35, %c0_36], %50 {strides = array<i32>} : memref<256x128xf32, #tpu.memory_space<vmem>>, vector<256x128xf32>,
      %c0_37 = arith.constant 0 : index
      %c0_38 = arith.constant 0 : index
      %52 = vector.load %arg10[%c0_37, %c0_38] : memref<8x256xf32, #tpu.memory_space<vmem>>, vector<8x256xf32>
      %cst_39 = arith.constant dense<0.000000e+00> : vector<8x128xf32>
      %53 = tpu.matmul %52, %50, %cst_39 {dimension_numbers = #tpu.dot_dimension_numbers<[1], [0], [0], [1], [0, 0, 1, 1], [], []>} : vector<8x256xf32>, vector<256x128xf32>, vector<8x128xf32> -> vector<8x128xf32>
      %c0_40 = arith.constant 0 : index
      %c0_41 = arith.constant 0 : index
      %54 = vector.load %arg11[%c0_40, %c0_41] : memref<128x12xf32, #tpu.memory_space<vmem>>, vector<128x12xf32>
      %cst_42 = arith.constant dense<0.000000e+00> : vector<8x12xf32>
      %55 = tpu.matmul %53, %54, %cst_42 {dimension_numbers = #tpu.dot_dimension_numbers<[1], [0], [0], [1], [0, 0, 1, 1], [], []>} : vector<8x128xf32>, vector<128x12xf32>, vector<8x12xf32> -> vector<8x12xf32>
      %c0_43 = arith.constant 0 : index
      %c0_44 = arith.constant 0 : index
      %56 = vector.load %arg12[%c0_43, %c0_44] : memref<1x12xf32, #tpu.memory_space<vmem>>, vector<1x12xf32>
      %57 = vector.broadcast %56 : vector<1x12xf32> to vector<8x12xf32>
      %58 = arith.addf %55, %57 : vector<8x12xf32>
      %c0_45 = arith.constant 0 : index
      %c0_46 = arith.constant 0 : index
      %59 = vector.load %arg14[%c0_45, %c0_46] : memref<8x12xf32, #tpu.memory_space<vmem>>, vector<8x12xf32>
      tpu.vector_store %arg14[%c0_45, %c0_46], %58 {strides = array<i32>} : memref<8x12xf32, #tpu.memory_space<vmem>>, vector<8x12xf32>,
    } else {
    }
    return
  }
  func.func @transform_0(%arg0: i32) -> (i32, i32) {
    %c0_i32 = arith.constant 0 : i32
    %c0_i32_0 = arith.constant 0 : i32
    return %c0_i32, %arg0 : i32, i32
  }
  func.func @transform_1(%arg0: i32) -> (i32, i32) {
    %c0_i32 = arith.constant 0 : i32
    %c0_i32_0 = arith.constant 0 : i32
    return %arg0, %c0_i32 : i32, i32
  }
  func.func @transform_2(%arg0: i32) -> (i32, i32) {
    %c0_i32 = arith.constant 0 : i32
    %c0_i32_0 = arith.constant 0 : i32
    %c0_i32_1 = arith.constant 0 : i32
    return %c0_i32, %c0_i32_0 : i32, i32
  }
  func.func @transform_3(%arg0: i32) -> (i32, i32) {
    %c0_i32 = arith.constant 0 : i32
    %c0_i32_0 = arith.constant 0 : i32
    %c0_i32_1 = arith.constant 0 : i32
    return %c0_i32, %c0_i32_0 : i32, i32
  }
  func.func @transform_4(%arg0: i32) -> (i32, i32) {
    %c0_i32 = arith.constant 0 : i32
    %c0_i32_0 = arith.constant 0 : i32
    %c0_i32_1 = arith.constant 0 : i32
    return %c0_i32, %c0_i32_0 : i32, i32
  }
  func.func @transform_5(%arg0: i32) -> (i32, i32) {
    %c0_i32 = arith.constant 0 : i32
    %c0_i32_0 = arith.constant 0 : i32
    %c0_i32_1 = arith.constant 0 : i32
    return %c0_i32, %c0_i32_0 : i32, i32
  }
  func.func @transform_6(%arg0: i32) -> (i32, i32) {
    %c0_i32 = arith.constant 0 : i32
    %c0_i32_0 = arith.constant 0 : i32
    %c0_i32_1 = arith.constant 0 : i32
    return %c0_i32, %c0_i32_0 : i32, i32
  }
  func.func @transform_7(%arg0: i32) -> (i32, i32) {
    %c0_i32 = arith.constant 0 : i32
    %c0_i32_0 = arith.constant 0 : i32
    %c0_i32_1 = arith.constant 0 : i32
    return %c0_i32, %c0_i32_0 : i32, i32
  }
  func.func @transform_8(%arg0: i32) -> (i32, i32) {
    %c0_i32 = arith.constant 0 : i32
    %c0_i32_0 = arith.constant 0 : i32
    %c0_i32_1 = arith.constant 0 : i32
    return %c0_i32, %c0_i32_0 : i32, i32
  }
  func.func @transform_9(%arg0: i32) -> (i32, i32) {
    %c0_i32 = arith.constant 0 : i32
    %c0_i32_0 = arith.constant 0 : i32
    %c0_i32_1 = arith.constant 0 : i32
    return %c0_i32, %c0_i32_0 : i32, i32
  }
  func.func @transform_10(%arg0: i32) -> (i32, i32) {
    %c0_i32 = arith.constant 0 : i32
    %c0_i32_0 = arith.constant 0 : i32
    %c0_i32_1 = arith.constant 0 : i32
    return %c0_i32, %c0_i32_0 : i32, i32
  }
  func.func @transform_11(%arg0: i32) -> (i32, i32) {
    %c0_i32 = arith.constant 0 : i32
    %c0_i32_0 = arith.constant 0 : i32
    %c0_i32_1 = arith.constant 0 : i32
    return %c0_i32, %c0_i32_0 : i32, i32
  }
  func.func @transform_12(%arg0: i32) -> (i32, i32) {
    %c0_i32 = arith.constant 0 : i32
    %c0_i32_0 = arith.constant 0 : i32
    %c0_i32_1 = arith.constant 0 : i32
    return %c0_i32, %c0_i32_0 : i32, i32
  }
  func.func @transform_13(%arg0: i32) -> (i32, i32) {
    %c0_i32 = arith.constant 0 : i32
    %c0_i32_0 = arith.constant 0 : i32
    %c0_i32_1 = arith.constant 0 : i32
    return %c0_i32, %c0_i32_0 : i32, i32
  }
}

</mosaic_0001>

<bundles_post_ra>
// kernel: tile.48
= control target key start
LH: loop header
LB: loop body
LE: loop exit
PB: predicated region body
PF: predicated region fallthrough
CT: control target
= control target key end

     0   :  { %s22_s0 = inlined_call_operand.vmem [shape: f32[64], index: 0, kind: input, shape index: {}]   ;;  %s23_s1 = inlined_call_operand.vmem [shape: f32[2,64], index: 1, kind: output, shape index: {}]  }
   0x1   :  { %v4_v0 = vld [vmem:[%s22_s0] ss:$0 sm:$0xff] }
   0x2   :  { %5 = vst [vmem:[%s23_s1] sm:$0x3] %v4_v0 }

// kernel: tile.49
= control target key start
LH: loop header
LB: loop body
LE: loop exit
PB: predicated region body
PF: predicated region fallthrough
CT: control target
= control target key end

     0   :  { %vm7_vm0 = vcmask 523264   ;;  %vm13_vm1 = vcmask 1048064   ;;  %s39_s0 = inlined_call_operand.vmem [shape: f32[2,64], index: 0, kind: input, shape index: {}]   ;;  %s40_s1 = inlined_call_operand.vmem [shape: f32[128], index: 1, kind: output, shape index: {}]  }
   0x1   :  { %v4_v0 = vld [vmem:[%s39_s0] sm:$0x3]  ;;  %s22_s0 = smov 64  }
   0x2   :  { %5 = vst [vmem:[#allocation1] sm:$0x3] %v4_v0 }
   0x9   :  { %v10_v1 = vld [vmem:[#allocation1 + $0x1] sm:$0x1]   ;;  %v6_v2 = vld [vmem:[#allocation1] sm:$0x1]  }
   0xa   :  { %11 = vrot.lane.b32.xlu0 %v10_v1, %s22_s0  ;;  %8 = vst.msk [vmem:[#allocation0] sm:$0x1] %vm7_vm0, %v6_v2  }
  0x7c   :  { %v12_v3 = vpop.permute.xlu0 %11  }
  0x7d   :  { %14 = vst.msk [vmem:[#allocation0] sm:$0x1] %vm13_vm1, %v12_v3  }
  0x84   :  { %v18_v4 = vld [vmem:[#allocation0] sm:$0x1] }
  0x85   :  { %20 = vst [vmem:[%s40_s1] sm:$0x1] %v18_v4 }

// kernel: tile.44
= control target key start
LH: loop header
LB: loop body
LE: loop exit
PB: predicated region body
PF: predicated region fallthrough
CT: control target
= control target key end

     0   :  { %vm7_vm0 = vcmask 523264   ;;  %vm13_vm1 = vcmask 1048064   ;;  %s39_s0 = inlined_call_operand.vmem [shape: f32[2,64], index: 0, kind: input, shape index: {}]   ;;  %s40_s1 = inlined_call_operand.vmem [shape: f32[1,128], index: 1, kind: output, shape index: {}]  }
   0x1   :  { %v4_v0 = vld [vmem:[%s39_s0] sm:$0x3]  ;;  %s22_s0 = smov 64  }
   0x2   :  { %5 = vst [vmem:[#allocation1] sm:$0x3] %v4_v0 }
   0x9   :  { %v10_v1 = vld [vmem:[#allocation1 + $0x1] sm:$0x1]   ;;  %v6_v2 = vld [vmem:[#allocation1] sm:$0x1]  }
   0xa   :  { %11 = vrot.lane.b32.xlu0 %v10_v1, %s22_s0  ;;  %8 = vst.msk [vmem:[#allocation0] sm:$0x1] %vm7_vm0, %v6_v2  }
  0x7c   :  { %v12_v3 = vpop.permute.xlu0 %11  }
  0x7d   :  { %14 = vst.msk [vmem:[#allocation0] sm:$0x1] %vm13_vm1, %v12_v3  }
  0x84   :  { %v18_v4 = vld [vmem:[#allocation0] sm:$0x1] }
  0x85   :  { %20 = vst [vmem:[%s40_s1] sm:$0x1] %v18_v4 }

// kernel: gnn_graphpred_forward.2
= control target key start
LH: loop header
LB: loop body
LE: loop exit
PB: predicated region body
PF: predicated region fallthrough
CT: control target
= control target key end

     0   :  { %s3222_s30 = smov 0   ;;  %s3224_s10 = smov 0   ;;  %s4095_s0 = inlined_call_operand.vmem [shape: bf16[256,256], index: 0, kind: input, shape index: {}]   ;;  %s4096_s1 = inlined_call_operand.vmem [shape: f32[256,128], index: 1, kind: input, shape index: {}]   ;;  %s4097_s2 = inlined_call_operand.vmem [shape: f32[128,128], index: 2, kind: input, shape index: {}]   ;;  %s4098_s3 = inlined_call_operand.vmem [shape: f32[1,128], index: 3, kind: input, shape index: {}]   ;;  %s4099_s4 = inlined_call_operand.vmem [shape: f32[128,128], index: 4, kind: input, shape index: {}]   ;;  %s4100_s5 = inlined_call_operand.vmem [shape: f32[1,128], index: 5, kind: input, shape index: {}]   ;;  %s4101_s6 = inlined_call_operand.vmem [shape: f32[1,128], index: 6, kind: input, shape index: {}]   ;;  %s4102_s7 = inlined_call_operand.vmem [shape: f32[1,128], index: 7, kind: input, shape index: {}]   ;;  %s4103_s8 = inlined_call_operand.vmem [shape: f32[128,128], index: 8, kind: input, shape index: {}]   ;;  %s4104_s9 = inlined_call_operand.vmem [shape: f32[256,128], index: 9, kind: output, shape index: {}]  }
   0x1   :  { %s3226_s11 = smov 0  }
   0x2 LB: > { %s3238_s12 = sadd.s32 4294967295, %s3169_s11   ;;  %s3241_s13 = sadd.s32 1, %s3169_s11   ;;  %s3169_s11 = sphi %s3226_s11, %s4107_s11   ;;  %s3165_s10 = sphi %s3224_s10, %s4106_s10   ;;  %s3161_s30 = sphi %s3222_s30, %s4105_s30  }
   0x3   : > { %s23_s14 = ssub.s32 %s3169_s11, %s3241_s13  ;;  %s26_s15 = sadd.s32 1, %s3165_s10 }
   0x4   : > { %p24_p0 = scmp.eq.s32.totalorder %s23_s14, 0  ;;  %p33_p1 = scmp.ne.s32.totalorder %s3165_s10, %s3161_s30 }
   0x5   : > { %p34_p2 = scmp.eq.s32.totalorder %s3169_s11, 0  ;;  %p2345_p4 = scmp.ge.s32.totalorder %s3169_s11, 2 }
   0x6   : > { %s3250_s16 = scalar_select %p24_p0, %s3165_s10, %s26_s15  }
   0x7   : > { %p35_p3 = por %p34_p2, %p33_p1  ;;  %274 = sbr.rel (%p2345_p4) target bundleno = 39 (0x27), region = 44 }
   0xe   : > { %277 = sbr.rel (!%p35_p3) target bundleno = 39 (0x27), region = 48  ;;  %s279_s17 = sand.u32 (%p35_p3), 1, %s3165_s10  }
   0xf   : > { %s2347_s18 = sshll.u32 (%p35_p3), %s3169_s11, 2  ;;  %s2346_s19 = sshll.u32 (%p35_p3), %s279_s17, 7 }
  0x10   : > { %s3258_s22 = scalar_lea.vmem (%p35_p3), %s4095_s0, %s2347_s18  ;;  %s3262_s23 = scalar_lea.vmem (%p35_p3), [#allocation3], %s2346_s19 }
  0x11   : > { %v299_v0 = vld [vmem:[%s3258_s22] sm:$0xf] (%p35_p3)  ;;  %v301_v1 = vld [vmem:[%s3258_s22 + $0x8] sm:$0xf] (%p35_p3)  ;;  %v303_v2 = vld [vmem:[%s3258_s22 + $0x10] sm:$0xf] (%p35_p3) }
  0x12   : > { %300 = vst [vmem:[%s3262_s23] sm:$0xf] (%p35_p3), %v299_v0  ;;  %302 = vst [vmem:[%s3262_s23 + $0x4] sm:$0xf] (%p35_p3), %v301_v1  ;;  %v305_v3 = vld [vmem:[%s3258_s22 + $0x18] sm:$0xf] (%p35_p3) }
  0x13   : > { %v307_v4 = vld [vmem:[%s3258_s22 + $0x20] sm:$0xf] (%p35_p3)  ;;  %304 = vst [vmem:[%s3262_s23 + $0x8] sm:$0xf] (%p35_p3), %v303_v2  ;;  %306 = vst [vmem:[%s3262_s23 + $0xc] sm:$0xf] (%p35_p3), %v305_v3 }
  0x14   : > { %308 = vst [vmem:[%s3262_s23 + $0x10] sm:$0xf] (%p35_p3), %v307_v4  ;;  %v309_v5 = vld [vmem:[%s3258_s22 + $0x28] sm:$0xf] (%p35_p3)  ;;  %v311_v6 = vld [vmem:[%s3258_s22 + $0x30] sm:$0xf] (%p35_p3) }
  0x15   : > { %v313_v7 = vld [vmem:[%s3258_s22 + $0x38] sm:$0xf]  ;;  %310 = vst [vmem:[%s3262_s23 + $0x14] sm:$0xf] %v309_v5  ;;  %312 = vst [vmem:[%s3262_s23 + $0x18] sm:$0xf] %v311_v6 }
  0x16   : > { %314 = vst [vmem:[%s3262_s23 + $0x1c] sm:$0xf] %v313_v7  ;;  %v315_v8 = vld [vmem:[%s3258_s22 + $0x40] sm:$0xf]  ;;  %v317_v9 = vld [vmem:[%s3258_s22 + $0x48] sm:$0xf] }
  0x17   : > { %v319_v10 = vld [vmem:[%s3258_s22 + $0x50] sm:$0xf]  ;;  %316 = vst [vmem:[%s3262_s23 + $0x20] sm:$0xf] %v315_v8  ;;  %318 = vst [vmem:[%s3262_s23 + $0x24] sm:$0xf] %v317_v9 }
  0x18   : > { %320 = vst [vmem:[%s3262_s23 + $0x28] sm:$0xf] %v319_v10  ;;  %v321_v11 = vld [vmem:[%s3258_s22 + $0x58] sm:$0xf]  ;;  %v323_v12 = vld [vmem:[%s3258_s22 + $0x60] sm:$0xf] }
  0x19   : > { %v325_v13 = vld [vmem:[%s3258_s22 + $0x68] sm:$0xf]  ;;  %322 = vst [vmem:[%s3262_s23 + $0x2c] sm:$0xf] %v321_v11  ;;  %324 = vst [vmem:[%s3262_s23 + $0x30] sm:$0xf] %v323_v12 }
  0x1a   : > { %326 = vst [vmem:[%s3262_s23 + $0x34] sm:$0xf] %v325_v13  ;;  %v327_v14 = vld [vmem:[%s3258_s22 + $0x70] sm:$0xf]  ;;  %v329_v15 = vld [vmem:[%s3258_s22 + $0x78] sm:$0xf] }
  0x1b   : > { %v331_v16 = vld [vmem:[%s3258_s22 + $0x80] sm:$0xf]  ;;  %328 = vst [vmem:[%s3262_s23 + $0x38] sm:$0xf] %v327_v14  ;;  %330 = vst [vmem:[%s3262_s23 + $0x3c] sm:$0xf] %v329_v15 }
  0x1c   : > { %332 = vst [vmem:[%s3262_s23 + $0x40] sm:$0xf] %v331_v16  ;;  %v333_v17 = vld [vmem:[%s3258_s22 + $0x88] sm:$0xf]  ;;  %v335_v18 = vld [vmem:[%s3258_s22 + $0x90] sm:$0xf] }
  0x1d   : > { %v337_v19 = vld [vmem:[%s3258_s22 + $0x98] sm:$0xf]  ;;  %334 = vst [vmem:[%s3262_s23 + $0x44] sm:$0xf] %v333_v17  ;;  %336 = vst [vmem:[%s3262_s23 + $0x48] sm:$0xf] %v335_v18 }
  0x1e   : > { %338 = vst [vmem:[%s3262_s23 + $0x4c] sm:$0xf] %v337_v19  ;;  %v339_v20 = vld [vmem:[%s3258_s22 + $0xa0] sm:$0xf]  ;;  %v341_v21 = vld [vmem:[%s3258_s22 + $0xa8] sm:$0xf] }
  0x1f   : > { %v343_v22 = vld [vmem:[%s3258_s22 + $0xb0] sm:$0xf]  ;;  %340 = vst [vmem:[%s3262_s23 + $0x50] sm:$0xf] %v339_v20  ;;  %342 = vst [vmem:[%s3262_s23 + $0x54] sm:$0xf] %v341_v21 }
  0x20   : > { %344 = vst [vmem:[%s3262_s23 + $0x58] sm:$0xf] %v343_v22  ;;  %v345_v23 = vld [vmem:[%s3258_s22 + $0xb8] sm:$0xf]  ;;  %v347_v24 = vld [vmem:[%s3258_s22 + $0xc0] sm:$0xf] }
  0x21   : > { %v349_v25 = vld [vmem:[%s3258_s22 + $0xc8] sm:$0xf]  ;;  %346 = vst [vmem:[%s3262_s23 + $0x5c] sm:$0xf] %v345_v23  ;;  %348 = vst [vmem:[%s3262_s23 + $0x60] sm:$0xf] %v347_v24 }
  0x22   : > { %350 = vst [vmem:[%s3262_s23 + $0x64] sm:$0xf] %v349_v25  ;;  %v351_v26 = vld [vmem:[%s3258_s22 + $0xd0] sm:$0xf]  ;;  %v353_v27 = vld [vmem:[%s3258_s22 + $0xd8] sm:$0xf] }
  0x23   : > { %v355_v28 = vld [vmem:[%s3258_s22 + $0xe0] sm:$0xf]  ;;  %352 = vst [vmem:[%s3262_s23 + $0x68] sm:$0xf] %v351_v26  ;;  %354 = vst [vmem:[%s3262_s23 + $0x6c] sm:$0xf] %v353_v27 }
  0x24   : > { %356 = vst [vmem:[%s3262_s23 + $0x70] sm:$0xf] %v355_v28  ;;  %v357_v29 = vld [vmem:[%s3258_s22 + $0xe8] sm:$0xf]  ;;  %v359_v30 = vld [vmem:[%s3258_s22 + $0xf0] sm:$0xf] }
  0x25   : > { %v361_v31 = vld [vmem:[%s3258_s22 + $0xf8] sm:$0xf]  ;;  %358 = vst [vmem:[%s3262_s23 + $0x74] sm:$0xf] %v357_v29  ;;  %360 = vst [vmem:[%s3262_s23 + $0x78] sm:$0xf] %v359_v30 }
  0x26   : > { %362 = vst [vmem:[%s3262_s23 + $0x7c] sm:$0xf] %v361_v31 }
  0x27 PF: > { %p2348_p5 = scmp.ge.s32.totalorder %s3169_s11, 1  ;;  %p457_p6 = scmp.lt.s32.totalorder %s3169_s11, 3 }
  0x29   : > { %p458_p7 = pnand %p2348_p5, %p457_p6 }
  0x2a   : > { %s464_s24 = sand.u32 (!%p458_p7), 1, %s3161_s30   ;;  %s2350_s25 = sshll.u32 (!%p458_p7), %s3238_s12, 4 }
  0x2b   : > { %461 = sbr.rel (%p458_p7) target bundleno = 1436 (0x59c), region = 93  ;;  %s2349_s26 = sshll.u32 (!%p458_p7), %s464_s24, 7 }
  0x2c   : > { %p500_p8 = scmp.lt.s32.totalorder (!%p458_p7), %s2350_s25, 31  ;;  %s3335_s15 = scalar_lea.vmem (!%p458_p7), [#allocation3], %s2349_s26 }
  0x2d   : > { %p2352_p9 = scmp.ne.s32.totalorder (!%p458_p7), %s3238_s12, 0 }
  0x32   : > { %s4109_s25 = smov (!%p500_p8, %s2350_s25), 31  ;;  %509 = sbr.rel (%p2352_p9) target bundleno = 68 (0x44), region = 101 }
  0x33   : > { %s2351_s27 = sshll.u32 %s4109_s25, 3  ;;  %v3171_v32 = vmov (!%p2352_p9), 0.0  }
  0x34   : > { %s3333_s14 = scalar_lea.vmem %s4096_s1, %s2351_s27  ;;  %510 = vst [vmem:[#allocation2] sm:$0xff] (!%p2352_p9), %v3171_v32  ;;  %511 = vst [vmem:[#allocation2 + $0x8] sm:$0xff] (!%p2352_p9), %v3171_v32 }
  0x35   : > { %512 = vst [vmem:[#allocation2 + $0x10] sm:$0xff] (!%p2352_p9), %v3171_v32  ;;  %513 = vst [vmem:[#allocation2 + $0x18] sm:$0xff] (!%p2352_p9), %v3171_v32 }
  0x36   : > { %514 = vst [vmem:[#allocation2 + $0x20] sm:$0xff] (!%p2352_p9), %v3171_v32  ;;  %515 = vst [vmem:[#allocation2 + $0x28] sm:$0xff] (!%p2352_p9), %v3171_v32 }
  0x37   : > { %516 = vst [vmem:[#allocation2 + $0x30] sm:$0xff] (!%p2352_p9), %v3171_v32  ;;  %517 = vst [vmem:[#allocation2 + $0x38] sm:$0xff] (!%p2352_p9), %v3171_v32 }
  0x38   : > { %518 = vst [vmem:[#allocation2 + $0x40] sm:$0xff] (!%p2352_p9), %v3171_v32  ;;  %519 = vst [vmem:[#allocation2 + $0x48] sm:$0xff] (!%p2352_p9), %v3171_v32 }
  0x39   : > { %520 = vst [vmem:[#allocation2 + $0x50] sm:$0xff] %v3171_v32  ;;  %521 = vst [vmem:[#allocation2 + $0x58] sm:$0xff] %v3171_v32 }
  0x3a   : > { %522 = vst [vmem:[#allocation2 + $0x60] sm:$0xff] %v3171_v32  ;;  %523 = vst [vmem:[#allocation2 + $0x68] sm:$0xff] %v3171_v32 }
  0x3b   : > { %524 = vst [vmem:[#allocation2 + $0x70] sm:$0xff] %v3171_v32  ;;  %525 = vst [vmem:[#allocation2 + $0x78] sm:$0xff] %v3171_v32 }
  0x3c   : > { %526 = vst [vmem:[#allocation2 + $0x80] sm:$0xff] %v3171_v32  ;;  %527 = vst [vmem:[#allocation2 + $0x88] sm:$0xff] %v3171_v32 }
  0x3d   : > { %528 = vst [vmem:[#allocation2 + $0x90] sm:$0xff] %v3171_v32  ;;  %529 = vst [vmem:[#allocation2 + $0x98] sm:$0xff] %v3171_v32 }
  0x3e   : > { %530 = vst [vmem:[#allocation2 + $0xa0] sm:$0xff] %v3171_v32  ;;  %531 = vst [vmem:[#allocation2 + $0xa8] sm:$0xff] %v3171_v32 }
  0x3f   : > { %532 = vst [vmem:[#allocation2 + $0xb0] sm:$0xff] %v3171_v32  ;;  %533 = vst [vmem:[#allocation2 + $0xb8] sm:$0xff] %v3171_v32 }
  0x40   : > { %534 = vst [vmem:[#allocation2 + $0xc0] sm:$0xff] %v3171_v32  ;;  %535 = vst [vmem:[#allocation2 + $0xc8] sm:$0xff] %v3171_v32 }
  0x41   : > { %536 = vst [vmem:[#allocation2 + $0xd0] sm:$0xff] %v3171_v32  ;;  %537 = vst [vmem:[#allocation2 + $0xd8] sm:$0xff] %v3171_v32 }
  0x42   : > { %538 = vst [vmem:[#allocation2 + $0xe0] sm:$0xff] %v3171_v32  ;;  %539 = vst [vmem:[#allocation2 + $0xe8] sm:$0xff] %v3171_v32 }
  0x43   : > { %540 = vst [vmem:[#allocation2 + $0xf0] sm:$0xff] %v3171_v32  ;;  %541 = vst [vmem:[#allocation2 + $0xf8] sm:$0xff] %v3171_v32 }
  0x44 PF: > { %v606_v33 = vld [vmem:[%s3333_s14] sm:$0xff]  ;;  %v607_v34 = vld [vmem:[%s3333_s14 + $0x8] sm:$0xff]  ;;  %v608_v35 = vld [vmem:[%s3333_s14 + $0x10] sm:$0xff]  ;;  %p2369_p10 = scmp.ne.s32.totalorder %s3238_s12, 1 }
  0x45   : > { %v622_v36 = vpack.c.bf16 %v607_v34, %v606_v33  ;;  %v609_v37 = vld [vmem:[%s3333_s14 + $0x18] sm:$0xff]  ;;  %v610_v39 = vld [vmem:[%s3333_s14 + $0x20] sm:$0xff]  ;;  %v611_v40 = vld [vmem:[%s3333_s14 + $0x28] sm:$0xff] }
  0x46   : > { %v623_v38 = vpack.c.bf16 %v609_v37, %v608_v35  ;;  %v612_v41 = vld [vmem:[%s3333_s14 + $0x30] sm:$0xff]  ;;  %v624_v42 = vpack.c.bf16 %v611_v40, %v610_v39  ;;  %v613_v43 = vld [vmem:[%s3333_s14 + $0x38] sm:$0xff]  ;;  %v3129_v44 = vld [vmem:[%s3335_s15] sm:$0xff]  }
  0x47   : > { %2592 = vmatprep.subr.bf16.mxu0 %v622_v36  ;;  %3088 = vmatprep.subr.bf16.mxu1 %v622_v36  ;;  %v3130_v45 = vld [vmem:[%s3335_s15 + $0x40] sm:$0xff]   ;;  %v625_v46 = vpack.c.bf16 %v613_v43, %v612_v41  ;;  %v615_v48 = vld [vmem:[%s3333_s14 + $0x48] sm:$0xff]  ;;  %v616_v50 = vld [vmem:[%s3333_s14 + $0x50] sm:$0xff] }
  0x48   : > { %2593 = vmatpush3.bf16.msra.mxu0 %v622_v36  ;;  %3096 = vmatpush3.bf16.msra.mxu1 %v622_v36  ;;  %v614_v47 = vld [vmem:[%s3333_s14 + $0x40] sm:$0xff]  ;;  %v617_v51 = vld [vmem:[%s3333_s14 + $0x58] sm:$0xff]  ;;  %v619_v54 = vld [vmem:[%s3333_s14 + $0x68] sm:$0xff] }
  0x49   : > { %2594 = vmatprep.subr.bf16.mxu0 %v623_v38  ;;  %3089 = vmatprep.subr.bf16.mxu1 %v623_v38  ;;  %v626_v49 = vpack.c.bf16 %v615_v48, %v614_v47  ;;  %v627_v52 = vpack.c.bf16 %v617_v51, %v616_v50  ;;  %v618_v53 = vld [vmem:[%s3333_s14 + $0x60] sm:$0xff]  ;;  %v620_v56 = vld [vmem:[%s3333_s14 + $0x70] sm:$0xff]  ;;  %v621_v57 = vld [vmem:[%s3333_s14 + $0x78] sm:$0xff] }
  0x4a   : > { %2608 = vmatprep.mubr.bf16.mxu0 %v3129_v44  ;;  %2624 = vmatprep.mubr.bf16.mxu1 %v3130_v45  ;;  %v628_v55 = vpack.c.bf16 %v619_v54, %v618_v53  ;;  %v629_v58 = vpack.c.bf16 %v621_v57, %v620_v56  ;;  %v3131_v59 = vld [vmem:[%s3335_s15 + $0x8] sm:$0xff]   ;;  %v3133_v61 = vld [vmem:[%s3335_s15 + $0x10] sm:$0xff]   ;;  %v3135_v63 = vld [vmem:[%s3335_s15 + $0x18] sm:$0xff]  }
  0x4b   : > { %v3132_v60 = vld [vmem:[%s3335_s15 + $0x48] sm:$0xff]   ;;  %v3134_v62 = vld [vmem:[%s3335_s15 + $0x50] sm:$0xff]   ;;  %v3136_v0 = vld [vmem:[%s3335_s15 + $0x58] sm:$0xff]  }
  0x4c   : > { %2595 = vmatpush3.bf16.msra.mxu0 %v623_v38  ;;  %3097 = vmatpush3.bf16.msra.mxu1 %v623_v38  ;;  %v3137_v1 = vld [vmem:[%s3335_s15 + $0x20] sm:$0xff]   ;;  %v3139_v3 = vld [vmem:[%s3335_s15 + $0x28] sm:$0xff]   ;;  %v3141_v5 = vld [vmem:[%s3335_s15 + $0x30] sm:$0xff]  }
  0x4d   : > { %2596 = vmatprep.subr.bf16.mxu0 %v624_v42  ;;  %3090 = vmatprep.subr.bf16.mxu1 %v624_v42  ;;  %v3138_v2 = vld [vmem:[%s3335_s15 + $0x60] sm:$0xff]   ;;  %v3140_v4 = vld [vmem:[%s3335_s15 + $0x68] sm:$0xff]   ;;  %v3142_v6 = vld [vmem:[%s3335_s15 + $0x70] sm:$0xff]  }
  0x4e   : > { %v3143_v7 = vld [vmem:[%s3335_s15 + $0x38] sm:$0xff]   ;;  %v544_v9 = vld [vmem:[#allocation2 + $0x10] sm:$0xff]  ;;  %v542_v11 = vld [vmem:[#allocation2] sm:$0xff] }
  0x4f   : > { %v3144_v8 = vld [vmem:[%s3335_s15 + $0x78] sm:$0xff]   ;;  %v560_v10 = vld [vmem:[#allocation2 + $0x90] sm:$0xff]  ;;  %v558_v12 = vld [vmem:[#allocation2 + $0x80] sm:$0xff] }
  0x50   : > { %2597 = vmatpush3.bf16.msra.mxu0 %v624_v42  ;;  %3098 = vmatpush3.bf16.msra.mxu1 %v624_v42  ;;  %v545_v15 = vld [vmem:[#allocation2 + $0x18] sm:$0xff]  ;;  %v543_v21 = vld [vmem:[#allocation2 + $0x8] sm:$0xff]  ;;  %v548_v33 = vld [vmem:[#allocation2 + $0x30] sm:$0xff] }
  0x51   : > { %2598 = vmatprep.subr.bf16.mxu0 %v625_v46  ;;  %3091 = vmatprep.subr.bf16.mxu1 %v625_v46  ;;  %v561_v16 = vld [vmem:[#allocation2 + $0x98] sm:$0xff]  ;;  %v559_v22 = vld [vmem:[#allocation2 + $0x88] sm:$0xff]  ;;  %v564_v34 = vld [vmem:[#allocation2 + $0xb0] sm:$0xff] }
  0x52   : > { %v546_v35 = vld [vmem:[#allocation2 + $0x20] sm:$0xff]  ;;  %v549_v39 = vld [vmem:[#allocation2 + $0x38] sm:$0xff]  ;;  %v547_v45 = vld [vmem:[#allocation2 + $0x28] sm:$0xff] }
  0x53   : > { %v562_v36 = vld [vmem:[#allocation2 + $0xa0] sm:$0xff]  ;;  %v565_v40 = vld [vmem:[#allocation2 + $0xb8] sm:$0xff]  ;;  %v552_v57 = vld [vmem:[#allocation2 + $0x50] sm:$0xff] }
  0x54   : > { %2599 = vmatpush3.bf16.msra.mxu0 %v625_v46  ;;  %3099 = vmatpush3.bf16.msra.mxu1 %v625_v46  ;;  %v563_v46 = vld [vmem:[#allocation2 + $0xa8] sm:$0xff] }
  0x55   : > { %2600 = vmatprep.subr.bf16.mxu0 %v626_v49  ;;  %3092 = vmatprep.subr.bf16.mxu1 %v626_v49 }
  0x58   : > { %2601 = vmatpush3.bf16.msra.mxu0 %v626_v49  ;;  %3100 = vmatpush3.bf16.msra.mxu1 %v626_v49 }
  0x59   : > { %2602 = vmatprep.subr.bf16.mxu0 %v627_v52  ;;  %3093 = vmatprep.subr.bf16.mxu1 %v627_v52 }
  0x5c   : > { %2603 = vmatpush3.bf16.msra.mxu0 %v627_v52  ;;  %3101 = vmatpush3.bf16.msra.mxu1 %v627_v52 }
  0x5d   : > { %2604 = vmatprep.subr.bf16.mxu0 %v628_v55  ;;  %3094 = vmatprep.subr.bf16.mxu1 %v628_v55 }
  0x60   : > { %2605 = vmatpush3.bf16.msra.mxu0 %v628_v55  ;;  %3102 = vmatpush3.bf16.msra.mxu1 %v628_v55 }
  0x61   : > { %2606 = vmatprep.subr.bf16.mxu0 %v629_v58  ;;  %3095 = vmatprep.subr.bf16.mxu1 %v629_v58 }
  0x64   : > { %2607 = vmatpush3.bf16.msra.mxu0 %v629_v58  ;;  %3103 = vmatpush3.bf16.msra.mxu1 %v629_v58  ;;  %v568_v58 = vld [vmem:[#allocation2 + $0xd0] sm:$0xff] }
  0x67   : > { %2609 = vmatmul.mubr.bf16.vlgmr.msra.gmra.mrb[0].mxu0 %v3131_v59  ;;  %2625 = vmatmul.mubr.bf16.vlgmr.msra.gmra.mrb[0].mxu1 %v3132_v60  ;;  %v550_v59 = vld [vmem:[#allocation2 + $0x40] sm:$0xff] }
  0x68   : > { %2612 = vmatprep.mubr.bf16.mxu0 %v3133_v61  ;;  %2628 = vmatprep.mubr.bf16.mxu1 %v3134_v62  ;;  %v566_v60 = vld [vmem:[#allocation2 + $0xc0] sm:$0xff] }
  0x6f   : > { %2613 = vmatmul.mubr.bf16.gmra.mrb[4].mxu0 %v3135_v63  ;;  %2629 = vmatmul.mubr.bf16.gmra.mrb[4].mxu1 %v3136_v0  ;;  %v553_v63 = vld [vmem:[#allocation2 + $0x58] sm:$0xff] }
  0x70   : > { %2616 = vmatprep.mubr.bf16.mxu0 %v3137_v1  ;;  %2632 = vmatprep.mubr.bf16.mxu1 %v3138_v2  ;;  %v569_v0 = vld [vmem:[#allocation2 + $0xd8] sm:$0xff] }
  0x77   : > { %2617 = vmatmul.mubr.bf16.gmra.mrb[8].mxu0 %v3139_v3  ;;  %2633 = vmatmul.mubr.bf16.gmra.mrb[8].mxu1 %v3140_v4 }
  0x78   : > { %2620 = vmatprep.mubr.bf16.mxu0 %v3141_v5  ;;  %2636 = vmatprep.mubr.bf16.mxu1 %v3142_v6  ;;  %v551_v5 = vld [vmem:[#allocation2 + $0x48] sm:$0xff] }
  0x79   : > { %v567_v6 = vld [vmem:[#allocation2 + $0xc8] sm:$0xff] }
  0x7f   : > { %2621 = vmatmul.mubr.bf16.gmra.mrb[12].mxu0 %v3143_v7  ;;  %2637 = vmatmul.mubr.bf16.gmra.mrb[12].mxu1 %v3144_v8 }
 0x13a   : > { %v2610_v13 = vpop.f32.mrb[0].mxu0  ;;  %v2626_v14 = vpop.f32.mrb[0].mxu1 }
 0x13b   : > { %v889_v17 = vadd.f32 %v2610_v13, %v544_v9  ;;  %v905_v18 = vadd.f32 %v2626_v14, %v560_v10  ;;  %v760_v19 = vpop.f32.mrb[1].mxu0  ;;  %v824_v20 = vpop.f32.mrb[1].mxu1 }
 0x13c   : > { %v887_v23 = vadd.f32 %v760_v19, %v542_v11  ;;  %v903_v24 = vadd.f32 %v824_v20, %v558_v12  ;;  %v2611_v25 = vpop.f32.mrb[2].mxu0  ;;  %v2627_v26 = vpop.f32.mrb[2].mxu1  ;;  %v554_v19 = vld [vmem:[#allocation2 + $0x60] sm:$0xff] }
 0x13d   : > { %921 = vst [vmem:[#allocation2 + $0x10] sm:$0xff] %v889_v17  ;;  %937 = vst [vmem:[#allocation2 + $0x90] sm:$0xff] %v905_v18  ;;  %v890_v27 = vadd.f32 %v2611_v25, %v545_v15  ;;  %v906_v28 = vadd.f32 %v2627_v26, %v561_v16  ;;  %v763_v29 = vpop.f32.mrb[3].mxu0  ;;  %v827_v30 = vpop.f32.mrb[3].mxu1  ;;  %v556_v17 = vld [vmem:[#allocation2 + $0x70] sm:$0xff]  ;;  %v570_v20 = vld [vmem:[#allocation2 + $0xe0] sm:$0xff] }
 0x13e   : > { %919 = vst [vmem:[#allocation2] sm:$0xff] %v887_v23  ;;  %935 = vst [vmem:[#allocation2 + $0x80] sm:$0xff] %v903_v24  ;;  %v888_v31 = vadd.f32 %v763_v29, %v543_v21  ;;  %v904_v32 = vadd.f32 %v827_v30, %v559_v22  ;;  %v572_v18 = vld [vmem:[#allocation2 + $0xf0] sm:$0xff]  ;;  %v557_v23 = vld [vmem:[#allocation2 + $0x78] sm:$0xff] }
 0x13f   : > { %922 = vst [vmem:[#allocation2 + $0x18] sm:$0xff] %v890_v27  ;;  %938 = vst [vmem:[#allocation2 + $0x98] sm:$0xff] %v906_v28  ;;  %v573_v24 = vld [vmem:[#allocation2 + $0xf8] sm:$0xff]  ;;  %v555_v29 = vld [vmem:[#allocation2 + $0x68] sm:$0xff] }
 0x140   : > { %920 = vst [vmem:[#allocation2 + $0x8] sm:$0xff] %v888_v31  ;;  %936 = vst [vmem:[#allocation2 + $0x88] sm:$0xff] %v904_v32  ;;  %v571_v30 = vld [vmem:[#allocation2 + $0xe8] sm:$0xff] }
 0x142   : > { %v2614_v37 = vpop.f32.mrb[4].mxu0  ;;  %v2630_v38 = vpop.f32.mrb[4].mxu1 }
 0x143   : > { %v893_v41 = vadd.f32 %v2614_v37, %v548_v33  ;;  %v909_v42 = vadd.f32 %v2630_v38, %v564_v34  ;;  %v776_v43 = vpop.f32.mrb[5].mxu0  ;;  %v840_v44 = vpop.f32.mrb[5].mxu1 }
 0x144   : > { %v891_v47 = vadd.f32 %v776_v43, %v546_v35  ;;  %v907_v48 = vadd.f32 %v840_v44, %v562_v36  ;;  %v2615_v49 = vpop.f32.mrb[6].mxu0  ;;  %v2631_v50 = vpop.f32.mrb[6].mxu1  ;;  %v989_v43 = vld [vmem:[%s4097_s2 + $0x10] sm:$0xff] (!%p2369_p10) }
 0x145   : > { %925 = vst [vmem:[#allocation2 + $0x30] sm:$0xff] %v893_v41  ;;  %941 = vst [vmem:[#allocation2 + $0xb0] sm:$0xff] %v909_v42  ;;  %v894_v51 = vadd.f32 %v2615_v49, %v549_v39  ;;  %v910_v52 = vadd.f32 %v2631_v50, %v565_v40  ;;  %v779_v53 = vpop.f32.mrb[7].mxu0  ;;  %v843_v54 = vpop.f32.mrb[7].mxu1  ;;  %v987_v41 = vld [vmem:[%s4097_s2] sm:$0xff] (!%p2369_p10)  ;;  %v988_v42 = vld [vmem:[%s4097_s2 + $0x8] sm:$0xff] (!%p2369_p10) }
 0x146   : > { %923 = vst [vmem:[#allocation2 + $0x20] sm:$0xff] %v891_v47  ;;  %939 = vst [vmem:[#allocation2 + $0xa0] sm:$0xff] %v907_v48  ;;  %v892_v55 = vadd.f32 %v779_v53, %v547_v45  ;;  %v908_v56 = vadd.f32 %v843_v54, %v563_v46  ;;  %v2960_v44 = vpack.c.bf16 (!%p2369_p10), %v988_v42, %v987_v41  ;;  %v990_v45 = vld [vmem:[%s4097_s2 + $0x18] sm:$0xff] (!%p2369_p10)  ;;  %v991_v47 = vld [vmem:[%s4097_s2 + $0x20] sm:$0xff] (!%p2369_p10) }
 0x147   : > { %926 = vst [vmem:[#allocation2 + $0x38] sm:$0xff] %v894_v51  ;;  %942 = vst [vmem:[#allocation2 + $0xb8] sm:$0xff] %v910_v52  ;;  %v2964_v46 = vpack.c.bf16 (!%p2369_p10), %v990_v45, %v989_v43  ;;  %v992_v48 = vld [vmem:[%s4097_s2 + $0x28] sm:$0xff] (!%p2369_p10)  ;;  %v955_v50 = vld [vmem:[#allocation2] sm:$0xff] (!%p2369_p10) }
 0x148   : > { %924 = vst [vmem:[#allocation2 + $0x28] sm:$0xff] %v892_v55  ;;  %940 = vst [vmem:[#allocation2 + $0xa8] sm:$0xff] %v908_v56  ;;  %2961 = vmatprep.subr.bf16.mxu0 (!%p2369_p10), %v2960_v44  ;;  %v2968_v49 = vpack.c.bf16 (!%p2369_p10), %v992_v48, %v991_v47  ;;  %v993_v51 = vld [vmem:[%s4097_s2 + $0x30] sm:$0xff] (!%p2369_p10)  ;;  %v994_v52 = vld [vmem:[%s4097_s2 + $0x38] sm:$0xff] (!%p2369_p10)  ;;  %2672 = vmatprep.mubr.f32.mxu0 (!%p2369_p10), %v955_v50 }
 0x149   : > { %2963 = vmatpush3.bf16.msra.mxu0 (!%p2369_p10), %v2960_v44  ;;  %v2972_v53 = vpack.c.bf16 (!%p2369_p10), %v994_v52, %v993_v51  ;;  %v995_v54 = vld [vmem:[%s4097_s2 + $0x40] sm:$0xff] (!%p2369_p10)  ;;  %v996_v55 = vld [vmem:[%s4097_s2 + $0x48] sm:$0xff] (!%p2369_p10)  ;;  %v974_v41 = vld [vmem:[#allocation2 + $0x98] sm:$0xff] (!%p2369_p10) }
 0x14a   : > { %v2618_v61 = vpop.f32.mrb[8].mxu0  ;;  %v2634_v62 = vpop.f32.mrb[8].mxu1  ;;  %2965 = vmatprep.subr.bf16.mxu0 (!%p2369_p10), %v2964_v46  ;;  %v2976_v56 = vpack.c.bf16 (!%p2369_p10), %v996_v55, %v995_v54  ;;  %v1281_v54 = vld [vmem:[%s4099_s4 + $0x70] sm:$0xff] (!%p2369_p10)  ;;  %v1282_v55 = vld [vmem:[%s4099_s4 + $0x78] sm:$0xff] (!%p2369_p10) }
 0x14b   : > { %v897_v1 = vadd.f32 %v2618_v61, %v552_v57  ;;  %v913_v2 = vadd.f32 %v2634_v62, %v568_v58  ;;  %v792_v3 = vpop.f32.mrb[9].mxu0  ;;  %v856_v4 = vpop.f32.mrb[9].mxu1  ;;  %v997_v57 = vld [vmem:[%s4097_s2 + $0x50] sm:$0xff] (!%p2369_p10)  ;;  %v998_v58 = vld [vmem:[%s4097_s2 + $0x58] sm:$0xff] (!%p2369_p10) }
 0x14c   : > { %v895_v7 = vadd.f32 %v792_v3, %v550_v59  ;;  %v911_v8 = vadd.f32 %v856_v4, %v566_v60  ;;  %v2619_v9 = vpop.f32.mrb[10].mxu0  ;;  %v2635_v10 = vpop.f32.mrb[10].mxu1  ;;  %v1267_v59 = vld [vmem:[%s4099_s4] sm:$0xff] (!%p2369_p10)  ;;  %v1268_v60 = vld [vmem:[%s4099_s4 + $0x8] sm:$0xff] (!%p2369_p10)  ;;  %v1269_v61 = vld [vmem:[%s4099_s4 + $0x10] sm:$0xff] (!%p2369_p10)  ;;  %v2980_v62 = vpack.c.bf16 (!%p2369_p10), %v998_v58, %v997_v57 }
 0x14d   : > { %929 = vst [vmem:[#allocation2 + $0x50] sm:$0xff] %v897_v1  ;;  %945 = vst [vmem:[#allocation2 + $0xd0] sm:$0xff] %v913_v2  ;;  %v898_v11 = vadd.f32 %v2619_v9, %v553_v63  ;;  %v914_v12 = vadd.f32 %v2635_v10, %v569_v0  ;;  %v795_v13 = vpop.f32.mrb[11].mxu0  ;;  %v859_v14 = vpop.f32.mrb[11].mxu1  ;;  %2967 = vmatpush3.bf16.msra.mxu0 (!%p2369_p10), %v2964_v46  ;;  %v999_v63 = vld [vmem:[%s4097_s2 + $0x60] sm:$0xff] (!%p2369_p10)  ;;  %v2992_v0 = vpack.c.bf16 (!%p2369_p10), %v1268_v60, %v1267_v59  ;;  %v1270_v1 = vld [vmem:[%s4099_s4 + $0x18] sm:$0xff] (!%p2369_p10) }
 0x14e   : > { %927 = vst [vmem:[#allocation2 + $0x40] sm:$0xff] %v895_v7  ;;  %943 = vst [vmem:[#allocation2 + $0xc0] sm:$0xff] %v911_v8  ;;  %v896_v15 = vadd.f32 %v795_v13, %v551_v5  ;;  %v912_v16 = vadd.f32 %v859_v14, %v567_v6  ;;  %2969 = vmatprep.subr.bf16.mxu0 (!%p2369_p10), %v2968_v49  ;;  %v1000_v2 = vld [vmem:[%s4097_s2 + $0x68] sm:$0xff] (!%p2369_p10)  ;;  %v2996_v3 = vpack.c.bf16 (!%p2369_p10), %v1270_v1, %v1269_v61  ;;  %v1271_v4 = vld [vmem:[%s4099_s4 + $0x20] sm:$0xff] (!%p2369_p10) }
 0x14f   : > { %930 = vst [vmem:[#allocation2 + $0x58] sm:$0xff] %v898_v11  ;;  %946 = vst [vmem:[#allocation2 + $0xd8] sm:$0xff] %v914_v12  ;;  %v1272_v5 = vld [vmem:[%s4099_s4 + $0x28] sm:$0xff] (!%p2369_p10)  ;;  %2993 = vmatprep.subr.bf16.mxu1 (!%p2369_p10), %v2992_v0  ;;  %v2984_v6 = vpack.c.bf16 (!%p2369_p10), %v1000_v2, %v999_v63  ;;  %v1001_v7 = vld [vmem:[%s4097_s2 + $0x70] sm:$0xff] (!%p2369_p10) }
 0x150   : > { %928 = vst [vmem:[#allocation2 + $0x48] sm:$0xff] %v896_v15  ;;  %944 = vst [vmem:[#allocation2 + $0xc8] sm:$0xff] %v912_v16  ;;  %2995 = vmatpush3.bf16.msra.mxu1 (!%p2369_p10), %v2992_v0  ;;  %v3000_v8 = vpack.c.bf16 (!%p2369_p10), %v1272_v5, %v1271_v4  ;;  %v1002_v9 = vld [vmem:[%s4097_s2 + $0x78] sm:$0xff] (!%p2369_p10)  ;;  %v1273_v10 = vld [vmem:[%s4099_s4 + $0x30] sm:$0xff] (!%p2369_p10) }
 0x151   : > { %2971 = vmatpush3.bf16.msra.mxu0 (!%p2369_p10), %v2968_v49  ;;  %2997 = vmatprep.subr.bf16.mxu1 (!%p2369_p10), %v2996_v3  ;;  %v1274_v11 = vld [vmem:[%s4099_s4 + $0x38] sm:$0xff] (!%p2369_p10)  ;;  %v2988_v12 = vpack.c.bf16 (!%p2369_p10), %v1002_v9, %v1001_v7  ;;  %v1275_v14 = vld [vmem:[%s4099_s4 + $0x40] sm:$0xff] (!%p2369_p10)  ;;  %v1276_v15 = vld [vmem:[%s4099_s4 + $0x48] sm:$0xff] (!%p2369_p10) }
 0x152   : > { %v2622_v21 = vpop.f32.mrb[12].mxu0  ;;  %v2638_v22 = vpop.f32.mrb[12].mxu1  ;;  %954 = sbr.rel (%p2369_p10) target bundleno = 1436 (0x59c), region = 105  ;;  %2973 = vmatprep.subr.bf16.mxu0 (!%p2369_p10), %v2972_v53  ;;  %v3004_v13 = vpack.c.bf16 (!%p2369_p10), %v1274_v11, %v1273_v10  ;;  %v3008_v16 = vpack.c.bf16 (!%p2369_p10), %v1276_v15, %v1275_v14  ;;  %v975_v42 = vld [vmem:[#allocation2 + $0xa0] sm:$0xff] (!%p2369_p10)  ;;  %v976_v43 = vld [vmem:[#allocation2 + $0xa8] sm:$0xff] (!%p2369_p10)  ;;  %v977_v44 = vld [vmem:[#allocation2 + $0xb0] sm:$0xff] (!%p2369_p10) }
 0x153   : > { %v901_v25 = vadd.f32 %v2622_v21, %v556_v17  ;;  %v917_v26 = vadd.f32 %v2638_v22, %v572_v18  ;;  %v808_v27 = vpop.f32.mrb[13].mxu0  ;;  %v872_v28 = vpop.f32.mrb[13].mxu1  ;;  %v1277_v17 = vld [vmem:[%s4099_s4 + $0x50] sm:$0xff] (!%p2369_p10)  ;;  %v1278_v18 = vld [vmem:[%s4099_s4 + $0x58] sm:$0xff] (!%p2369_p10)  ;;  %v1279_v22 = vld [vmem:[%s4099_s4 + $0x60] sm:$0xff] (!%p2369_p10) }
 0x154   : > { %v899_v31 = vadd.f32 %v808_v27, %v554_v19  ;;  %v915_v32 = vadd.f32 %v872_v28, %v570_v20  ;;  %v2623_v33 = vpop.f32.mrb[14].mxu0  ;;  %v2639_v34 = vpop.f32.mrb[14].mxu1  ;;  %2999 = vmatpush3.bf16.msra.mxu1 (!%p2369_p10), %v2996_v3  ;;  %v956_v19 = vld [vmem:[#allocation2 + $0x8] sm:$0xff] (!%p2369_p10)  ;;  %v957_v20 = vld [vmem:[#allocation2 + $0x10] sm:$0xff] (!%p2369_p10)  ;;  %v3012_v21 = vpack.c.bf16 (!%p2369_p10), %v1278_v18, %v1277_v17  ;;  %v978_v45 = vld [vmem:[#allocation2 + $0xb8] sm:$0xff] (!%p2369_p10) }
 0x155   : > { %933 = vst [vmem:[#allocation2 + $0x70] sm:$0xff] %v901_v25  ;;  %949 = vst [vmem:[#allocation2 + $0xf0] sm:$0xff] %v917_v26  ;;  %v902_v35 = vadd.f32 %v2623_v33, %v557_v23  ;;  %v918_v36 = vadd.f32 %v2639_v34, %v573_v24  ;;  %v811_v37 = vpop.f32.mrb[15].mxu0  ;;  %v875_v38 = vpop.f32.mrb[15].mxu1  ;;  %2975 = vmatpush3.bf16.msra.mxu0 (!%p2369_p10), %v2972_v53  ;;  %3001 = vmatprep.subr.bf16.mxu1 (!%p2369_p10), %v3000_v8  ;;  %v1280_v23 = vld [vmem:[%s4099_s4 + $0x68] sm:$0xff] (!%p2369_p10)  ;;  %v958_v24 = vld [vmem:[#allocation2 + $0x18] sm:$0xff] (!%p2369_p10) }
 0x156   : > { %931 = vst [vmem:[#allocation2 + $0x60] sm:$0xff] %v899_v31  ;;  %947 = vst [vmem:[#allocation2 + $0xe0] sm:$0xff] %v915_v32  ;;  %v900_v39 = vadd.f32 %v811_v37, %v555_v29  ;;  %v916_v40 = vadd.f32 %v875_v38, %v571_v30  ;;  %2977 = vmatprep.subr.bf16.mxu0 (!%p2369_p10), %v2976_v56  ;;  %v959_v25 = vld [vmem:[#allocation2 + $0x20] sm:$0xff] (!%p2369_p10)  ;;  %v3016_v26 = vpack.c.bf16 (!%p2369_p10), %v1280_v23, %v1279_v22  ;;  %v960_v27 = vld [vmem:[#allocation2 + $0x28] sm:$0xff] (!%p2369_p10) }
 0x157   : > { %934 = vst [vmem:[#allocation2 + $0x78] sm:$0xff] %v902_v35  ;;  %950 = vst [vmem:[#allocation2 + $0xf8] sm:$0xff] %v918_v36  ;;  %v961_v28 = vld [vmem:[#allocation2 + $0x30] sm:$0xff] (!%p2369_p10)  ;;  %v962_v29 = vld [vmem:[#allocation2 + $0x38] sm:$0xff] (!%p2369_p10) }
 0x158   : > { %932 = vst [vmem:[#allocation2 + $0x68] sm:$0xff] %v900_v39  ;;  %948 = vst [vmem:[#allocation2 + $0xe8] sm:$0xff] %v916_v40  ;;  %3003 = vmatpush3.bf16.msra.mxu1 (!%p2369_p10), %v3000_v8  ;;  %v963_v30 = vld [vmem:[#allocation2 + $0x40] sm:$0xff] (!%p2369_p10)  ;;  %v964_v31 = vld [vmem:[#allocation2 + $0x48] sm:$0xff] (!%p2369_p10) }
 0x159   : > { %2979 = vmatpush3.bf16.msra.mxu0 %v2976_v56  ;;  %3005 = vmatprep.subr.bf16.mxu1 %v3004_v13  ;;  %v965_v32 = vld [vmem:[#allocation2 + $0x50] sm:$0xff]  ;;  %v966_v33 = vld [vmem:[#allocation2 + $0x58] sm:$0xff]  ;;  %v971_v38 = vld [vmem:[#allocation2 + $0x80] sm:$0xff]  ;;  %v3020_v56 = vpack.c.bf16 %v1282_v55, %v1281_v54 }
 0x15a   : > { %2981 = vmatprep.subr.bf16.mxu0 %v2980_v62  ;;  %v972_v39 = vld [vmem:[#allocation2 + $0x88] sm:$0xff]  ;;  %v973_v40 = vld [vmem:[#allocation2 + $0x90] sm:$0xff]  ;;  %v979_v46 = vld [vmem:[#allocation2 + $0xc0] sm:$0xff] }
 0x15b   : > { %v980_v47 = vld [vmem:[#allocation2 + $0xc8] sm:$0xff]  ;;  %v981_v48 = vld [vmem:[#allocation2 + $0xd0] sm:$0xff]  ;;  %v982_v49 = vld [vmem:[#allocation2 + $0xd8] sm:$0xff] }
 0x15c   : > { %3007 = vmatpush3.bf16.msra.mxu1 %v3004_v13  ;;  %v969_v36 = vld [vmem:[#allocation2 + $0x70] sm:$0xff]  ;;  %v1515_v57 = vld [vmem:[%s4103_s8] sm:$0xff]  ;;  %v1516_v58 = vld [vmem:[%s4103_s8 + $0x8] sm:$0xff] }
 0x15d   : > { %2983 = vmatpush3.bf16.msra.mxu0 %v2980_v62  ;;  %3009 = vmatprep.subr.bf16.mxu1 %v3008_v16  ;;  %v967_v34 = vld [vmem:[#allocation2 + $0x60] sm:$0xff]  ;;  %v985_v52 = vld [vmem:[#allocation2 + $0xf0] sm:$0xff]  ;;  %v3024_v60 = vpack.c.bf16 %v1516_v58, %v1515_v57  ;;  %v1518_v61 = vld [vmem:[%s4103_s8 + $0x18] sm:$0xff] }
 0x15e   : > { %2985 = vmatprep.subr.bf16.mxu0 %v2984_v6  ;;  %v970_v37 = vld [vmem:[#allocation2 + $0x78] sm:$0xff]  ;;  %v983_v50 = vld [vmem:[#allocation2 + $0xe0] sm:$0xff]  ;;  %v1517_v59 = vld [vmem:[%s4103_s8 + $0x10] sm:$0xff] }
 0x15f   : > { %v968_v35 = vld [vmem:[#allocation2 + $0x68] sm:$0xff]  ;;  %v986_v53 = vld [vmem:[#allocation2 + $0xf8] sm:$0xff]  ;;  %v3028_v62 = vpack.c.bf16 %v1518_v61, %v1517_v59  ;;  %v1519_v63 = vld [vmem:[%s4103_s8 + $0x20] sm:$0xff] }
 0x160   : > { %3011 = vmatpush3.bf16.msra.mxu1 %v3008_v16  ;;  %v984_v51 = vld [vmem:[#allocation2 + $0xe8] sm:$0xff]  ;;  %v1521_v2 = vld [vmem:[%s4103_s8 + $0x30] sm:$0xff]  ;;  %v1522_v3 = vld [vmem:[%s4103_s8 + $0x38] sm:$0xff] }
 0x161   : > { %2987 = vmatpush3.bf16.msra.mxu0 %v2984_v6  ;;  %3013 = vmatprep.subr.bf16.mxu1 %v3012_v21  ;;  %v1520_v0 = vld [vmem:[%s4103_s8 + $0x28] sm:$0xff]  ;;  %v3494_v4 = vpack.c.bf16 %v1522_v3, %v1521_v2  ;;  %v1523_v5 = vld [vmem:[%s4103_s8 + $0x40] sm:$0xff]  ;;  %v1525_v8 = vld [vmem:[%s4103_s8 + $0x50] sm:$0xff] }
 0x162   : > { %2989 = vmatprep.subr.bf16.mxu0 %v2988_v12  ;;  %v3485_v1 = vpack.c.bf16 %v1520_v0, %v1519_v63  ;;  %v1524_v6 = vld [vmem:[%s4103_s8 + $0x48] sm:$0xff]  ;;  %v1526_v9 = vld [vmem:[%s4103_s8 + $0x58] sm:$0xff]  ;;  %v1527_v11 = vld [vmem:[%s4103_s8 + $0x60] sm:$0xff] }
 0x163   : > { %v3504_v7 = vpack.c.bf16 %v1524_v6, %v1523_v5  ;;  %v3514_v10 = vpack.c.bf16 %v1526_v9, %v1525_v8  ;;  %v1529_v14 = vld [vmem:[%s4103_s8 + $0x70] sm:$0xff]  ;;  %v1530_v15 = vld [vmem:[%s4103_s8 + $0x78] sm:$0xff]  ;;  %v3542_v17 = vld [vmem:[%s4098_s3] ss:$0 sm:$0xff] }
 0x164   : > { %3015 = vmatpush3.bf16.msra.mxu1 %v3012_v21  ;;  %v3534_v16 = vpack.c.bf16 %v1530_v15, %v1529_v14 }
 0x165   : > { %2991 = vmatpush3.bf16.msra.mxu0 %v2988_v12  ;;  %3017 = vmatprep.subr.bf16.mxu1 %v3016_v26  ;;  %v1528_v12 = vld [vmem:[%s4103_s8 + $0x68] sm:$0xff] }
 0x166   : > { %3025 = vmatprep.subr.bf16.mxu0 %v3024_v60  ;;  %v3524_v13 = vpack.c.bf16 %v1528_v12, %v1527_v11 }
 0x168   : > { %2673 = vmatmul.mubr.f32.vlgmr.msra.gmra.mrb[0].mxu0 %v956_v19  ;;  %3019 = vmatpush3.bf16.msra.mxu1 %v3016_v26 }
 0x169   : > { %2675 = vmatprep.mubr.f32.mxu0 %v957_v20  ;;  %3021 = vmatprep.subr.bf16.mxu1 %v3020_v56 }
 0x16a   : > { %3027 = vmatpush3.bf16.msra.mxu0 %v3024_v60 }
 0x16b   : > { %3029 = vmatprep.subr.bf16.mxu0 %v3028_v62 }
 0x16c   : > { %2676 = vmatmul.mubr.f32.gmra.mrb[2].mxu0 %v958_v24  ;;  %3023 = vmatpush3.bf16.msra.mxu1 %v3020_v56 }
 0x16d   : > { %2678 = vmatprep.mubr.f32.mxu0 %v959_v25  ;;  %3057 = vmatprep.subr.bf16.mxu1 %v3024_v60 }
 0x16e   : > { %3031 = vmatpush3.bf16.msra.mxu0 %v3028_v62 }
 0x16f   : > { %3033 = vmatprep.subr.bf16.mxu0 %v3485_v1 }
 0x170   : > { %2679 = vmatmul.mubr.f32.gmra.mrb[4].mxu0 %v960_v27 }
 0x171   : > { %2681 = vmatprep.mubr.f32.mxu0 %v961_v28 }
 0x172   : > { %3035 = vmatpush3.bf16.msra.mxu0 %v3485_v1 }
 0x173   : > { %3037 = vmatprep.subr.bf16.mxu0 %v3494_v4 }
 0x174   : > { %2682 = vmatmul.mubr.f32.gmra.mrb[6].mxu0 %v962_v29 }
 0x175   : > { %2684 = vmatprep.mubr.f32.mxu0 %v963_v30 }
 0x176   : > { %3039 = vmatpush3.bf16.msra.mxu0 %v3494_v4 }
 0x177   : > { %3041 = vmatprep.subr.bf16.mxu0 %v3504_v7 }
 0x178   : > { %2685 = vmatmul.mubr.f32.gmra.mrb[8].mxu0 %v964_v31 }
 0x179   : > { %2687 = vmatprep.mubr.f32.mxu0 %v965_v32 }
 0x17a   : > { %3043 = vmatpush3.bf16.msra.mxu0 %v3504_v7 }
 0x17b   : > { %3045 = vmatprep.subr.bf16.mxu0 %v3514_v10 }
 0x17c   : > { %2688 = vmatmul.mubr.f32.gmra.mrb[10].mxu0 %v966_v33 }
 0x17d   : > { %2690 = vmatprep.mubr.f32.mxu0 %v967_v34 }
 0x17e   : > { %3047 = vmatpush3.bf16.msra.mxu0 %v3514_v10 }
 0x17f   : > { %3049 = vmatprep.subr.bf16.mxu0 %v3524_v13 }
 0x180   : > { %2691 = vmatmul.mubr.f32.gmra.mrb[12].mxu0 %v968_v35 }
 0x181   : > { %2693 = vmatprep.mubr.f32.mxu0 %v969_v36 }
 0x182   : > { %3051 = vmatpush3.bf16.msra.mxu0 %v3524_v13 }
 0x183   : > { %3053 = vmatprep.subr.bf16.mxu0 %v3534_v16 }
 0x184   : > { %2694 = vmatmul.mubr.f32.gmra.mrb[14].mxu0 %v970_v37 }
 0x185   : > { %2696 = vmatprep.mubr.f32.mxu0 %v971_v38 }
 0x186   : > { %3055 = vmatpush3.bf16.msra.mxu0 %v3534_v16 }
 0x188   : > { %2697 = vmatmul.mubr.f32.gmra.mrb[16].mxu0 %v972_v39 }
 0x189   : > { %2699 = vmatprep.mubr.f32.mxu0 %v973_v40 }
 0x18c   : > { %2700 = vmatmul.mubr.f32.gmra.mrb[18].mxu0 %v974_v41 }
 0x18d   : > { %2702 = vmatprep.mubr.f32.mxu0 %v975_v42 }
 0x190   : > { %2703 = vmatmul.mubr.f32.gmra.mrb[20].mxu0 %v976_v43 }
 0x191   : > { %2705 = vmatprep.mubr.f32.mxu0 %v977_v44 }
 0x194   : > { %2706 = vmatmul.mubr.f32.gmra.mrb[22].mxu0 %v978_v45 }
 0x195   : > { %2708 = vmatprep.mubr.f32.mxu0 %v979_v46 }
 0x198   : > { %2709 = vmatmul.mubr.f32.gmra.mrb[24].mxu0 %v980_v47 }
 0x199   : > { %2711 = vmatprep.mubr.f32.mxu0 %v981_v48 }
 0x19c   : > { %2712 = vmatmul.mubr.f32.gmra.mrb[26].mxu0 %v982_v49 }
 0x19d   : > { %2714 = vmatprep.mubr.f32.mxu0 %v983_v50 }
 0x1a0   : > { %2715 = vmatmul.mubr.f32.gmra.mrb[28].mxu0 %v984_v51 }
 0x1a1   : > { %2717 = vmatprep.mubr.f32.mxu0 %v985_v52 }
 0x1a4   : > { %2718 = vmatmul.mubr.f32.gmra.mrb[30].mxu0 %v986_v53 }
 0x23b   : > { %v2674_v18 = vpop.f32.mrb[0].mxu0 }
 0x23c   : > { %v1082_v19 = vadd.f32 %v2674_v18, %v3542_v17  ;;  %v1076_v20 = vpop.f32.mrb[1].mxu0 }
 0x23d   : > { %v1077_v21 = vadd.f32 %v3542_v17, %v1076_v20 }
 0x23e   : > { %v1236_v24 = vmax.f32 %v1082_v19, 0.0 }
 0x23f   : > { %v2677_v22 = vpop.f32.mrb[2].mxu0  ;;  %v1235_v23 = vmax.f32 %v1077_v21, 0.0 }
 0x240   : > { %v1092_v25 = vadd.f32 %v2677_v22, %v3542_v17  ;;  %v1086_v26 = vpop.f32.mrb[3].mxu0 }
 0x241   : > { %v1087_v27 = vadd.f32 %v3542_v17, %v1086_v26  ;;  %2752 = vmatprep.mubr.f32.mxu1 %v1235_v23 }
 0x242   : > { %2753 = vmatmul.mubr.f32.vlgmr.msra.gmra.mrb[0].mxu1 %v1236_v24  ;;  %v1238_v30 = vmax.f32 %v1092_v25, 0.0 }
 0x243   : > { %v1237_v28 = vmax.f32 %v1087_v27, 0.0  ;;  %v2680_v29 = vpop.f32.mrb[4].mxu0  ;;  %3059 = vmatpush3.bf16.msra.mxu1 %v3024_v60 }
 0x244   : > { %v1102_v31 = vadd.f32 %v2680_v29, %v3542_v17  ;;  %v1096_v32 = vpop.f32.mrb[5].mxu0  ;;  %3061 = vmatprep.subr.bf16.mxu1 %v3028_v62 }
 0x245   : > { %v1097_v33 = vadd.f32 %v3542_v17, %v1096_v32  ;;  %2755 = vmatprep.mubr.f32.mxu1 %v1237_v28 }
 0x246   : > { %2756 = vmatmul.mubr.f32.gmra.mrb[2].mxu1 %v1238_v30  ;;  %v1240_v36 = vmax.f32 %v1102_v31, 0.0 }
 0x247   : > { %v1239_v34 = vmax.f32 %v1097_v33, 0.0  ;;  %v2683_v35 = vpop.f32.mrb[6].mxu0  ;;  %3063 = vmatpush3.bf16.msra.mxu1 %v3028_v62 }
 0x248   : > { %v1112_v37 = vadd.f32 %v2683_v35, %v3542_v17  ;;  %v1106_v38 = vpop.f32.mrb[7].mxu0  ;;  %3065 = vmatprep.subr.bf16.mxu1 %v3485_v1 }
 0x249   : > { %v1107_v39 = vadd.f32 %v3542_v17, %v1106_v38  ;;  %2758 = vmatprep.mubr.f32.mxu1 %v1239_v34 }
 0x24a   : > { %2759 = vmatmul.mubr.f32.gmra.mrb[4].mxu1 %v1240_v36  ;;  %v1242_v42 = vmax.f32 %v1112_v37, 0.0 }
 0x24b   : > { %v1241_v40 = vmax.f32 %v1107_v39, 0.0  ;;  %v2686_v41 = vpop.f32.mrb[8].mxu0  ;;  %3067 = vmatpush3.bf16.msra.mxu1 %v3485_v1 }
 0x24c   : > { %v1122_v43 = vadd.f32 %v2686_v41, %v3542_v17  ;;  %v1116_v44 = vpop.f32.mrb[9].mxu0  ;;  %3069 = vmatprep.subr.bf16.mxu1 %v3494_v4 }
 0x24d   : > { %v1117_v45 = vadd.f32 %v3542_v17, %v1116_v44  ;;  %2761 = vmatprep.mubr.f32.mxu1 %v1241_v40 }
 0x24e   : > { %2762 = vmatmul.mubr.f32.gmra.mrb[6].mxu1 %v1242_v42  ;;  %v1244_v48 = vmax.f32 %v1122_v43, 0.0 }
 0x24f   : > { %v1243_v46 = vmax.f32 %v1117_v45, 0.0  ;;  %v2689_v47 = vpop.f32.mrb[10].mxu0  ;;  %3071 = vmatpush3.bf16.msra.mxu1 %v3494_v4 }
 0x250   : > { %v1132_v49 = vadd.f32 %v2689_v47, %v3542_v17  ;;  %v1126_v50 = vpop.f32.mrb[11].mxu0  ;;  %3073 = vmatprep.subr.bf16.mxu1 %v3504_v7 }
 0x251   : > { %v1127_v51 = vadd.f32 %v3542_v17, %v1126_v50  ;;  %2764 = vmatprep.mubr.f32.mxu1 %v1243_v46 }
 0x252   : > { %2765 = vmatmul.mubr.f32.gmra.mrb[8].mxu1 %v1244_v48  ;;  %v1246_v54 = vmax.f32 %v1132_v49, 0.0 }
 0x253   : > { %v1245_v52 = vmax.f32 %v1127_v51, 0.0  ;;  %v2692_v53 = vpop.f32.mrb[12].mxu0  ;;  %3075 = vmatpush3.bf16.msra.mxu1 %v3504_v7  ;;  %v3591_v51 = vld [vmem:[%s4100_s5] ss:$0 sm:$0xff] }
 0x254   : > { %v1142_v55 = vadd.f32 %v2692_v53, %v3542_v17  ;;  %v1136_v56 = vpop.f32.mrb[13].mxu0  ;;  %3077 = vmatprep.subr.bf16.mxu1 %v3514_v10 }
 0x255   : > { %v1137_v57 = vadd.f32 %v3542_v17, %v1136_v56  ;;  %2767 = vmatprep.mubr.f32.mxu1 %v1245_v52 }
 0x256   : > { %2768 = vmatmul.mubr.f32.gmra.mrb[10].mxu1 %v1246_v54  ;;  %v1248_v60 = vmax.f32 %v1142_v55, 0.0 }
 0x257   : > { %v1247_v58 = vmax.f32 %v1137_v57, 0.0  ;;  %v2695_v59 = vpop.f32.mrb[14].mxu0  ;;  %3079 = vmatpush3.bf16.msra.mxu1 %v3514_v10 }
 0x258   : > { %v1152_v61 = vadd.f32 %v2695_v59, %v3542_v17  ;;  %v1146_v62 = vpop.f32.mrb[15].mxu0  ;;  %3081 = vmatprep.subr.bf16.mxu1 %v3524_v13 }
 0x259   : > { %v1147_v63 = vadd.f32 %v3542_v17, %v1146_v62  ;;  %2770 = vmatprep.mubr.f32.mxu1 %v1247_v58 }
 0x25a   : > { %2771 = vmatmul.mubr.f32.gmra.mrb[12].mxu1 %v1248_v60  ;;  %v1250_v2 = vmax.f32 %v1152_v61, 0.0 }
 0x25b   : > { %v1249_v0 = vmax.f32 %v1147_v63, 0.0  ;;  %v2698_v1 = vpop.f32.mrb[16].mxu0  ;;  %3083 = vmatpush3.bf16.msra.mxu1 %v3524_v13 }
 0x25c   : > { %v1162_v3 = vadd.f32 %v2698_v1, %v3542_v17  ;;  %v1156_v4 = vpop.f32.mrb[17].mxu0  ;;  %3085 = vmatprep.subr.bf16.mxu1 %v3534_v16 }
 0x25d   : > { %v1157_v5 = vadd.f32 %v3542_v17, %v1156_v4  ;;  %2773 = vmatprep.mubr.f32.mxu1 %v1249_v0 }
 0x25e   : > { %2774 = vmatmul.mubr.f32.gmra.mrb[14].mxu1 %v1250_v2  ;;  %v1252_v8 = vmax.f32 %v1162_v3, 0.0 }
 0x25f   : > { %v1251_v6 = vmax.f32 %v1157_v5, 0.0  ;;  %v2701_v7 = vpop.f32.mrb[18].mxu0  ;;  %3087 = vmatpush3.bf16.msra.mxu1 %v3534_v16 }
 0x260   : > { %v1172_v9 = vadd.f32 %v2701_v7, %v3542_v17  ;;  %v1166_v10 = vpop.f32.mrb[19].mxu0 }
 0x261   : > { %v1167_v11 = vadd.f32 %v3542_v17, %v1166_v10  ;;  %2776 = vmatprep.mubr.f32.mxu1 %v1251_v6 }
 0x262   : > { %2777 = vmatmul.mubr.f32.gmra.mrb[16].mxu1 %v1252_v8  ;;  %v1254_v14 = vmax.f32 %v1172_v9, 0.0 }
 0x263   : > { %v1253_v12 = vmax.f32 %v1167_v11, 0.0  ;;  %v2704_v13 = vpop.f32.mrb[20].mxu0 }
 0x264   : > { %v1182_v15 = vadd.f32 %v2704_v13, %v3542_v17  ;;  %v1176_v18 = vpop.f32.mrb[21].mxu0 }
 0x265   : > { %v1177_v19 = vadd.f32 %v3542_v17, %v1176_v18  ;;  %2779 = vmatprep.mubr.f32.mxu1 %v1253_v12 }
 0x266   : > { %2780 = vmatmul.mubr.f32.gmra.mrb[18].mxu1 %v1254_v14  ;;  %v1256_v21 = vmax.f32 %v1182_v15, 0.0 }
 0x267   : > { %v1255_v20 = vmax.f32 %v1177_v19, 0.0  ;;  %v2707_v16 = vpop.f32.mrb[22].mxu0 }
 0x268   : > { %v1192_v22 = vadd.f32 %v2707_v16, %v3542_v17  ;;  %v1186_v23 = vpop.f32.mrb[23].mxu0 }
 0x269   : > { %v1187_v24 = vadd.f32 %v3542_v17, %v1186_v23  ;;  %2782 = vmatprep.mubr.f32.mxu1 %v1255_v20 }
 0x26a   : > { %2783 = vmatmul.mubr.f32.gmra.mrb[20].mxu1 %v1256_v21  ;;  %v1258_v27 = vmax.f32 %v1192_v22, 0.0 }
 0x26b   : > { %v1257_v25 = vmax.f32 %v1187_v24, 0.0  ;;  %v2710_v26 = vpop.f32.mrb[24].mxu0 }
 0x26c   : > { %v1202_v28 = vadd.f32 %v2710_v26, %v3542_v17  ;;  %v1196_v29 = vpop.f32.mrb[25].mxu0 }
 0x26d   : > { %v1197_v30 = vadd.f32 %v3542_v17, %v1196_v29  ;;  %2785 = vmatprep.mubr.f32.mxu1 %v1257_v25 }
 0x26e   : > { %2786 = vmatmul.mubr.f32.gmra.mrb[22].mxu1 %v1258_v27  ;;  %v1260_v33 = vmax.f32 %v1202_v28, 0.0 }
 0x26f   : > { %v1259_v31 = vmax.f32 %v1197_v30, 0.0  ;;  %v2713_v32 = vpop.f32.mrb[26].mxu0 }
 0x270   : > { %v1212_v34 = vadd.f32 %v2713_v32, %v3542_v17  ;;  %v1206_v35 = vpop.f32.mrb[27].mxu0 }
 0x271   : > { %v1207_v36 = vadd.f32 %v3542_v17, %v1206_v35  ;;  %2788 = vmatprep.mubr.f32.mxu1 %v1259_v31 }
 0x272   : > { %2789 = vmatmul.mubr.f32.gmra.mrb[24].mxu1 %v1260_v33  ;;  %v1262_v39 = vmax.f32 %v1212_v34, 0.0 }
 0x273   : > { %v1261_v37 = vmax.f32 %v1207_v36, 0.0  ;;  %v2716_v38 = vpop.f32.mrb[28].mxu0 }
 0x274   : > { %v1222_v40 = vadd.f32 %v2716_v38, %v3542_v17  ;;  %v1216_v41 = vpop.f32.mrb[29].mxu0 }
 0x275   : > { %v1217_v42 = vadd.f32 %v3542_v17, %v1216_v41  ;;  %2791 = vmatprep.mubr.f32.mxu1 %v1261_v37 }
 0x276   : > { %2792 = vmatmul.mubr.f32.gmra.mrb[26].mxu1 %v1262_v39  ;;  %v1264_v45 = vmax.f32 %v1222_v40, 0.0 }
 0x277   : > { %v1263_v43 = vmax.f32 %v1217_v42, 0.0  ;;  %v2719_v44 = vpop.f32.mrb[30].mxu0 }
 0x278   : > { %v1232_v46 = vadd.f32 %v2719_v44, %v3542_v17  ;;  %v1226_v47 = vpop.f32.mrb[31].mxu0 }
 0x279   : > { %v1227_v48 = vadd.f32 %v3542_v17, %v1226_v47  ;;  %2794 = vmatprep.mubr.f32.mxu1 %v1263_v43 }
 0x27a   : > { %2795 = vmatmul.mubr.f32.gmra.mrb[28].mxu1 %v1264_v45  ;;  %v1266_v50 = vmax.f32 %v1232_v46, 0.0 }
 0x27b   : > { %v1265_v49 = vmax.f32 %v1227_v48, 0.0 }
 0x27d   : > { %2797 = vmatprep.mubr.f32.mxu1 %v1265_v49 }
 0x27e   : > { %2798 = vmatmul.mubr.f32.gmra.mrb[30].mxu1 %v1266_v50 }
 0x315   : > { %v2754_v52 = vpop.f32.mrb[0].mxu1 }
 0x316   : > { %v1356_v53 = vpop.f32.mrb[1].mxu1  ;;  %v3597_v55 = vadd.f32 %v2754_v52, %v3591_v51 }
 0x317   : > { %v3594_v54 = vadd.f32 %v3591_v51, %v1356_v53 }
 0x319   : > { %v2757_v17 = vpop.f32.mrb[2].mxu1  ;;  %2832 = vmatprep.mubr.f32.mxu0 %v3594_v54 }
 0x31a   : > { %v1366_v56 = vpop.f32.mrb[3].mxu1  ;;  %2833 = vmatmul.mubr.f32.vlgmr.msra.gmra.mrb[32].mxu0 %v3597_v55  ;;  %v3605_v58 = vadd.f32 %v2757_v17, %v3591_v51 }
 0x31b   : > { %v3602_v57 = vadd.f32 %v3591_v51, %v1366_v56 }
 0x31d   : > { %v2760_v59 = vpop.f32.mrb[4].mxu1  ;;  %2835 = vmatprep.mubr.f32.mxu0 %v3602_v57 }
 0x31e   : > { %v1376_v60 = vpop.f32.mrb[5].mxu1  ;;  %2836 = vmatmul.mubr.f32.gmra.mrb[34].mxu0 %v3605_v58  ;;  %v3613_v62 = vadd.f32 %v2760_v59, %v3591_v51 }
 0x31f   : > { %v3610_v61 = vadd.f32 %v3591_v51, %v1376_v60 }
 0x321   : > { %v2763_v63 = vpop.f32.mrb[6].mxu1  ;;  %2838 = vmatprep.mubr.f32.mxu0 %v3610_v61 }
 0x322   : > { %v1386_v0 = vpop.f32.mrb[7].mxu1  ;;  %2839 = vmatmul.mubr.f32.gmra.mrb[36].mxu0 %v3613_v62  ;;  %v3621_v2 = vadd.f32 %v2763_v63, %v3591_v51 }
 0x323   : > { %v3618_v1 = vadd.f32 %v3591_v51, %v1386_v0 }
 0x325   : > { %v2766_v3 = vpop.f32.mrb[8].mxu1  ;;  %2841 = vmatprep.mubr.f32.mxu0 %v3618_v1 }
 0x326   : > { %v1396_v4 = vpop.f32.mrb[9].mxu1  ;;  %2842 = vmatmul.mubr.f32.gmra.mrb[38].mxu0 %v3621_v2  ;;  %v3629_v6 = vadd.f32 %v2766_v3, %v3591_v51 }
 0x327   : > { %v3626_v5 = vadd.f32 %v3591_v51, %v1396_v4 }
 0x329   : > { %v2769_v7 = vpop.f32.mrb[10].mxu1  ;;  %2844 = vmatprep.mubr.f32.mxu0 %v3626_v5 }
 0x32a   : > { %v1406_v8 = vpop.f32.mrb[11].mxu1  ;;  %2845 = vmatmul.mubr.f32.gmra.mrb[40].mxu0 %v3629_v6  ;;  %v3637_v10 = vadd.f32 %v2769_v7, %v3591_v51 }
 0x32b   : > { %v3634_v9 = vadd.f32 %v3591_v51, %v1406_v8 }
 0x32d   : > { %v2772_v11 = vpop.f32.mrb[12].mxu1  ;;  %2847 = vmatprep.mubr.f32.mxu0 %v3634_v9 }
 0x32e   : > { %v1416_v12 = vpop.f32.mrb[13].mxu1  ;;  %2848 = vmatmul.mubr.f32.gmra.mrb[42].mxu0 %v3637_v10  ;;  %v3645_v14 = vadd.f32 %v2772_v11, %v3591_v51 }
 0x32f   : > { %v3642_v13 = vadd.f32 %v3591_v51, %v1416_v12 }
 0x331   : > { %v2775_v15 = vpop.f32.mrb[14].mxu1  ;;  %2850 = vmatprep.mubr.f32.mxu0 %v3642_v13 }
 0x332   : > { %v1426_v18 = vpop.f32.mrb[15].mxu1  ;;  %2851 = vmatmul.mubr.f32.gmra.mrb[44].mxu0 %v3645_v14  ;;  %v3653_v20 = vadd.f32 %v2775_v15, %v3591_v51 }
 0x333   : > { %v3650_v19 = vadd.f32 %v3591_v51, %v1426_v18 }
 0x335   : > { %v2778_v16 = vpop.f32.mrb[16].mxu1  ;;  %2853 = vmatprep.mubr.f32.mxu0 %v3650_v19 }
 0x336   : > { %v1436_v21 = vpop.f32.mrb[17].mxu1  ;;  %2854 = vmatmul.mubr.f32.gmra.mrb[46].mxu0 %v3653_v20  ;;  %v3661_v23 = vadd.f32 %v2778_v16, %v3591_v51 }
 0x337   : > { %v3658_v22 = vadd.f32 %v3591_v51, %v1436_v21 }
 0x339   : > { %v2781_v24 = vpop.f32.mrb[18].mxu1  ;;  %2856 = vmatprep.mubr.f32.mxu0 %v3658_v22 }
 0x33a   : > { %v1446_v25 = vpop.f32.mrb[19].mxu1  ;;  %2857 = vmatmul.mubr.f32.gmra.mrb[48].mxu0 %v3661_v23  ;;  %v3669_v27 = vadd.f32 %v2781_v24, %v3591_v51 }
 0x33b   : > { %v3666_v26 = vadd.f32 %v3591_v51, %v1446_v25 }
 0x33d   : > { %v2784_v28 = vpop.f32.mrb[20].mxu1  ;;  %2859 = vmatprep.mubr.f32.mxu0 %v3666_v26 }
 0x33e   : > { %v1456_v29 = vpop.f32.mrb[21].mxu1  ;;  %2860 = vmatmul.mubr.f32.gmra.mrb[50].mxu0 %v3669_v27  ;;  %v3677_v31 = vadd.f32 %v2784_v28, %v3591_v51 }
 0x33f   : > { %v3674_v30 = vadd.f32 %v3591_v51, %v1456_v29 }
 0x341   : > { %v2787_v32 = vpop.f32.mrb[22].mxu1  ;;  %2862 = vmatprep.mubr.f32.mxu0 %v3674_v30 }
 0x342   : > { %v1466_v33 = vpop.f32.mrb[23].mxu1  ;;  %2863 = vmatmul.mubr.f32.gmra.mrb[52].mxu0 %v3677_v31  ;;  %v3685_v35 = vadd.f32 %v2787_v32, %v3591_v51 }
 0x343   : > { %v3682_v34 = vadd.f32 %v3591_v51, %v1466_v33 }
 0x345   : > { %v2790_v36 = vpop.f32.mrb[24].mxu1  ;;  %2865 = vmatprep.mubr.f32.mxu0 %v3682_v34 }
 0x346   : > { %v1476_v37 = vpop.f32.mrb[25].mxu1  ;;  %2866 = vmatmul.mubr.f32.gmra.mrb[54].mxu0 %v3685_v35  ;;  %v3693_v39 = vadd.f32 %v2790_v36, %v3591_v51 }
 0x347   : > { %v3690_v38 = vadd.f32 %v3591_v51, %v1476_v37 }
 0x349   : > { %v2793_v40 = vpop.f32.mrb[26].mxu1  ;;  %2868 = vmatprep.mubr.f32.mxu0 %v3690_v38 }
 0x34a   : > { %v1486_v41 = vpop.f32.mrb[27].mxu1  ;;  %2869 = vmatmul.mubr.f32.gmra.mrb[56].mxu0 %v3693_v39  ;;  %v3701_v43 = vadd.f32 %v2793_v40, %v3591_v51 }
 0x34b   : > { %v3698_v42 = vadd.f32 %v3591_v51, %v1486_v41 }
 0x34d   : > { %v2796_v44 = vpop.f32.mrb[28].mxu1  ;;  %2871 = vmatprep.mubr.f32.mxu0 %v3698_v42 }
 0x34e   : > { %v1496_v45 = vpop.f32.mrb[29].mxu1  ;;  %2872 = vmatmul.mubr.f32.gmra.mrb[58].mxu0 %v3701_v43  ;;  %v3709_v47 = vadd.f32 %v2796_v44, %v3591_v51 }
 0x34f   : > { %v3706_v46 = vadd.f32 %v3591_v51, %v1496_v45 }
 0x351   : > { %v2799_v48 = vpop.f32.mrb[30].mxu1  ;;  %2874 = vmatprep.mubr.f32.mxu0 %v3706_v46 }
 0x352   : > { %v1506_v49 = vpop.f32.mrb[31].mxu1  ;;  %2875 = vmatmul.mubr.f32.gmra.mrb[60].mxu0 %v3709_v47  ;;  %v3717_v52 = vadd.f32 %v2799_v48, %v3591_v51 }
 0x353   : > { %v3714_v50 = vadd.f32 %v3591_v51, %v1506_v49 }
 0x355   : > { %2877 = vmatprep.mubr.f32.mxu0 %v3714_v50 }
 0x356   : > { %2878 = vmatmul.mubr.f32.gmra.mrb[62].mxu0 %v3717_v52 }
 0x3ed   : > { %v2834_v53 = vpop.f32.mrb[32].mxu0 }
 0x3ee   : > { %v1597_v17 = vpop.f32.mrb[33].mxu0 }
 0x3ef   : > { %v1756_v56 = vadd.f32 %v2834_v53, %v1597_v17 }
 0x3f1   : > { %v2837_v59 = vpop.f32.mrb[34].mxu0 }
 0x3f2   : > { %v1607_v60 = vpop.f32.mrb[35].mxu0 }
 0x3f3   : > { %v1757_v63 = vadd.f32 %v1756_v56, %v1607_v60 }
 0x3f5   : > { %v2840_v0 = vpop.f32.mrb[36].mxu0  ;;  %v1758_v3 = vadd.f32 %v2837_v59, %v1757_v63 }
 0x3f6   : > { %v1617_v4 = vpop.f32.mrb[37].mxu0 }
 0x3f7   : > { %v1759_v7 = vadd.f32 %v1758_v3, %v1617_v4 }
 0x3f9   : > { %v2843_v8 = vpop.f32.mrb[38].mxu0  ;;  %v1760_v11 = vadd.f32 %v2840_v0, %v1759_v7 }
 0x3fa   : > { %v1627_v12 = vpop.f32.mrb[39].mxu0 }
 0x3fb   : > { %v1761_v15 = vadd.f32 %v1760_v11, %v1627_v12 }
 0x3fd   : > { %v2846_v51 = vpop.f32.mrb[40].mxu0  ;;  %v1762_v18 = vadd.f32 %v2843_v8, %v1761_v15 }
 0x3fe   : > { %v1637_v16 = vpop.f32.mrb[41].mxu0 }
 0x3ff   : > { %v1763_v21 = vadd.f32 %v1762_v18, %v1637_v16 }
 0x401   : > { %v2849_v24 = vpop.f32.mrb[42].mxu0  ;;  %v1764_v25 = vadd.f32 %v2846_v51, %v1763_v21 }
 0x402   : > { %v1647_v28 = vpop.f32.mrb[43].mxu0 }
 0x403   : > { %v1765_v29 = vadd.f32 %v1764_v25, %v1647_v28 }
 0x405   : > { %v2852_v32 = vpop.f32.mrb[44].mxu0  ;;  %v1766_v33 = vadd.f32 %v2849_v24, %v1765_v29 }
 0x406   : > { %v1657_v36 = vpop.f32.mrb[45].mxu0 }
 0x407   : > { %v1767_v37 = vadd.f32 %v1766_v33, %v1657_v36 }
 0x409   : > { %v2855_v40 = vpop.f32.mrb[46].mxu0  ;;  %v1768_v41 = vadd.f32 %v2852_v32, %v1767_v37 }
 0x40a   : > { %v1667_v44 = vpop.f32.mrb[47].mxu0 }
 0x40b   : > { %v1769_v45 = vadd.f32 %v1768_v41, %v1667_v44 }
 0x40d   : > { %v2858_v48 = vpop.f32.mrb[48].mxu0  ;;  %v1770_v49 = vadd.f32 %v2855_v40, %v1769_v45 }
 0x40e   : > { %v1677_v53 = vpop.f32.mrb[49].mxu0 }
 0x40f   : > { %v1771_v17 = vadd.f32 %v1770_v49, %v1677_v53 }
 0x411   : > { %v2861_v56 = vpop.f32.mrb[50].mxu0  ;;  %v1772_v59 = vadd.f32 %v2858_v48, %v1771_v17 }
 0x412   : > { %v1687_v60 = vpop.f32.mrb[51].mxu0 }
 0x413   : > { %v1773_v63 = vadd.f32 %v1772_v59, %v1687_v60 }
 0x415   : > { %v2864_v0 = vpop.f32.mrb[52].mxu0  ;;  %v1774_v3 = vadd.f32 %v2861_v56, %v1773_v63 }
 0x416   : > { %v1697_v4 = vpop.f32.mrb[53].mxu0 }
 0x417   : > { %v1775_v7 = vadd.f32 %v1774_v3, %v1697_v4 }
 0x419   : > { %v2867_v8 = vpop.f32.mrb[54].mxu0  ;;  %v1776_v11 = vadd.f32 %v2864_v0, %v1775_v7 }
 0x41a   : > { %v1707_v12 = vpop.f32.mrb[55].mxu0 }
 0x41b   : > { %v1777_v15 = vadd.f32 %v1776_v11, %v1707_v12 }
 0x41d   : > { %v2870_v51 = vpop.f32.mrb[56].mxu0  ;;  %v1778_v18 = vadd.f32 %v2867_v8, %v1777_v15 }
 0x41e   : > { %v1717_v16 = vpop.f32.mrb[57].mxu0 }
 0x41f   : > { %v1779_v21 = vadd.f32 %v1778_v18, %v1717_v16 }
 0x421   : > { %v2873_v24 = vpop.f32.mrb[58].mxu0  ;;  %v1780_v25 = vadd.f32 %v2870_v51, %v1779_v21 }
 0x422   : > { %v1727_v28 = vpop.f32.mrb[59].mxu0 }
 0x423   : > { %v1781_v29 = vadd.f32 %v1780_v25, %v1727_v28 }
 0x425   : > { %v2876_v32 = vpop.f32.mrb[60].mxu0  ;;  %v1782_v33 = vadd.f32 %v2873_v24, %v1781_v29 }
 0x426   : > { %v1737_v36 = vpop.f32.mrb[61].mxu0 }
 0x427   : > { %v1783_v37 = vadd.f32 %v1782_v33, %v1737_v36 }
 0x429   : > { %v2879_v40 = vpop.f32.mrb[62].mxu0  ;;  %v1784_v41 = vadd.f32 %v2876_v32, %v1783_v37 }
 0x42a   : > { %v1747_v44 = vpop.f32.mrb[63].mxu0 }
 0x42b   : > { %v1785_v45 = vadd.f32 %v1784_v41, %v1747_v44 }
 0x42d   : > { %v1786_v48 = vadd.f32 %v2879_v40, %v1785_v45 }
 0x42f   : > { %v1787_v49 = vrot.slane %v1786_v48, 4 }
 0x431   : > { %v1788_v53 = vadd.f32 %v1787_v49, %v1786_v48 }
 0x433   : > { %v1789_v17 = vrot.slane %v1788_v53, 2 }
 0x435   : > { %v1790_v56 = vadd.f32 %v1789_v17, %v1788_v53 }
 0x437   : > { %v1791_v59 = vrot.slane %v1790_v56, 1 }
 0x439   : > { %v1792_v60 = vadd.f32 %v1791_v59, %v1790_v56 }
 0x43b   : > { %v3721_v63 = vmul.f32 0.001953125, %v1792_v60 }
 0x43d   : > { %v3725_v0 = vsub.f32 %v3594_v54, %v3721_v63  ;;  %v3729_v3 = vsub.f32 %v3597_v55, %v3721_v63  ;;  %v3733_v4 = vsub.f32 %v3602_v57, %v3721_v63  ;;  %v3741_v11 = vsub.f32 %v3605_v58, %v3721_v63 }
 0x43e   : > { %v3745_v54 = vsub.f32 %v3610_v61, %v3721_v63  ;;  %v3751_v57 = vsub.f32 %v3613_v62, %v3721_v63  ;;  %v3757_v58 = vsub.f32 %v3618_v1, %v3721_v63  ;;  %v3763_v15 = vsub.f32 %v3621_v2, %v3721_v63 }
 0x43f   : > { %v1827_v7 = vmul.f32 %v3729_v3, %v3729_v3  ;;  %v1826_v8 = vmul.f32 %v3725_v0, %v3725_v0  ;;  %v1828_v55 = vmul.f32 %v3733_v4, %v3733_v4  ;;  %v1829_v12 = vmul.f32 %v3741_v11, %v3741_v11 }
 0x440   : > { %v1830_v61 = vmul.f32 %v3745_v54, %v3745_v54  ;;  %v1831_v62 = vmul.f32 %v3751_v57, %v3751_v57  ;;  %v3769_v51 = vsub.f32 %v3626_v5, %v3721_v63  ;;  %v1832_v1 = vmul.f32 %v3757_v58, %v3757_v58 }
 0x441   : > { %2912 = vmatprep.mubr.f32.mxu1 %v1826_v8  ;;  %v3775_v18 = vsub.f32 %v3629_v6, %v3721_v63  ;;  %v1833_v2 = vmul.f32 %v3763_v15, %v3763_v15  ;;  %v3781_v16 = vsub.f32 %v3634_v9, %v3721_v63  ;;  %v3787_v21 = vsub.f32 %v3637_v10, %v3721_v63 }
 0x442   : > { %2913 = vmatmul.mubr.f32.vlgmr.msra.gmra.mrb[32].mxu1 %v1827_v7  ;;  %v1834_v5 = vmul.f32 %v3769_v51, %v3769_v51  ;;  %v3793_v24 = vsub.f32 %v3642_v13, %v3721_v63  ;;  %v3799_v25 = vsub.f32 %v3645_v14, %v3721_v63  ;;  %v3805_v28 = vsub.f32 %v3650_v19, %v3721_v63 }
 0x443   : > { %2915 = vmatprep.mubr.f32.mxu1 %v1828_v55  ;;  %v1835_v6 = vmul.f32 %v3775_v18, %v3775_v18  ;;  %v1836_v9 = vmul.f32 %v3781_v16, %v3781_v16  ;;  %v1837_v10 = vmul.f32 %v3787_v21, %v3787_v21  ;;  %v3811_v29 = vsub.f32 %v3653_v20, %v3721_v63 }
 0x444   : > { %v1838_v13 = vmul.f32 %v3793_v24, %v3793_v24  ;;  %v1839_v14 = vmul.f32 %v3799_v25, %v3799_v25  ;;  %v3817_v32 = vsub.f32 %v3658_v22, %v3721_v63  ;;  %v1840_v19 = vmul.f32 %v3805_v28, %v3805_v28 }
 0x445   : > { %v3823_v33 = vsub.f32 %v3661_v23, %v3721_v63  ;;  %v1841_v20 = vmul.f32 %v3811_v29, %v3811_v29  ;;  %v3829_v36 = vsub.f32 %v3666_v26, %v3721_v63  ;;  %v3835_v37 = vsub.f32 %v3669_v27, %v3721_v63 }
 0x446   : > { %2916 = vmatmul.mubr.f32.gmra.mrb[34].mxu1 %v1829_v12  ;;  %v1842_v22 = vmul.f32 %v3817_v32, %v3817_v32  ;;  %v3841_v40 = vsub.f32 %v3674_v30, %v3721_v63  ;;  %v3847_v41 = vsub.f32 %v3677_v31, %v3721_v63  ;;  %v3853_v44 = vsub.f32 %v3682_v34, %v3721_v63 }
 0x447   : > { %2918 = vmatprep.mubr.f32.mxu1 %v1830_v61  ;;  %v1843_v23 = vmul.f32 %v3823_v33, %v3823_v33  ;;  %v1844_v26 = vmul.f32 %v3829_v36, %v3829_v36  ;;  %v1845_v27 = vmul.f32 %v3835_v37, %v3835_v37  ;;  %v3859_v45 = vsub.f32 %v3685_v35, %v3721_v63 }
 0x448   : > { %v1846_v30 = vmul.f32 %v3841_v40, %v3841_v40  ;;  %v1847_v31 = vmul.f32 %v3847_v41, %v3847_v41  ;;  %v3865_v48 = vsub.f32 %v3690_v38, %v3721_v63  ;;  %v1848_v34 = vmul.f32 %v3853_v44, %v3853_v44 }
 0x449   : > { %v3871_v49 = vsub.f32 %v3693_v39, %v3721_v63  ;;  %v1849_v35 = vmul.f32 %v3859_v45, %v3859_v45  ;;  %v3877_v53 = vsub.f32 %v3698_v42, %v3721_v63  ;;  %v3883_v17 = vsub.f32 %v3701_v43, %v3721_v63 }
 0x44a   : > { %2919 = vmatmul.mubr.f32.gmra.mrb[36].mxu1 %v1831_v62  ;;  %v1850_v38 = vmul.f32 %v3865_v48, %v3865_v48  ;;  %v3889_v56 = vsub.f32 %v3706_v46, %v3721_v63  ;;  %v3895_v59 = vsub.f32 %v3709_v47, %v3721_v63  ;;  %v3901_v60 = vsub.f32 %v3714_v50, %v3721_v63 }
 0x44b   : > { %2921 = vmatprep.mubr.f32.mxu1 %v1832_v1  ;;  %v1851_v39 = vmul.f32 %v3871_v49, %v3871_v49  ;;  %v1852_v42 = vmul.f32 %v3877_v53, %v3877_v53  ;;  %v1853_v43 = vmul.f32 %v3883_v17, %v3883_v17  ;;  %v3907_v7 = vsub.f32 %v3717_v52, %v3721_v63 }
 0x44c   : > { %v1854_v46 = vmul.f32 %v3889_v56, %v3889_v56  ;;  %v1855_v47 = vmul.f32 %v3895_v59, %v3895_v59  ;;  %v1856_v8 = vmul.f32 %v3901_v60, %v3901_v60 }
 0x44d   : > { %v1857_v50 = vmul.f32 %v3907_v7, %v3907_v7 }
 0x44e   : > { %2922 = vmatmul.mubr.f32.gmra.mrb[38].mxu1 %v1833_v2 }
 0x44f   : > { %2924 = vmatprep.mubr.f32.mxu1 %v1834_v5 }
 0x452   : > { %2925 = vmatmul.mubr.f32.gmra.mrb[40].mxu1 %v1835_v6 }
 0x453   : > { %2927 = vmatprep.mubr.f32.mxu1 %v1836_v9 }
 0x456   : > { %2928 = vmatmul.mubr.f32.gmra.mrb[42].mxu1 %v1837_v10 }
 0x457   : > { %2930 = vmatprep.mubr.f32.mxu1 %v1838_v13 }
 0x45a   : > { %2931 = vmatmul.mubr.f32.gmra.mrb[44].mxu1 %v1839_v14 }
 0x45b   : > { %2933 = vmatprep.mubr.f32.mxu1 %v1840_v19 }
 0x45e   : > { %2934 = vmatmul.mubr.f32.gmra.mrb[46].mxu1 %v1841_v20 }
 0x45f   : > { %2936 = vmatprep.mubr.f32.mxu1 %v1842_v22 }
 0x462   : > { %2937 = vmatmul.mubr.f32.gmra.mrb[48].mxu1 %v1843_v23 }
 0x463   : > { %2939 = vmatprep.mubr.f32.mxu1 %v1844_v26 }
 0x466   : > { %2940 = vmatmul.mubr.f32.gmra.mrb[50].mxu1 %v1845_v27 }
 0x467   : > { %2942 = vmatprep.mubr.f32.mxu1 %v1846_v30 }
 0x46a   : > { %2943 = vmatmul.mubr.f32.gmra.mrb[52].mxu1 %v1847_v31 }
 0x46b   : > { %2945 = vmatprep.mubr.f32.mxu1 %v1848_v34 }
 0x46e   : > { %2946 = vmatmul.mubr.f32.gmra.mrb[54].mxu1 %v1849_v35 }
 0x46f   : > { %2948 = vmatprep.mubr.f32.mxu1 %v1850_v38 }
 0x472   : > { %2949 = vmatmul.mubr.f32.gmra.mrb[56].mxu1 %v1851_v39 }
 0x473   : > { %2951 = vmatprep.mubr.f32.mxu1 %v1852_v42 }
 0x476   : > { %2952 = vmatmul.mubr.f32.gmra.mrb[58].mxu1 %v1853_v43 }
 0x477   : > { %2954 = vmatprep.mubr.f32.mxu1 %v1854_v46 }
 0x47a   : > { %2955 = vmatmul.mubr.f32.gmra.mrb[60].mxu1 %v1855_v47 }
 0x47b   : > { %2957 = vmatprep.mubr.f32.mxu1 %v1856_v8 }
 0x47e   : > { %2958 = vmatmul.mubr.f32.gmra.mrb[62].mxu1 %v1857_v50 }
 0x515   : > { %v2914_v55 = vpop.f32.mrb[32].mxu1 }
 0x516   : > { %v1924_v12 = vpop.f32.mrb[33].mxu1 }
 0x517   : > { %v2083_v61 = vadd.f32 %v2914_v55, %v1924_v12 }
 0x519   : > { %v2917_v62 = vpop.f32.mrb[34].mxu1 }
 0x51a   : > { %v1934_v1 = vpop.f32.mrb[35].mxu1 }
 0x51b   : > { %v2084_v2 = vadd.f32 %v2083_v61, %v1934_v1 }
 0x51d   : > { %v2920_v52 = vpop.f32.mrb[36].mxu1  ;;  %v2085_v63 = vadd.f32 %v2917_v62, %v2084_v2 }
 0x51e   : > { %v1944_v5 = vpop.f32.mrb[37].mxu1 }
 0x51f   : > { %v2086_v6 = vadd.f32 %v2085_v63, %v1944_v5 }
 0x521   : > { %v2923_v9 = vpop.f32.mrb[38].mxu1  ;;  %v2087_v10 = vadd.f32 %v2920_v52, %v2086_v6 }
 0x522   : > { %v1954_v13 = vpop.f32.mrb[39].mxu1 }
 0x523   : > { %v2088_v14 = vadd.f32 %v2087_v10, %v1954_v13 }
 0x525   : > { %v2926_v19 = vpop.f32.mrb[40].mxu1  ;;  %v2089_v20 = vadd.f32 %v2923_v9, %v2088_v14 }
 0x526   : > { %v1964_v22 = vpop.f32.mrb[41].mxu1 }
 0x527   : > { %v2090_v23 = vadd.f32 %v2089_v20, %v1964_v22 }
 0x529   : > { %v2929_v26 = vpop.f32.mrb[42].mxu1  ;;  %v2091_v27 = vadd.f32 %v2926_v19, %v2090_v23 }
 0x52a   : > { %v1974_v30 = vpop.f32.mrb[43].mxu1 }
 0x52b   : > { %v2092_v31 = vadd.f32 %v2091_v27, %v1974_v30 }
 0x52d   : > { %v2932_v34 = vpop.f32.mrb[44].mxu1  ;;  %v2093_v35 = vadd.f32 %v2929_v26, %v2092_v31 }
 0x52e   : > { %v1984_v38 = vpop.f32.mrb[45].mxu1 }
 0x52f   : > { %v2094_v39 = vadd.f32 %v2093_v35, %v1984_v38 }
 0x531   : > { %v2935_v42 = vpop.f32.mrb[46].mxu1  ;;  %v2095_v43 = vadd.f32 %v2932_v34, %v2094_v39 }
 0x532   : > { %v1994_v46 = vpop.f32.mrb[47].mxu1 }
 0x533   : > { %v2096_v47 = vadd.f32 %v2095_v43, %v1994_v46 }
 0x535   : > { %v2938_v8 = vpop.f32.mrb[48].mxu1  ;;  %v2097_v50 = vadd.f32 %v2935_v42, %v2096_v47 }
 0x536   : > { %v2004_v55 = vpop.f32.mrb[49].mxu1 }
 0x537   : > { %v2098_v12 = vadd.f32 %v2097_v50, %v2004_v55 }
 0x539   : > { %v2941_v61 = vpop.f32.mrb[50].mxu1  ;;  %v2099_v62 = vadd.f32 %v2938_v8, %v2098_v12 }
 0x53a   : > { %v2014_v1 = vpop.f32.mrb[51].mxu1 }
 0x53b   : > { %v2100_v2 = vadd.f32 %v2099_v62, %v2014_v1 }
 0x53d   : > { %v2944_v52 = vpop.f32.mrb[52].mxu1  ;;  %v2101_v63 = vadd.f32 %v2941_v61, %v2100_v2 }
 0x53e   : > { %v2024_v5 = vpop.f32.mrb[53].mxu1 }
 0x53f   : > { %v2102_v6 = vadd.f32 %v2101_v63, %v2024_v5 }
 0x541   : > { %v2947_v9 = vpop.f32.mrb[54].mxu1  ;;  %v2103_v10 = vadd.f32 %v2944_v52, %v2102_v6 }
 0x542   : > { %v2034_v13 = vpop.f32.mrb[55].mxu1 }
 0x543   : > { %v2104_v14 = vadd.f32 %v2103_v10, %v2034_v13 }
 0x545   : > { %v2950_v19 = vpop.f32.mrb[56].mxu1  ;;  %v2105_v20 = vadd.f32 %v2947_v9, %v2104_v14 }
 0x546   : > { %v2044_v22 = vpop.f32.mrb[57].mxu1 }
 0x547   : > { %v2106_v23 = vadd.f32 %v2105_v20, %v2044_v22 }
 0x549   : > { %v2953_v26 = vpop.f32.mrb[58].mxu1  ;;  %v2107_v27 = vadd.f32 %v2950_v19, %v2106_v23 }
 0x54a   : > { %v2054_v30 = vpop.f32.mrb[59].mxu1 }
 0x54b   : > { %v2108_v31 = vadd.f32 %v2107_v27, %v2054_v30 }
 0x54d   : > { %v2956_v34 = vpop.f32.mrb[60].mxu1  ;;  %v2109_v35 = vadd.f32 %v2953_v26, %v2108_v31 }
 0x54e   : > { %v2064_v38 = vpop.f32.mrb[61].mxu1 }
 0x54f   : > { %v2110_v39 = vadd.f32 %v2109_v35, %v2064_v38 }
 0x551   : > { %v2959_v42 = vpop.f32.mrb[62].mxu1  ;;  %v2111_v43 = vadd.f32 %v2956_v34, %v2110_v39 }
 0x552   : > { %v2074_v46 = vpop.f32.mrb[63].mxu1 }
 0x553   : > { %v2112_v47 = vadd.f32 %v2111_v43, %v2074_v46 }
 0x555   : > { %v2113_v8 = vadd.f32 %v2959_v42, %v2112_v47 }
 0x557   : > { %v2114_v50 = vrot.slane %v2113_v8, 4 }
 0x559   : > { %v2115_v55 = vadd.f32 %v2114_v50, %v2113_v8 }
 0x55b   : > { %v2116_v12 = vrot.slane %v2115_v55, 2 }
 0x55d   : > { %v2117_v61 = vadd.f32 %v2116_v12, %v2115_v55  ;;  %v2373_v12 = vld [vmem:[%s4102_s7] ss:$0 sm:$0xff] }
 0x55f   : > { %v2118_v62 = vrot.slane %v2117_v61, 1 }
 0x561   : > { %v2119_v1 = vadd.f32 %v2118_v62, %v2117_v61 }
 0x563   : > { %v2120_v2 = vmul.f32 0.001953125, %v2119_v1 }
 0x565   : > { %v2121_v52 = vadd.f32 1e-05, %v2120_v2 }
 0x567   : > { %3145 = vrsqrt.f32 %v2121_v52 }
 0x571   : > { %v3146_v63 = vpop.eup %3145 }
 0x572   : > { %v2123_v5 = vmul.f32 %v3146_v63, %v3725_v0  ;;  %v2124_v6 = vmul.f32 %v3146_v63, %v3729_v3  ;;  %v2125_v9 = vmul.f32 %v3146_v63, %v3733_v4  ;;  %v2126_v10 = vmul.f32 %v3146_v63, %v3741_v11 }
 0x573   : > { %v2127_v13 = vmul.f32 %v3146_v63, %v3745_v54  ;;  %v2128_v14 = vmul.f32 %v3146_v63, %v3751_v57  ;;  %v2129_v19 = vmul.f32 %v3146_v63, %v3757_v58  ;;  %v2130_v20 = vmul.f32 %v3146_v63, %v3763_v15 }
 0x574   : > { %v2131_v22 = vmul.f32 %v3146_v63, %v3769_v51  ;;  %v2132_v23 = vmul.f32 %v3146_v63, %v3775_v18  ;;  %v2133_v0 = vmul.f32 %v3146_v63, %v3781_v16  ;;  %v2134_v3 = vmul.f32 %v3146_v63, %v3787_v21 }
 0x575   : > { %v2135_v4 = vmul.f32 %v3146_v63, %v3793_v24  ;;  %v2136_v11 = vmul.f32 %v3146_v63, %v3799_v25  ;;  %v2137_v54 = vmul.f32 %v3146_v63, %v3805_v28  ;;  %v2138_v57 = vmul.f32 %v3146_v63, %v3811_v29  ;;  %v2372_v28 = vld [vmem:[%s4101_s6] ss:$0 sm:$0xff] }
 0x576   : > { %v2139_v58 = vmul.f32 %v3146_v63, %v3817_v32  ;;  %v2140_v15 = vmul.f32 %v3146_v63, %v3823_v33  ;;  %v2141_v51 = vmul.f32 %v3146_v63, %v3829_v36  ;;  %v2142_v18 = vmul.f32 %v3146_v63, %v3835_v37 }
 0x577   : > { %v2143_v16 = vmul.f32 %v3146_v63, %v3841_v40  ;;  %v2144_v21 = vmul.f32 %v3146_v63, %v3847_v41  ;;  %v2145_v24 = vmul.f32 %v3146_v63, %v3853_v44  ;;  %v2146_v25 = vmul.f32 %v3146_v63, %v3859_v45 }
 0x578   : > { %v2147_v29 = vmul.f32 %v3146_v63, %v3865_v48  ;;  %v2148_v32 = vmul.f32 %v3146_v63, %v3871_v49  ;;  %v2149_v33 = vmul.f32 %v3146_v63, %v3877_v53  ;;  %v2150_v36 = vmul.f32 %v3146_v63, %v3883_v17 }
 0x579   : > { %v2151_v37 = vmul.f32 %v3146_v63, %v3889_v56  ;;  %v2152_v40 = vmul.f32 %v3146_v63, %v3895_v59  ;;  %v2153_v41 = vmul.f32 %v3146_v63, %v3901_v60  ;;  %v2154_v44 = vmul.f32 %v3146_v63, %v3907_v7 }
 0x57a   : > { %v2162_v45 = vmul.f32 %v2372_v28, %v2123_v5  ;;  %v2163_v26 = vmul.f32 %v2372_v28, %v2124_v6  ;;  %v2164_v27 = vmul.f32 %v2372_v28, %v2125_v9  ;;  %v2165_v30 = vmul.f32 %v2372_v28, %v2126_v10 }
 0x57b   : > { %v2166_v31 = vmul.f32 %v2372_v28, %v2127_v13  ;;  %v2167_v48 = vmul.f32 %v2372_v28, %v2128_v14  ;;  %v2168_v34 = vmul.f32 %v2372_v28, %v2129_v19  ;;  %v2169_v49 = vmul.f32 %v2372_v28, %v2130_v20 }
 0x57c   : > { %v2170_v35 = vmul.f32 %v2372_v28, %v2131_v22  ;;  %v2171_v53 = vmul.f32 %v2372_v28, %v2132_v23  ;;  %v2172_v38 = vmul.f32 %v2372_v28, %v2133_v0  ;;  %v2173_v17 = vmul.f32 %v2372_v28, %v2134_v3 }
 0x57d   : > { %v2174_v39 = vmul.f32 %v2372_v28, %v2135_v4  ;;  %v2175_v56 = vmul.f32 %v2372_v28, %v2136_v11  ;;  %v2176_v42 = vmul.f32 %v2372_v28, %v2137_v54  ;;  %v2177_v59 = vmul.f32 %v2372_v28, %v2138_v57 }
 0x57e   : > { %v2178_v43 = vmul.f32 %v2372_v28, %v2139_v58  ;;  %v2179_v60 = vmul.f32 %v2372_v28, %v2140_v15  ;;  %v2180_v46 = vmul.f32 %v2372_v28, %v2141_v51  ;;  %v2181_v7 = vmul.f32 %v2372_v28, %v2142_v18 }
 0x57f   : > { %v2182_v47 = vmul.f32 %v2372_v28, %v2143_v16  ;;  %v2183_v8 = vmul.f32 %v2372_v28, %v2144_v21  ;;  %v2184_v50 = vmul.f32 %v2372_v28, %v2145_v24  ;;  %v2185_v55 = vmul.f32 %v2372_v28, %v2146_v25 }
 0x580   : > { %v2186_v61 = vmul.f32 %v2372_v28, %v2147_v29  ;;  %v2187_v62 = vmul.f32 %v2372_v28, %v2148_v32  ;;  %v2188_v1 = vmul.f32 %v2372_v28, %v2149_v33  ;;  %v2189_v2 = vmul.f32 %v2372_v28, %v2150_v36 }
 0x581   : > { %v2190_v52 = vmul.f32 %v2372_v28, %v2151_v37  ;;  %v2191_v63 = vmul.f32 %v2372_v28, %v2152_v40  ;;  %v2192_v5 = vmul.f32 %v2372_v28, %v2153_v41  ;;  %v2193_v6 = vmul.f32 %v2372_v28, %v2154_v44 }
 0x582   : > { %v2201_v9 = vadd.f32 %v2373_v12, %v2162_v45  ;;  %v2202_v10 = vadd.f32 %v2373_v12, %v2163_v26  ;;  %v2203_v13 = vadd.f32 %v2373_v12, %v2164_v27  ;;  %v2204_v14 = vadd.f32 %v2373_v12, %v2165_v30 }
 0x583   : > { %v2205_v19 = vadd.f32 %v2373_v12, %v2166_v31  ;;  %v2206_v20 = vadd.f32 %v2373_v12, %v2167_v48  ;;  %v2207_v22 = vadd.f32 %v2373_v12, %v2168_v34  ;;  %v2208_v23 = vadd.f32 %v2373_v12, %v2169_v49 }
 0x584   : > { %v2209_v0 = vadd.f32 %v2373_v12, %v2170_v35  ;;  %v2210_v3 = vadd.f32 %v2373_v12, %v2171_v53  ;;  %v2211_v4 = vadd.f32 %v2373_v12, %v2172_v38  ;;  %v2212_v11 = vadd.f32 %v2373_v12, %v2173_v17 }
 0x585   : > { %v2213_v54 = vadd.f32 %v2373_v12, %v2174_v39  ;;  %v2214_v57 = vadd.f32 %v2373_v12, %v2175_v56  ;;  %v2215_v58 = vadd.f32 %v2373_v12, %v2176_v42  ;;  %v2216_v15 = vadd.f32 %v2373_v12, %v2177_v59 }
 0x586   : > { %v2217_v51 = vadd.f32 %v2373_v12, %v2178_v43  ;;  %v2218_v18 = vadd.f32 %v2373_v12, %v2179_v60  ;;  %v2219_v16 = vadd.f32 %v2373_v12, %v2180_v46  ;;  %v2220_v21 = vadd.f32 %v2373_v12, %v2181_v7 }
 0x587   : > { %v3953_v24 = vadd.f32 %v2373_v12, %v2182_v47  ;;  %v3955_v25 = vadd.f32 %v2373_v12, %v2183_v8  ;;  %v3957_v28 = vadd.f32 %v2373_v12, %v2184_v50  ;;  %v3959_v29 = vadd.f32 %v2373_v12, %v2185_v55 }
 0x588   : > { %v3961_v32 = vadd.f32 %v2373_v12, %v2186_v61  ;;  %v3963_v33 = vadd.f32 %v2373_v12, %v2187_v62  ;;  %v3965_v36 = vadd.f32 %v2373_v12, %v2188_v1  ;;  %v3967_v37 = vadd.f32 %v2373_v12, %v2189_v2 }
 0x589   : > { %v3969_v40 = vadd.f32 %v2373_v12, %v2190_v52  ;;  %v3971_v41 = vadd.f32 %v2373_v12, %v2191_v63  ;;  %v3973_v44 = vadd.f32 %v2373_v12, %v2192_v5  ;;  %v3975_v45 = vadd.f32 %v2373_v12, %v2193_v6 }
 0x58a   : > { %v2233_v26 = vmax.f32 %v2201_v9, 0.0  ;;  %v2234_v27 = vmax.f32 %v2202_v10, 0.0  ;;  %v2235_v30 = vmax.f32 %v2203_v13, 0.0  ;;  %v2236_v31 = vmax.f32 %v2204_v14, 0.0 }
 0x58b   : > { %v2237_v48 = vmax.f32 %v2205_v19, 0.0  ;;  %v2238_v34 = vmax.f32 %v2206_v20, 0.0  ;;  %v2239_v49 = vmax.f32 %v2207_v22, 0.0  ;;  %v2240_v35 = vmax.f32 %v2208_v23, 0.0 }
 0x58c   : > { %v2241_v53 = vmax.f32 %v2209_v0, 0.0  ;;  %v2242_v38 = vmax.f32 %v2210_v3, 0.0  ;;  %v2243_v17 = vmax.f32 %v2211_v4, 0.0  ;;  %v2244_v39 = vmax.f32 %v2212_v11, 0.0  ;;  %2265 = vst [vmem:[%s4104_s9] sm:$0xff] %v2233_v26  ;;  %2266 = vst [vmem:[%s4104_s9 + $0x8] sm:$0xff] %v2234_v27 }
 0x58d   : > { %2267 = vst [vmem:[%s4104_s9 + $0x10] sm:$0xff] %v2235_v30  ;;  %2268 = vst [vmem:[%s4104_s9 + $0x18] sm:$0xff] %v2236_v31  ;;  %v2245_v56 = vmax.f32 %v2213_v54, 0.0  ;;  %v2246_v42 = vmax.f32 %v2214_v57, 0.0  ;;  %v2247_v59 = vmax.f32 %v2215_v58, 0.0  ;;  %v2248_v43 = vmax.f32 %v2216_v15, 0.0 }
 0x58e   : > { %2269 = vst [vmem:[%s4104_s9 + $0x20] sm:$0xff] %v2237_v48  ;;  %2270 = vst [vmem:[%s4104_s9 + $0x28] sm:$0xff] %v2238_v34  ;;  %v2249_v60 = vmax.f32 %v2217_v51, 0.0  ;;  %v2250_v46 = vmax.f32 %v2218_v18, 0.0  ;;  %v2251_v7 = vmax.f32 %v2219_v16, 0.0  ;;  %v2252_v47 = vmax.f32 %v2220_v21, 0.0 }
 0x58f   : > { %2271 = vst [vmem:[%s4104_s9 + $0x30] sm:$0xff] %v2239_v49  ;;  %2272 = vst [vmem:[%s4104_s9 + $0x38] sm:$0xff] %v2240_v35  ;;  %v2253_v8 = vmax.f32 %v3953_v24, 0.0  ;;  %v2254_v50 = vmax.f32 %v3955_v25, 0.0  ;;  %v2255_v55 = vmax.f32 %v3957_v28, 0.0  ;;  %v2256_v12 = vmax.f32 %v3959_v29, 0.0 }
 0x590   : > { %2273 = vst [vmem:[%s4104_s9 + $0x40] sm:$0xff] %v2241_v53  ;;  %2274 = vst [vmem:[%s4104_s9 + $0x48] sm:$0xff] %v2242_v38  ;;  %v2257_v61 = vmax.f32 %v3961_v32, 0.0  ;;  %v2258_v62 = vmax.f32 %v3963_v33, 0.0  ;;  %v2259_v1 = vmax.f32 %v3965_v36, 0.0  ;;  %v2260_v2 = vmax.f32 %v3967_v37, 0.0 }
 0x591   : > { %2275 = vst [vmem:[%s4104_s9 + $0x50] sm:$0xff] %v2243_v17  ;;  %2276 = vst [vmem:[%s4104_s9 + $0x58] sm:$0xff] %v2244_v39  ;;  %v2261_v52 = vmax.f32 %v3969_v40, 0.0  ;;  %v2262_v63 = vmax.f32 %v3971_v41, 0.0  ;;  %v2263_v5 = vmax.f32 %v3973_v44, 0.0  ;;  %v2264_v6 = vmax.f32 %v3975_v45, 0.0 }
 0x592   : > { %2277 = vst [vmem:[%s4104_s9 + $0x60] sm:$0xff] %v2245_v56  ;;  %2278 = vst [vmem:[%s4104_s9 + $0x68] sm:$0xff] %v2246_v42 }
 0x593   : > { %2279 = vst [vmem:[%s4104_s9 + $0x70] sm:$0xff] %v2247_v59  ;;  %2280 = vst [vmem:[%s4104_s9 + $0x78] sm:$0xff] %v2248_v43 }
 0x594   : > { %2281 = vst [vmem:[%s4104_s9 + $0x80] sm:$0xff] %v2249_v60  ;;  %2282 = vst [vmem:[%s4104_s9 + $0x88] sm:$0xff] %v2250_v46 }
 0x595   : > { %2283 = vst [vmem:[%s4104_s9 + $0x90] sm:$0xff] %v2251_v7  ;;  %2284 = vst [vmem:[%s4104_s9 + $0x98] sm:$0xff] %v2252_v47 }
 0x596   : > { %2285 = vst [vmem:[%s4104_s9 + $0xa0] sm:$0xff] %v2253_v8  ;;  %2286 = vst [vmem:[%s4104_s9 + $0xa8] sm:$0xff] %v2254_v50 }
 0x597   : > { %2287 = vst [vmem:[%s4104_s9 + $0xb0] sm:$0xff] %v2255_v55  ;;  %2288 = vst [vmem:[%s4104_s9 + $0xb8] sm:$0xff] %v2256_v12 }
 0x598   : > { %2289 = vst [vmem:[%s4104_s9 + $0xc0] sm:$0xff] %v2257_v61  ;;  %2290 = vst [vmem:[%s4104_s9 + $0xc8] sm:$0xff] %v2258_v62 }
 0x599   : > { %2291 = vst [vmem:[%s4104_s9 + $0xd0] sm:$0xff] %v2259_v1  ;;  %2292 = vst [vmem:[%s4104_s9 + $0xd8] sm:$0xff] %v2260_v2 }
 0x59a   : > { %2293 = vst [vmem:[%s4104_s9 + $0xe0] sm:$0xff] %v2261_v52  ;;  %2294 = vst [vmem:[%s4104_s9 + $0xe8] sm:$0xff] %v2262_v63 }
 0x59b   : > { %2295 = vst [vmem:[%s4104_s9 + $0xf0] sm:$0xff] %v2263_v5  ;;  %2296 = vst [vmem:[%s4104_s9 + $0xf8] sm:$0xff] %v2264_v6 }
 0x59c PF: > { %p16_p11 = scmp.ge.s32.totalorder %s3241_s13, 4   ;;  %s4105_s30 = smov %s3165_s10 }
 0x59d   : > { %s4106_s10 = smov %s3250_s16  ;;  %s4107_s11 = smov %s3241_s13 }
 0x59e   :  { %18 = sbr.rel (!%p16_p11) target bundleno = 2 (0x2), region = 139 }

// kernel: gnn_graphpred_forward.3
= control target key start
LH: loop header
LB: loop body
LE: loop exit
PB: predicated region body
PF: predicated region fallthrough
CT: control target
= control target key end

     0   :  { %19 = vsyncpa [#allocation5], 0  ;;  %s3698_s25 = smov 0   ;;  %s3700_s26 = smov 0   ;;  %s4730_s0 = inlined_call_operand.vmem [shape: bf16[256,256], index: 0, kind: input, shape index: {}]   ;;  %s4731_s1 = inlined_call_operand.vmem [shape: f32[256,128], index: 1, kind: input, shape index: {}]   ;;  %s4732_s2 = inlined_call_operand.vmem [shape: f32[128,128], index: 2, kind: input, shape index: {}]   ;;  %s4733_s3 = inlined_call_operand.vmem [shape: f32[1,128], index: 3, kind: input, shape index: {}]   ;;  %s4734_s4 = inlined_call_operand.vmem [shape: f32[128,128], index: 4, kind: input, shape index: {}]   ;;  %s4735_s5 = inlined_call_operand.vmem [shape: f32[1,128], index: 5, kind: input, shape index: {}]   ;;  %s4736_s6 = inlined_call_operand.vmem [shape: f32[1,128], index: 6, kind: input, shape index: {}]   ;;  %s4737_s7 = inlined_call_operand.vmem [shape: f32[1,128], index: 7, kind: input, shape index: {}]   ;;  %s4738_s8 = inlined_call_operand.vmem [shape: f32[128,128], index: 8, kind: input, shape index: {}]   ;;  %s4739_s9 = inlined_call_operand.vmem [shape: f32[8,256], index: 9, kind: input, shape index: {}]   ;;  %s4740_s10 = inlined_call_operand.vmem [shape: f32[128,12], index: 10, kind: input, shape index: {}]   ;;  %s4741_s11 = inlined_call_operand.vmem [shape: f32[1,12], index: 11, kind: input, shape index: {}]   ;;  %s4742_s12 = inlined_call_operand.vmem [shape: f32[256,128], index: 12, kind: output, shape index: {0}]   ;;  %s4743_s13 = inlined_call_operand.hbm [shape: f32[8,12], index: 13, kind: output, shape index: {1}]  }
   0x1   :  { %s3702_s27 = smov 0  }
   0x2 LB: > { %s3714_s28 = sadd.s32 4294967295, %s3621_s27   ;;  %s3717_s29 = sadd.s32 1, %s3621_s27   ;;  %s3621_s27 = sphi %s3702_s27, %s4746_s27   ;;  %s3617_s26 = sphi %s3700_s26, %s4745_s26   ;;  %s3613_s25 = sphi %s3698_s25, %s4744_s25  }
   0x3   : > { %s29_s30 = ssub.s32 %s3621_s27, %s3717_s29  ;;  %s32_s14 = sadd.s32 1, %s3617_s26 }
   0x4   : > { %p30_p0 = scmp.eq.s32.totalorder %s29_s30, 0  ;;  %p39_p1 = scmp.ne.s32.totalorder %s3617_s26, %s3613_s25 }
   0x5   : > { %p40_p2 = scmp.eq.s32.totalorder %s3621_s27, 0  ;;  %p2611_p4 = scmp.ge.s32.totalorder %s3621_s27, 2 }
   0x6   : > { %s3726_s15 = scalar_select %p30_p0, %s3617_s26, %s32_s14  }
   0x7   : > { %p41_p3 = por %p40_p2, %p39_p1  ;;  %373 = sbr.rel (%p2611_p4) target bundleno = 39 (0x27), region = 56 }
   0xe   : > { %376 = sbr.rel (!%p41_p3) target bundleno = 39 (0x27), region = 60  ;;  %s378_s16 = sand.u32 (%p41_p3), 1, %s3617_s26  }
   0xf   : > { %s2613_s17 = sshll.u32 (%p41_p3), %s3621_s27, 2  ;;  %s2612_s18 = sshll.u32 (%p41_p3), %s378_s16, 7 }
  0x10   : > { %s3734_s21 = scalar_lea.vmem (%p41_p3), %s4730_s0, %s2613_s17  ;;  %s3738_s22 = scalar_lea.vmem (%p41_p3), [#allocation3], %s2612_s18 }
  0x11   : > { %v398_v0 = vld [vmem:[%s3734_s21] sm:$0xf] (%p41_p3)  ;;  %v400_v1 = vld [vmem:[%s3734_s21 + $0x8] sm:$0xf] (%p41_p3)  ;;  %v402_v2 = vld [vmem:[%s3734_s21 + $0x10] sm:$0xf] (%p41_p3) }
  0x12   : > { %399 = vst [vmem:[%s3738_s22] sm:$0xf] (%p41_p3), %v398_v0  ;;  %401 = vst [vmem:[%s3738_s22 + $0x4] sm:$0xf] (%p41_p3), %v400_v1  ;;  %v404_v3 = vld [vmem:[%s3734_s21 + $0x18] sm:$0xf] (%p41_p3) }
  0x13   : > { %v406_v4 = vld [vmem:[%s3734_s21 + $0x20] sm:$0xf] (%p41_p3)  ;;  %403 = vst [vmem:[%s3738_s22 + $0x8] sm:$0xf] (%p41_p3), %v402_v2  ;;  %405 = vst [vmem:[%s3738_s22 + $0xc] sm:$0xf] (%p41_p3), %v404_v3 }
  0x14   : > { %407 = vst [vmem:[%s3738_s22 + $0x10] sm:$0xf] (%p41_p3), %v406_v4  ;;  %v408_v5 = vld [vmem:[%s3734_s21 + $0x28] sm:$0xf] (%p41_p3)  ;;  %v410_v6 = vld [vmem:[%s3734_s21 + $0x30] sm:$0xf] (%p41_p3) }
  0x15   : > { %v412_v7 = vld [vmem:[%s3734_s21 + $0x38] sm:$0xf]  ;;  %409 = vst [vmem:[%s3738_s22 + $0x14] sm:$0xf] %v408_v5  ;;  %411 = vst [vmem:[%s3738_s22 + $0x18] sm:$0xf] %v410_v6 }
  0x16   : > { %413 = vst [vmem:[%s3738_s22 + $0x1c] sm:$0xf] %v412_v7  ;;  %v414_v8 = vld [vmem:[%s3734_s21 + $0x40] sm:$0xf]  ;;  %v416_v9 = vld [vmem:[%s3734_s21 + $0x48] sm:$0xf] }
  0x17   : > { %v418_v10 = vld [vmem:[%s3734_s21 + $0x50] sm:$0xf]  ;;  %415 = vst [vmem:[%s3738_s22 + $0x20] sm:$0xf] %v414_v8  ;;  %417 = vst [vmem:[%s3738_s22 + $0x24] sm:$0xf] %v416_v9 }
  0x18   : > { %419 = vst [vmem:[%s3738_s22 + $0x28] sm:$0xf] %v418_v10  ;;  %v420_v11 = vld [vmem:[%s3734_s21 + $0x58] sm:$0xf]  ;;  %v422_v12 = vld [vmem:[%s3734_s21 + $0x60] sm:$0xf] }
  0x19   : > { %v424_v13 = vld [vmem:[%s3734_s21 + $0x68] sm:$0xf]  ;;  %421 = vst [vmem:[%s3738_s22 + $0x2c] sm:$0xf] %v420_v11  ;;  %423 = vst [vmem:[%s3738_s22 + $0x30] sm:$0xf] %v422_v12 }
  0x1a   : > { %425 = vst [vmem:[%s3738_s22 + $0x34] sm:$0xf] %v424_v13  ;;  %v426_v14 = vld [vmem:[%s3734_s21 + $0x70] sm:$0xf]  ;;  %v428_v15 = vld [vmem:[%s3734_s21 + $0x78] sm:$0xf] }
  0x1b   : > { %v430_v16 = vld [vmem:[%s3734_s21 + $0x80] sm:$0xf]  ;;  %427 = vst [vmem:[%s3738_s22 + $0x38] sm:$0xf] %v426_v14  ;;  %429 = vst [vmem:[%s3738_s22 + $0x3c] sm:$0xf] %v428_v15 }
  0x1c   : > { %431 = vst [vmem:[%s3738_s22 + $0x40] sm:$0xf] %v430_v16  ;;  %v432_v17 = vld [vmem:[%s3734_s21 + $0x88] sm:$0xf]  ;;  %v434_v18 = vld [vmem:[%s3734_s21 + $0x90] sm:$0xf] }
  0x1d   : > { %v436_v19 = vld [vmem:[%s3734_s21 + $0x98] sm:$0xf]  ;;  %433 = vst [vmem:[%s3738_s22 + $0x44] sm:$0xf] %v432_v17  ;;  %435 = vst [vmem:[%s3738_s22 + $0x48] sm:$0xf] %v434_v18 }
  0x1e   : > { %437 = vst [vmem:[%s3738_s22 + $0x4c] sm:$0xf] %v436_v19  ;;  %v438_v20 = vld [vmem:[%s3734_s21 + $0xa0] sm:$0xf]  ;;  %v440_v21 = vld [vmem:[%s3734_s21 + $0xa8] sm:$0xf] }
  0x1f   : > { %v442_v22 = vld [vmem:[%s3734_s21 + $0xb0] sm:$0xf]  ;;  %439 = vst [vmem:[%s3738_s22 + $0x50] sm:$0xf] %v438_v20  ;;  %441 = vst [vmem:[%s3738_s22 + $0x54] sm:$0xf] %v440_v21 }
  0x20   : > { %443 = vst [vmem:[%s3738_s22 + $0x58] sm:$0xf] %v442_v22  ;;  %v444_v23 = vld [vmem:[%s3734_s21 + $0xb8] sm:$0xf]  ;;  %v446_v24 = vld [vmem:[%s3734_s21 + $0xc0] sm:$0xf] }
  0x21   : > { %v448_v25 = vld [vmem:[%s3734_s21 + $0xc8] sm:$0xf]  ;;  %445 = vst [vmem:[%s3738_s22 + $0x5c] sm:$0xf] %v444_v23  ;;  %447 = vst [vmem:[%s3738_s22 + $0x60] sm:$0xf] %v446_v24 }
  0x22   : > { %449 = vst [vmem:[%s3738_s22 + $0x64] sm:$0xf] %v448_v25  ;;  %v450_v26 = vld [vmem:[%s3734_s21 + $0xd0] sm:$0xf]  ;;  %v452_v27 = vld [vmem:[%s3734_s21 + $0xd8] sm:$0xf] }
  0x23   : > { %v454_v28 = vld [vmem:[%s3734_s21 + $0xe0] sm:$0xf]  ;;  %451 = vst [vmem:[%s3738_s22 + $0x68] sm:$0xf] %v450_v26  ;;  %453 = vst [vmem:[%s3738_s22 + $0x6c] sm:$0xf] %v452_v27 }
  0x24   : > { %455 = vst [vmem:[%s3738_s22 + $0x70] sm:$0xf] %v454_v28  ;;  %v456_v29 = vld [vmem:[%s3734_s21 + $0xe8] sm:$0xf]  ;;  %v458_v30 = vld [vmem:[%s3734_s21 + $0xf0] sm:$0xf] }
  0x25   : > { %v460_v31 = vld [vmem:[%s3734_s21 + $0xf8] sm:$0xf]  ;;  %457 = vst [vmem:[%s3738_s22 + $0x74] sm:$0xf] %v456_v29  ;;  %459 = vst [vmem:[%s3738_s22 + $0x78] sm:$0xf] %v458_v30 }
  0x26   : > { %461 = vst [vmem:[%s3738_s22 + $0x7c] sm:$0xf] %v460_v31 }
  0x27 PF: > { %p2614_p5 = scmp.ge.s32.totalorder %s3621_s27, 1  ;;  %p556_p6 = scmp.lt.s32.totalorder %s3621_s27, 3 }
  0x29   : > { %p557_p7 = pnand %p2614_p5, %p556_p6 }
  0x2a   : > { %s563_s23 = sand.u32 (!%p557_p7), 1, %s3613_s25   ;;  %s2616_s24 = sshll.u32 (!%p557_p7), %s3714_s28, 4 }
  0x2b   : > { %560 = sbr.rel (%p557_p7) target bundleno = 1906 (0x772), region = 105  ;;  %s2615_s30 = sshll.u32 (!%p557_p7), %s563_s23, 7 }
  0x2c   : > { %p607_p8 = scmp.lt.s32.totalorder (!%p557_p7), %s2616_s24, 31  ;;  %s3811_s19 = scalar_lea.vmem (!%p557_p7), [#allocation3], %s2615_s30 }
  0x2d   : > { %p2618_p9 = scmp.ne.s32.totalorder (!%p557_p7), %s3714_s28, 0 }
  0x32   : > { %s4748_s24 = smov (!%p607_p8, %s2616_s24), 31  ;;  %616 = sbr.rel (%p2618_p9) target bundleno = 68 (0x44), region = 113 }
  0x33   : > { %s2617_s14 = sshll.u32 %s4748_s24, 3  ;;  %v3623_v32 = vmov (!%p2618_p9), 0.0  }
  0x34   : > { %s3809_s18 = scalar_lea.vmem %s4731_s1, %s2617_s14  ;;  %617 = vst [vmem:[#allocation2] sm:$0xff] (!%p2618_p9), %v3623_v32  ;;  %618 = vst [vmem:[#allocation2 + $0x8] sm:$0xff] (!%p2618_p9), %v3623_v32 }
  0x35   : > { %619 = vst [vmem:[#allocation2 + $0x10] sm:$0xff] (!%p2618_p9), %v3623_v32  ;;  %620 = vst [vmem:[#allocation2 + $0x18] sm:$0xff] (!%p2618_p9), %v3623_v32 }
  0x36   : > { %621 = vst [vmem:[#allocation2 + $0x20] sm:$0xff] (!%p2618_p9), %v3623_v32  ;;  %622 = vst [vmem:[#allocation2 + $0x28] sm:$0xff] (!%p2618_p9), %v3623_v32 }
  0x37   : > { %623 = vst [vmem:[#allocation2 + $0x30] sm:$0xff] (!%p2618_p9), %v3623_v32  ;;  %624 = vst [vmem:[#allocation2 + $0x38] sm:$0xff] (!%p2618_p9), %v3623_v32 }
  0x38   : > { %625 = vst [vmem:[#allocation2 + $0x40] sm:$0xff] (!%p2618_p9), %v3623_v32  ;;  %626 = vst [vmem:[#allocation2 + $0x48] sm:$0xff] (!%p2618_p9), %v3623_v32 }
  0x39   : > { %627 = vst [vmem:[#allocation2 + $0x50] sm:$0xff] %v3623_v32  ;;  %628 = vst [vmem:[#allocation2 + $0x58] sm:$0xff] %v3623_v32 }
  0x3a   : > { %629 = vst [vmem:[#allocation2 + $0x60] sm:$0xff] %v3623_v32  ;;  %630 = vst [vmem:[#allocation2 + $0x68] sm:$0xff] %v3623_v32 }
  0x3b   : > { %631 = vst [vmem:[#allocation2 + $0x70] sm:$0xff] %v3623_v32  ;;  %632 = vst [vmem:[#allocation2 + $0x78] sm:$0xff] %v3623_v32 }
  0x3c   : > { %633 = vst [vmem:[#allocation2 + $0x80] sm:$0xff] %v3623_v32  ;;  %634 = vst [vmem:[#allocation2 + $0x88] sm:$0xff] %v3623_v32 }
  0x3d   : > { %635 = vst [vmem:[#allocation2 + $0x90] sm:$0xff] %v3623_v32  ;;  %636 = vst [vmem:[#allocation2 + $0x98] sm:$0xff] %v3623_v32 }
  0x3e   : > { %637 = vst [vmem:[#allocation2 + $0xa0] sm:$0xff] %v3623_v32  ;;  %638 = vst [vmem:[#allocation2 + $0xa8] sm:$0xff] %v3623_v32 }
  0x3f   : > { %639 = vst [vmem:[#allocation2 + $0xb0] sm:$0xff] %v3623_v32  ;;  %640 = vst [vmem:[#allocation2 + $0xb8] sm:$0xff] %v3623_v32 }
  0x40   : > { %641 = vst [vmem:[#allocation2 + $0xc0] sm:$0xff] %v3623_v32  ;;  %642 = vst [vmem:[#allocation2 + $0xc8] sm:$0xff] %v3623_v32 }
  0x41   : > { %643 = vst [vmem:[#allocation2 + $0xd0] sm:$0xff] %v3623_v32  ;;  %644 = vst [vmem:[#allocation2 + $0xd8] sm:$0xff] %v3623_v32 }
  0x42   : > { %645 = vst [vmem:[#allocation2 + $0xe0] sm:$0xff] %v3623_v32  ;;  %646 = vst [vmem:[#allocation2 + $0xe8] sm:$0xff] %v3623_v32 }
  0x43   : > { %647 = vst [vmem:[#allocation2 + $0xf0] sm:$0xff] %v3623_v32  ;;  %648 = vst [vmem:[#allocation2 + $0xf8] sm:$0xff] %v3623_v32 }
  0x44 PF: > { %v713_v33 = vld [vmem:[%s3809_s18] sm:$0xff]  ;;  %v714_v34 = vld [vmem:[%s3809_s18 + $0x8] sm:$0xff]  ;;  %v715_v35 = vld [vmem:[%s3809_s18 + $0x10] sm:$0xff]  ;;  %p2635_p10 = scmp.ne.s32.totalorder %s3714_s28, 1 }
  0x45   : > { %v729_v36 = vpack.c.bf16 %v714_v34, %v713_v33  ;;  %v716_v37 = vld [vmem:[%s3809_s18 + $0x18] sm:$0xff]  ;;  %v717_v39 = vld [vmem:[%s3809_s18 + $0x20] sm:$0xff]  ;;  %v718_v40 = vld [vmem:[%s3809_s18 + $0x28] sm:$0xff]  ;;  %vm3625_vm0 = vmmov (!%p2635_p10), 0   ;;  %vm2537_vm1 = vcmask (!%p2635_p10), 97280  }
  0x46   : > { %v730_v38 = vpack.c.bf16 %v716_v37, %v715_v35  ;;  %v719_v41 = vld [vmem:[%s3809_s18 + $0x30] sm:$0xff]  ;;  %v731_v42 = vpack.c.bf16 %v718_v40, %v717_v39  ;;  %v720_v43 = vld [vmem:[%s3809_s18 + $0x38] sm:$0xff]  ;;  %v3551_v44 = vld [vmem:[%s3811_s19] sm:$0xff]  }
  0x47   : > { %2913 = vmatprep.subr.bf16.mxu0 %v729_v36  ;;  %3500 = vmatprep.subr.bf16.mxu1 %v729_v36  ;;  %v3552_v45 = vld [vmem:[%s3811_s19 + $0x40] sm:$0xff]   ;;  %v732_v46 = vpack.c.bf16 %v720_v43, %v719_v41  ;;  %v722_v48 = vld [vmem:[%s3809_s18 + $0x48] sm:$0xff]  ;;  %v723_v50 = vld [vmem:[%s3809_s18 + $0x50] sm:$0xff] }
  0x48   : > { %2914 = vmatpush3.bf16.msra.mxu0 %v729_v36  ;;  %3508 = vmatpush3.bf16.msra.mxu1 %v729_v36  ;;  %v721_v47 = vld [vmem:[%s3809_s18 + $0x40] sm:$0xff]  ;;  %v724_v51 = vld [vmem:[%s3809_s18 + $0x58] sm:$0xff]  ;;  %v726_v54 = vld [vmem:[%s3809_s18 + $0x68] sm:$0xff] }
  0x49   : > { %2915 = vmatprep.subr.bf16.mxu0 %v730_v38  ;;  %3501 = vmatprep.subr.bf16.mxu1 %v730_v38  ;;  %v733_v49 = vpack.c.bf16 %v722_v48, %v721_v47  ;;  %v734_v52 = vpack.c.bf16 %v724_v51, %v723_v50  ;;  %v725_v53 = vld [vmem:[%s3809_s18 + $0x60] sm:$0xff]  ;;  %v727_v56 = vld [vmem:[%s3809_s18 + $0x70] sm:$0xff]  ;;  %v728_v57 = vld [vmem:[%s3809_s18 + $0x78] sm:$0xff] }
  0x4a   : > { %2929 = vmatprep.mubr.bf16.mxu0 %v3551_v44  ;;  %2945 = vmatprep.mubr.bf16.mxu1 %v3552_v45  ;;  %v735_v55 = vpack.c.bf16 %v726_v54, %v725_v53  ;;  %v736_v58 = vpack.c.bf16 %v728_v57, %v727_v56  ;;  %v3553_v59 = vld [vmem:[%s3811_s19 + $0x8] sm:$0xff]   ;;  %v3555_v61 = vld [vmem:[%s3811_s19 + $0x10] sm:$0xff]   ;;  %v3557_v63 = vld [vmem:[%s3811_s19 + $0x18] sm:$0xff]  }
  0x4b   : > { %v3554_v60 = vld [vmem:[%s3811_s19 + $0x48] sm:$0xff]   ;;  %v3556_v62 = vld [vmem:[%s3811_s19 + $0x50] sm:$0xff]   ;;  %v3558_v0 = vld [vmem:[%s3811_s19 + $0x58] sm:$0xff]  }
  0x4c   : > { %2916 = vmatpush3.bf16.msra.mxu0 %v730_v38  ;;  %3509 = vmatpush3.bf16.msra.mxu1 %v730_v38  ;;  %v3559_v1 = vld [vmem:[%s3811_s19 + $0x20] sm:$0xff]   ;;  %v3561_v3 = vld [vmem:[%s3811_s19 + $0x28] sm:$0xff]   ;;  %v3563_v5 = vld [vmem:[%s3811_s19 + $0x30] sm:$0xff]  }
  0x4d   : > { %2917 = vmatprep.subr.bf16.mxu0 %v731_v42  ;;  %3502 = vmatprep.subr.bf16.mxu1 %v731_v42  ;;  %v3560_v2 = vld [vmem:[%s3811_s19 + $0x60] sm:$0xff]   ;;  %v3562_v4 = vld [vmem:[%s3811_s19 + $0x68] sm:$0xff]   ;;  %v3564_v6 = vld [vmem:[%s3811_s19 + $0x70] sm:$0xff]  }
  0x4e   : > { %v3565_v7 = vld [vmem:[%s3811_s19 + $0x38] sm:$0xff]   ;;  %v651_v9 = vld [vmem:[#allocation2 + $0x10] sm:$0xff]  ;;  %v649_v11 = vld [vmem:[#allocation2] sm:$0xff] }
  0x4f   : > { %v3566_v8 = vld [vmem:[%s3811_s19 + $0x78] sm:$0xff]   ;;  %v667_v10 = vld [vmem:[#allocation2 + $0x90] sm:$0xff]  ;;  %v665_v12 = vld [vmem:[#allocation2 + $0x80] sm:$0xff] }
  0x50   : > { %2918 = vmatpush3.bf16.msra.mxu0 %v731_v42  ;;  %3510 = vmatpush3.bf16.msra.mxu1 %v731_v42  ;;  %v652_v15 = vld [vmem:[#allocation2 + $0x18] sm:$0xff]  ;;  %v650_v21 = vld [vmem:[#allocation2 + $0x8] sm:$0xff]  ;;  %v655_v33 = vld [vmem:[#allocation2 + $0x30] sm:$0xff] }
  0x51   : > { %2919 = vmatprep.subr.bf16.mxu0 %v732_v46  ;;  %3503 = vmatprep.subr.bf16.mxu1 %v732_v46  ;;  %v668_v16 = vld [vmem:[#allocation2 + $0x98] sm:$0xff]  ;;  %v666_v22 = vld [vmem:[#allocation2 + $0x88] sm:$0xff]  ;;  %v671_v34 = vld [vmem:[#allocation2 + $0xb0] sm:$0xff] }
  0x52   : > { %v653_v35 = vld [vmem:[#allocation2 + $0x20] sm:$0xff]  ;;  %v656_v39 = vld [vmem:[#allocation2 + $0x38] sm:$0xff]  ;;  %v654_v45 = vld [vmem:[#allocation2 + $0x28] sm:$0xff] }
  0x53   : > { %v669_v36 = vld [vmem:[#allocation2 + $0xa0] sm:$0xff]  ;;  %v672_v40 = vld [vmem:[#allocation2 + $0xb8] sm:$0xff]  ;;  %v659_v57 = vld [vmem:[#allocation2 + $0x50] sm:$0xff] }
  0x54   : > { %2920 = vmatpush3.bf16.msra.mxu0 %v732_v46  ;;  %3511 = vmatpush3.bf16.msra.mxu1 %v732_v46  ;;  %v670_v46 = vld [vmem:[#allocation2 + $0xa8] sm:$0xff] }
  0x55   : > { %2921 = vmatprep.subr.bf16.mxu0 %v733_v49  ;;  %3504 = vmatprep.subr.bf16.mxu1 %v733_v49 }
  0x58   : > { %2922 = vmatpush3.bf16.msra.mxu0 %v733_v49  ;;  %3512 = vmatpush3.bf16.msra.mxu1 %v733_v49 }
  0x59   : > { %2923 = vmatprep.subr.bf16.mxu0 %v734_v52  ;;  %3505 = vmatprep.subr.bf16.mxu1 %v734_v52 }
  0x5c   : > { %2924 = vmatpush3.bf16.msra.mxu0 %v734_v52  ;;  %3513 = vmatpush3.bf16.msra.mxu1 %v734_v52 }
  0x5d   : > { %2925 = vmatprep.subr.bf16.mxu0 %v735_v55  ;;  %3506 = vmatprep.subr.bf16.mxu1 %v735_v55 }
  0x60   : > { %2926 = vmatpush3.bf16.msra.mxu0 %v735_v55  ;;  %3514 = vmatpush3.bf16.msra.mxu1 %v735_v55 }
  0x61   : > { %2927 = vmatprep.subr.bf16.mxu0 %v736_v58  ;;  %3507 = vmatprep.subr.bf16.mxu1 %v736_v58 }
  0x64   : > { %2928 = vmatpush3.bf16.msra.mxu0 %v736_v58  ;;  %3515 = vmatpush3.bf16.msra.mxu1 %v736_v58  ;;  %v675_v58 = vld [vmem:[#allocation2 + $0xd0] sm:$0xff] }
  0x67   : > { %2930 = vmatmul.mubr.bf16.vlgmr.msra.gmra.mrb[0].mxu0 %v3553_v59  ;;  %2946 = vmatmul.mubr.bf16.vlgmr.msra.gmra.mrb[0].mxu1 %v3554_v60  ;;  %v657_v59 = vld [vmem:[#allocation2 + $0x40] sm:$0xff] }
  0x68   : > { %2933 = vmatprep.mubr.bf16.mxu0 %v3555_v61  ;;  %2949 = vmatprep.mubr.bf16.mxu1 %v3556_v62  ;;  %v673_v60 = vld [vmem:[#allocation2 + $0xc0] sm:$0xff] }
  0x6f   : > { %2934 = vmatmul.mubr.bf16.gmra.mrb[4].mxu0 %v3557_v63  ;;  %2950 = vmatmul.mubr.bf16.gmra.mrb[4].mxu1 %v3558_v0  ;;  %v660_v63 = vld [vmem:[#allocation2 + $0x58] sm:$0xff] }
  0x70   : > { %2937 = vmatprep.mubr.bf16.mxu0 %v3559_v1  ;;  %2953 = vmatprep.mubr.bf16.mxu1 %v3560_v2  ;;  %v676_v0 = vld [vmem:[#allocation2 + $0xd8] sm:$0xff] }
  0x77   : > { %2938 = vmatmul.mubr.bf16.gmra.mrb[8].mxu0 %v3561_v3  ;;  %2954 = vmatmul.mubr.bf16.gmra.mrb[8].mxu1 %v3562_v4 }
  0x78   : > { %2941 = vmatprep.mubr.bf16.mxu0 %v3563_v5  ;;  %2957 = vmatprep.mubr.bf16.mxu1 %v3564_v6  ;;  %v658_v5 = vld [vmem:[#allocation2 + $0x48] sm:$0xff] }
  0x79   : > { %v674_v6 = vld [vmem:[#allocation2 + $0xc8] sm:$0xff] }
  0x7f   : > { %2942 = vmatmul.mubr.bf16.gmra.mrb[12].mxu0 %v3565_v7  ;;  %2958 = vmatmul.mubr.bf16.gmra.mrb[12].mxu1 %v3566_v8 }
 0x13a   : > { %v2931_v13 = vpop.f32.mrb[0].mxu0  ;;  %v2947_v14 = vpop.f32.mrb[0].mxu1 }
 0x13b   : > { %v996_v17 = vadd.f32 %v2931_v13, %v651_v9  ;;  %v1012_v18 = vadd.f32 %v2947_v14, %v667_v10  ;;  %v867_v19 = vpop.f32.mrb[1].mxu0  ;;  %v931_v20 = vpop.f32.mrb[1].mxu1 }
 0x13c   : > { %v994_v23 = vadd.f32 %v867_v19, %v649_v11  ;;  %v1010_v24 = vadd.f32 %v931_v20, %v665_v12  ;;  %v2932_v25 = vpop.f32.mrb[2].mxu0  ;;  %v2948_v26 = vpop.f32.mrb[2].mxu1  ;;  %v661_v19 = vld [vmem:[#allocation2 + $0x60] sm:$0xff] }
 0x13d   : > { %1028 = vst [vmem:[#allocation2 + $0x10] sm:$0xff] %v996_v17  ;;  %1044 = vst [vmem:[#allocation2 + $0x90] sm:$0xff] %v1012_v18  ;;  %v997_v27 = vadd.f32 %v2932_v25, %v652_v15  ;;  %v1013_v28 = vadd.f32 %v2948_v26, %v668_v16  ;;  %v870_v29 = vpop.f32.mrb[3].mxu0  ;;  %v934_v30 = vpop.f32.mrb[3].mxu1  ;;  %v663_v17 = vld [vmem:[#allocation2 + $0x70] sm:$0xff]  ;;  %v677_v20 = vld [vmem:[#allocation2 + $0xe0] sm:$0xff] }
 0x13e   : > { %1026 = vst [vmem:[#allocation2] sm:$0xff] %v994_v23  ;;  %1042 = vst [vmem:[#allocation2 + $0x80] sm:$0xff] %v1010_v24  ;;  %v995_v31 = vadd.f32 %v870_v29, %v650_v21  ;;  %v1011_v32 = vadd.f32 %v934_v30, %v666_v22  ;;  %v679_v18 = vld [vmem:[#allocation2 + $0xf0] sm:$0xff]  ;;  %v664_v23 = vld [vmem:[#allocation2 + $0x78] sm:$0xff] }
 0x13f   : > { %1029 = vst [vmem:[#allocation2 + $0x18] sm:$0xff] %v997_v27  ;;  %1045 = vst [vmem:[#allocation2 + $0x98] sm:$0xff] %v1013_v28  ;;  %v680_v24 = vld [vmem:[#allocation2 + $0xf8] sm:$0xff]  ;;  %v662_v29 = vld [vmem:[#allocation2 + $0x68] sm:$0xff] }
 0x140   : > { %1027 = vst [vmem:[#allocation2 + $0x8] sm:$0xff] %v995_v31  ;;  %1043 = vst [vmem:[#allocation2 + $0x88] sm:$0xff] %v1011_v32  ;;  %v678_v30 = vld [vmem:[#allocation2 + $0xe8] sm:$0xff] }
 0x142   : > { %v2935_v37 = vpop.f32.mrb[4].mxu0  ;;  %v2951_v38 = vpop.f32.mrb[4].mxu1 }
 0x143   : > { %v1000_v41 = vadd.f32 %v2935_v37, %v655_v33  ;;  %v1016_v42 = vadd.f32 %v2951_v38, %v671_v34  ;;  %v883_v43 = vpop.f32.mrb[5].mxu0  ;;  %v947_v44 = vpop.f32.mrb[5].mxu1 }
 0x144   : > { %v998_v47 = vadd.f32 %v883_v43, %v653_v35  ;;  %v1014_v48 = vadd.f32 %v947_v44, %v669_v36  ;;  %v2936_v49 = vpop.f32.mrb[6].mxu0  ;;  %v2952_v50 = vpop.f32.mrb[6].mxu1  ;;  %v1096_v43 = vld [vmem:[%s4732_s2 + $0x10] sm:$0xff] (!%p2635_p10) }
 0x145   : > { %1032 = vst [vmem:[#allocation2 + $0x30] sm:$0xff] %v1000_v41  ;;  %1048 = vst [vmem:[#allocation2 + $0xb0] sm:$0xff] %v1016_v42  ;;  %v1001_v51 = vadd.f32 %v2936_v49, %v656_v39  ;;  %v1017_v52 = vadd.f32 %v2952_v50, %v672_v40  ;;  %v886_v53 = vpop.f32.mrb[7].mxu0  ;;  %v950_v54 = vpop.f32.mrb[7].mxu1  ;;  %v1094_v41 = vld [vmem:[%s4732_s2] sm:$0xff] (!%p2635_p10)  ;;  %v1095_v42 = vld [vmem:[%s4732_s2 + $0x8] sm:$0xff] (!%p2635_p10) }
 0x146   : > { %1030 = vst [vmem:[#allocation2 + $0x20] sm:$0xff] %v998_v47  ;;  %1046 = vst [vmem:[#allocation2 + $0xa0] sm:$0xff] %v1014_v48  ;;  %v999_v55 = vadd.f32 %v886_v53, %v654_v45  ;;  %v1015_v56 = vadd.f32 %v950_v54, %v670_v46  ;;  %v3316_v44 = vpack.c.bf16 (!%p2635_p10), %v1095_v42, %v1094_v41  ;;  %v1097_v45 = vld [vmem:[%s4732_s2 + $0x18] sm:$0xff] (!%p2635_p10)  ;;  %v1098_v47 = vld [vmem:[%s4732_s2 + $0x20] sm:$0xff] (!%p2635_p10) }
 0x147   : > { %1033 = vst [vmem:[#allocation2 + $0x38] sm:$0xff] %v1001_v51  ;;  %1049 = vst [vmem:[#allocation2 + $0xb8] sm:$0xff] %v1017_v52  ;;  %v3320_v46 = vpack.c.bf16 (!%p2635_p10), %v1097_v45, %v1096_v43  ;;  %v1099_v48 = vld [vmem:[%s4732_s2 + $0x28] sm:$0xff] (!%p2635_p10)  ;;  %v1062_v50 = vld [vmem:[#allocation2] sm:$0xff] (!%p2635_p10) }
 0x148   : > { %1031 = vst [vmem:[#allocation2 + $0x28] sm:$0xff] %v999_v55  ;;  %1047 = vst [vmem:[#allocation2 + $0xa8] sm:$0xff] %v1015_v56  ;;  %3317 = vmatprep.subr.bf16.mxu0 (!%p2635_p10), %v3316_v44  ;;  %v3324_v49 = vpack.c.bf16 (!%p2635_p10), %v1099_v48, %v1098_v47  ;;  %v1100_v51 = vld [vmem:[%s4732_s2 + $0x30] sm:$0xff] (!%p2635_p10)  ;;  %v1101_v52 = vld [vmem:[%s4732_s2 + $0x38] sm:$0xff] (!%p2635_p10)  ;;  %2993 = vmatprep.mubr.f32.mxu0 (!%p2635_p10), %v1062_v50 }
 0x149   : > { %3319 = vmatpush3.bf16.msra.mxu0 (!%p2635_p10), %v3316_v44  ;;  %v3328_v53 = vpack.c.bf16 (!%p2635_p10), %v1101_v52, %v1100_v51  ;;  %v1102_v54 = vld [vmem:[%s4732_s2 + $0x40] sm:$0xff] (!%p2635_p10)  ;;  %v1103_v55 = vld [vmem:[%s4732_s2 + $0x48] sm:$0xff] (!%p2635_p10)  ;;  %v1081_v41 = vld [vmem:[#allocation2 + $0x98] sm:$0xff] (!%p2635_p10) }
 0x14a   : > { %v2939_v61 = vpop.f32.mrb[8].mxu0  ;;  %v2955_v62 = vpop.f32.mrb[8].mxu1  ;;  %3321 = vmatprep.subr.bf16.mxu0 (!%p2635_p10), %v3320_v46  ;;  %v3332_v56 = vpack.c.bf16 (!%p2635_p10), %v1103_v55, %v1102_v54  ;;  %v1388_v54 = vld [vmem:[%s4734_s4 + $0x70] sm:$0xff] (!%p2635_p10)  ;;  %v1389_v55 = vld [vmem:[%s4734_s4 + $0x78] sm:$0xff] (!%p2635_p10) }
 0x14b   : > { %v1004_v1 = vadd.f32 %v2939_v61, %v659_v57  ;;  %v1020_v2 = vadd.f32 %v2955_v62, %v675_v58  ;;  %v899_v3 = vpop.f32.mrb[9].mxu0  ;;  %v963_v4 = vpop.f32.mrb[9].mxu1  ;;  %v1104_v57 = vld [vmem:[%s4732_s2 + $0x50] sm:$0xff] (!%p2635_p10)  ;;  %v1105_v58 = vld [vmem:[%s4732_s2 + $0x58] sm:$0xff] (!%p2635_p10) }
 0x14c   : > { %v1002_v7 = vadd.f32 %v899_v3, %v657_v59  ;;  %v1018_v8 = vadd.f32 %v963_v4, %v673_v60  ;;  %v2940_v9 = vpop.f32.mrb[10].mxu0  ;;  %v2956_v10 = vpop.f32.mrb[10].mxu1  ;;  %v1374_v59 = vld [vmem:[%s4734_s4] sm:$0xff] (!%p2635_p10)  ;;  %v1375_v60 = vld [vmem:[%s4734_s4 + $0x8] sm:$0xff] (!%p2635_p10)  ;;  %v1376_v61 = vld [vmem:[%s4734_s4 + $0x10] sm:$0xff] (!%p2635_p10)  ;;  %v3336_v62 = vpack.c.bf16 (!%p2635_p10), %v1105_v58, %v1104_v57 }
 0x14d   : > { %1036 = vst [vmem:[#allocation2 + $0x50] sm:$0xff] %v1004_v1  ;;  %1052 = vst [vmem:[#allocation2 + $0xd0] sm:$0xff] %v1020_v2  ;;  %v1005_v11 = vadd.f32 %v2940_v9, %v660_v63  ;;  %v1021_v12 = vadd.f32 %v2956_v10, %v676_v0  ;;  %v902_v13 = vpop.f32.mrb[11].mxu0  ;;  %v966_v14 = vpop.f32.mrb[11].mxu1  ;;  %3323 = vmatpush3.bf16.msra.mxu0 (!%p2635_p10), %v3320_v46  ;;  %v1106_v63 = vld [vmem:[%s4732_s2 + $0x60] sm:$0xff] (!%p2635_p10)  ;;  %v3348_v0 = vpack.c.bf16 (!%p2635_p10), %v1375_v60, %v1374_v59  ;;  %v1377_v1 = vld [vmem:[%s4734_s4 + $0x18] sm:$0xff] (!%p2635_p10) }
 0x14e   : > { %1034 = vst [vmem:[#allocation2 + $0x40] sm:$0xff] %v1002_v7  ;;  %1050 = vst [vmem:[#allocation2 + $0xc0] sm:$0xff] %v1018_v8  ;;  %v1003_v15 = vadd.f32 %v902_v13, %v658_v5  ;;  %v1019_v16 = vadd.f32 %v966_v14, %v674_v6  ;;  %3325 = vmatprep.subr.bf16.mxu0 (!%p2635_p10), %v3324_v49  ;;  %v1107_v2 = vld [vmem:[%s4732_s2 + $0x68] sm:$0xff] (!%p2635_p10)  ;;  %v3352_v3 = vpack.c.bf16 (!%p2635_p10), %v1377_v1, %v1376_v61  ;;  %v1378_v4 = vld [vmem:[%s4734_s4 + $0x20] sm:$0xff] (!%p2635_p10) }
 0x14f   : > { %1037 = vst [vmem:[#allocation2 + $0x58] sm:$0xff] %v1005_v11  ;;  %1053 = vst [vmem:[#allocation2 + $0xd8] sm:$0xff] %v1021_v12  ;;  %v1379_v5 = vld [vmem:[%s4734_s4 + $0x28] sm:$0xff] (!%p2635_p10)  ;;  %3349 = vmatprep.subr.bf16.mxu1 (!%p2635_p10), %v3348_v0  ;;  %v3340_v6 = vpack.c.bf16 (!%p2635_p10), %v1107_v2, %v1106_v63  ;;  %v1108_v7 = vld [vmem:[%s4732_s2 + $0x70] sm:$0xff] (!%p2635_p10) }
 0x150   : > { %1035 = vst [vmem:[#allocation2 + $0x48] sm:$0xff] %v1003_v15  ;;  %1051 = vst [vmem:[#allocation2 + $0xc8] sm:$0xff] %v1019_v16  ;;  %3351 = vmatpush3.bf16.msra.mxu1 (!%p2635_p10), %v3348_v0  ;;  %v3356_v8 = vpack.c.bf16 (!%p2635_p10), %v1379_v5, %v1378_v4  ;;  %v1109_v9 = vld [vmem:[%s4732_s2 + $0x78] sm:$0xff] (!%p2635_p10)  ;;  %v1380_v10 = vld [vmem:[%s4734_s4 + $0x30] sm:$0xff] (!%p2635_p10) }
 0x151   : > { %3327 = vmatpush3.bf16.msra.mxu0 (!%p2635_p10), %v3324_v49  ;;  %3353 = vmatprep.subr.bf16.mxu1 (!%p2635_p10), %v3352_v3  ;;  %v1381_v11 = vld [vmem:[%s4734_s4 + $0x38] sm:$0xff] (!%p2635_p10)  ;;  %v3344_v12 = vpack.c.bf16 (!%p2635_p10), %v1109_v9, %v1108_v7  ;;  %v1382_v14 = vld [vmem:[%s4734_s4 + $0x40] sm:$0xff] (!%p2635_p10)  ;;  %v1383_v15 = vld [vmem:[%s4734_s4 + $0x48] sm:$0xff] (!%p2635_p10) }
 0x152   : > { %v2943_v21 = vpop.f32.mrb[12].mxu0  ;;  %v2959_v22 = vpop.f32.mrb[12].mxu1  ;;  %1061 = sbr.rel (%p2635_p10) target bundleno = 1881 (0x759), region = 117  ;;  %3329 = vmatprep.subr.bf16.mxu0 (!%p2635_p10), %v3328_v53  ;;  %v3360_v13 = vpack.c.bf16 (!%p2635_p10), %v1381_v11, %v1380_v10  ;;  %v3364_v16 = vpack.c.bf16 (!%p2635_p10), %v1383_v15, %v1382_v14  ;;  %v1082_v42 = vld [vmem:[#allocation2 + $0xa0] sm:$0xff] (!%p2635_p10)  ;;  %v1083_v43 = vld [vmem:[#allocation2 + $0xa8] sm:$0xff] (!%p2635_p10)  ;;  %v1084_v44 = vld [vmem:[#allocation2 + $0xb0] sm:$0xff] (!%p2635_p10) }
 0x153   : > { %v1008_v25 = vadd.f32 %v2943_v21, %v663_v17  ;;  %v1024_v26 = vadd.f32 %v2959_v22, %v679_v18  ;;  %v915_v27 = vpop.f32.mrb[13].mxu0  ;;  %v979_v28 = vpop.f32.mrb[13].mxu1  ;;  %v1384_v17 = vld [vmem:[%s4734_s4 + $0x50] sm:$0xff] (!%p2635_p10)  ;;  %v1385_v18 = vld [vmem:[%s4734_s4 + $0x58] sm:$0xff] (!%p2635_p10)  ;;  %v1386_v22 = vld [vmem:[%s4734_s4 + $0x60] sm:$0xff] (!%p2635_p10) }
 0x154   : > { %v1006_v31 = vadd.f32 %v915_v27, %v661_v19  ;;  %v1022_v32 = vadd.f32 %v979_v28, %v677_v20  ;;  %v2944_v33 = vpop.f32.mrb[14].mxu0  ;;  %v2960_v34 = vpop.f32.mrb[14].mxu1  ;;  %3355 = vmatpush3.bf16.msra.mxu1 (!%p2635_p10), %v3352_v3  ;;  %v1063_v19 = vld [vmem:[#allocation2 + $0x8] sm:$0xff] (!%p2635_p10)  ;;  %v1064_v20 = vld [vmem:[#allocation2 + $0x10] sm:$0xff] (!%p2635_p10)  ;;  %v3368_v21 = vpack.c.bf16 (!%p2635_p10), %v1385_v18, %v1384_v17  ;;  %v1085_v45 = vld [vmem:[#allocation2 + $0xb8] sm:$0xff] (!%p2635_p10) }
 0x155   : > { %1040 = vst [vmem:[#allocation2 + $0x70] sm:$0xff] %v1008_v25  ;;  %1056 = vst [vmem:[#allocation2 + $0xf0] sm:$0xff] %v1024_v26  ;;  %v1009_v35 = vadd.f32 %v2944_v33, %v664_v23  ;;  %v1025_v36 = vadd.f32 %v2960_v34, %v680_v24  ;;  %v918_v37 = vpop.f32.mrb[15].mxu0  ;;  %v982_v38 = vpop.f32.mrb[15].mxu1  ;;  %3331 = vmatpush3.bf16.msra.mxu0 (!%p2635_p10), %v3328_v53  ;;  %3357 = vmatprep.subr.bf16.mxu1 (!%p2635_p10), %v3356_v8  ;;  %v1387_v23 = vld [vmem:[%s4734_s4 + $0x68] sm:$0xff] (!%p2635_p10)  ;;  %v1065_v24 = vld [vmem:[#allocation2 + $0x18] sm:$0xff] (!%p2635_p10) }
 0x156   : > { %1038 = vst [vmem:[#allocation2 + $0x60] sm:$0xff] %v1006_v31  ;;  %1054 = vst [vmem:[#allocation2 + $0xe0] sm:$0xff] %v1022_v32  ;;  %v1007_v39 = vadd.f32 %v918_v37, %v662_v29  ;;  %v1023_v40 = vadd.f32 %v982_v38, %v678_v30  ;;  %3333 = vmatprep.subr.bf16.mxu0 (!%p2635_p10), %v3332_v56  ;;  %v1066_v25 = vld [vmem:[#allocation2 + $0x20] sm:$0xff] (!%p2635_p10)  ;;  %v3372_v26 = vpack.c.bf16 (!%p2635_p10), %v1387_v23, %v1386_v22  ;;  %v1067_v27 = vld [vmem:[#allocation2 + $0x28] sm:$0xff] (!%p2635_p10) }
 0x157   : > { %1041 = vst [vmem:[#allocation2 + $0x78] sm:$0xff] %v1009_v35  ;;  %1057 = vst [vmem:[#allocation2 + $0xf8] sm:$0xff] %v1025_v36  ;;  %v1068_v28 = vld [vmem:[#allocation2 + $0x30] sm:$0xff] (!%p2635_p10)  ;;  %v1069_v29 = vld [vmem:[#allocation2 + $0x38] sm:$0xff] (!%p2635_p10) }
 0x158   : > { %1039 = vst [vmem:[#allocation2 + $0x68] sm:$0xff] %v1007_v39  ;;  %1055 = vst [vmem:[#allocation2 + $0xe8] sm:$0xff] %v1023_v40  ;;  %3359 = vmatpush3.bf16.msra.mxu1 (!%p2635_p10), %v3356_v8  ;;  %v1070_v30 = vld [vmem:[#allocation2 + $0x40] sm:$0xff] (!%p2635_p10)  ;;  %v1071_v31 = vld [vmem:[#allocation2 + $0x48] sm:$0xff] (!%p2635_p10) }
 0x159   : > { %3335 = vmatpush3.bf16.msra.mxu0 %v3332_v56  ;;  %3361 = vmatprep.subr.bf16.mxu1 %v3360_v13  ;;  %v1072_v32 = vld [vmem:[#allocation2 + $0x50] sm:$0xff]  ;;  %v1073_v33 = vld [vmem:[#allocation2 + $0x58] sm:$0xff]  ;;  %v1078_v38 = vld [vmem:[#allocation2 + $0x80] sm:$0xff]  ;;  %v3376_v56 = vpack.c.bf16 %v1389_v55, %v1388_v54 }
 0x15a   : > { %3337 = vmatprep.subr.bf16.mxu0 %v3336_v62  ;;  %v1079_v39 = vld [vmem:[#allocation2 + $0x88] sm:$0xff]  ;;  %v1080_v40 = vld [vmem:[#allocation2 + $0x90] sm:$0xff]  ;;  %v1086_v46 = vld [vmem:[#allocation2 + $0xc0] sm:$0xff] }
 0x15b   : > { %v1087_v47 = vld [vmem:[#allocation2 + $0xc8] sm:$0xff]  ;;  %v1088_v48 = vld [vmem:[#allocation2 + $0xd0] sm:$0xff]  ;;  %v1089_v49 = vld [vmem:[#allocation2 + $0xd8] sm:$0xff] }
 0x15c   : > { %3363 = vmatpush3.bf16.msra.mxu1 %v3360_v13  ;;  %v1076_v36 = vld [vmem:[#allocation2 + $0x70] sm:$0xff]  ;;  %v1622_v57 = vld [vmem:[%s4738_s8] sm:$0xff]  ;;  %v1623_v58 = vld [vmem:[%s4738_s8 + $0x8] sm:$0xff] }
 0x15d   : > { %3339 = vmatpush3.bf16.msra.mxu0 %v3336_v62  ;;  %3365 = vmatprep.subr.bf16.mxu1 %v3364_v16  ;;  %v1074_v34 = vld [vmem:[#allocation2 + $0x60] sm:$0xff]  ;;  %v1092_v52 = vld [vmem:[#allocation2 + $0xf0] sm:$0xff]  ;;  %v3380_v60 = vpack.c.bf16 %v1623_v58, %v1622_v57  ;;  %v1625_v61 = vld [vmem:[%s4738_s8 + $0x18] sm:$0xff] }
 0x15e   : > { %3341 = vmatprep.subr.bf16.mxu0 %v3340_v6  ;;  %v1077_v37 = vld [vmem:[#allocation2 + $0x78] sm:$0xff]  ;;  %v1090_v50 = vld [vmem:[#allocation2 + $0xe0] sm:$0xff]  ;;  %v1624_v59 = vld [vmem:[%s4738_s8 + $0x10] sm:$0xff] }
 0x15f   : > { %v1075_v35 = vld [vmem:[#allocation2 + $0x68] sm:$0xff]  ;;  %v1093_v53 = vld [vmem:[#allocation2 + $0xf8] sm:$0xff]  ;;  %v3384_v62 = vpack.c.bf16 %v1625_v61, %v1624_v59  ;;  %v1626_v63 = vld [vmem:[%s4738_s8 + $0x20] sm:$0xff] }
 0x160   : > { %3367 = vmatpush3.bf16.msra.mxu1 %v3364_v16  ;;  %v1091_v51 = vld [vmem:[#allocation2 + $0xe8] sm:$0xff]  ;;  %v1628_v2 = vld [vmem:[%s4738_s8 + $0x30] sm:$0xff]  ;;  %v1629_v3 = vld [vmem:[%s4738_s8 + $0x38] sm:$0xff] }
 0x161   : > { %3343 = vmatpush3.bf16.msra.mxu0 %v3340_v6  ;;  %3369 = vmatprep.subr.bf16.mxu1 %v3368_v21  ;;  %v1627_v0 = vld [vmem:[%s4738_s8 + $0x28] sm:$0xff]  ;;  %v3967_v4 = vpack.c.bf16 %v1629_v3, %v1628_v2  ;;  %v1630_v5 = vld [vmem:[%s4738_s8 + $0x40] sm:$0xff]  ;;  %v1632_v8 = vld [vmem:[%s4738_s8 + $0x50] sm:$0xff] }
 0x162   : > { %3345 = vmatprep.subr.bf16.mxu0 %v3344_v12  ;;  %v3388_v1 = vpack.c.bf16 %v1627_v0, %v1626_v63  ;;  %v1631_v6 = vld [vmem:[%s4738_s8 + $0x48] sm:$0xff]  ;;  %v1633_v9 = vld [vmem:[%s4738_s8 + $0x58] sm:$0xff]  ;;  %v1634_v11 = vld [vmem:[%s4738_s8 + $0x60] sm:$0xff] }
 0x163   : > { %v3976_v7 = vpack.c.bf16 %v1631_v6, %v1630_v5  ;;  %v3986_v10 = vpack.c.bf16 %v1633_v9, %v1632_v8  ;;  %v4004_v14 = vld [vmem:[%s4733_s3] ss:$0 sm:$0xff] }
 0x164   : > { %3371 = vmatpush3.bf16.msra.mxu1 %v3368_v21 }
 0x165   : > { %3347 = vmatpush3.bf16.msra.mxu0 %v3344_v12  ;;  %3373 = vmatprep.subr.bf16.mxu1 %v3372_v26  ;;  %v1635_v12 = vld [vmem:[%s4738_s8 + $0x68] sm:$0xff] }
 0x166   : > { %3381 = vmatprep.subr.bf16.mxu0 %v3380_v60  ;;  %v3996_v13 = vpack.c.bf16 %v1635_v12, %v1634_v11 }
 0x168   : > { %2994 = vmatmul.mubr.f32.vlgmr.msra.gmra.mrb[0].mxu0 %v1063_v19  ;;  %3375 = vmatpush3.bf16.msra.mxu1 %v3372_v26 }
 0x169   : > { %2996 = vmatprep.mubr.f32.mxu0 %v1064_v20  ;;  %3377 = vmatprep.subr.bf16.mxu1 %v3376_v56 }
 0x16a   : > { %3383 = vmatpush3.bf16.msra.mxu0 %v3380_v60 }
 0x16b   : > { %3385 = vmatprep.subr.bf16.mxu0 %v3384_v62 }
 0x16c   : > { %2997 = vmatmul.mubr.f32.gmra.mrb[2].mxu0 %v1065_v24  ;;  %3379 = vmatpush3.bf16.msra.mxu1 %v3376_v56 }
 0x16d   : > { %2999 = vmatprep.mubr.f32.mxu0 %v1066_v25  ;;  %3413 = vmatprep.subr.bf16.mxu1 %v3380_v60 }
 0x16e   : > { %3387 = vmatpush3.bf16.msra.mxu0 %v3384_v62 }
 0x16f   : > { %3389 = vmatprep.subr.bf16.mxu0 %v3388_v1 }
 0x170   : > { %3000 = vmatmul.mubr.f32.gmra.mrb[4].mxu0 %v1067_v27 }
 0x171   : > { %3002 = vmatprep.mubr.f32.mxu0 %v1068_v28 }
 0x172   : > { %3391 = vmatpush3.bf16.msra.mxu0 %v3388_v1 }
 0x173   : > { %3393 = vmatprep.subr.bf16.mxu0 %v3967_v4 }
 0x174   : > { %3003 = vmatmul.mubr.f32.gmra.mrb[6].mxu0 %v1069_v29 }
 0x175   : > { %3005 = vmatprep.mubr.f32.mxu0 %v1070_v30 }
 0x176   : > { %3395 = vmatpush3.bf16.msra.mxu0 %v3967_v4 }
 0x177   : > { %3397 = vmatprep.subr.bf16.mxu0 %v3976_v7 }
 0x178   : > { %3006 = vmatmul.mubr.f32.gmra.mrb[8].mxu0 %v1071_v31 }
 0x179   : > { %3008 = vmatprep.mubr.f32.mxu0 %v1072_v32 }
 0x17a   : > { %3399 = vmatpush3.bf16.msra.mxu0 %v3976_v7 }
 0x17b   : > { %3401 = vmatprep.subr.bf16.mxu0 %v3986_v10 }
 0x17c   : > { %3009 = vmatmul.mubr.f32.gmra.mrb[10].mxu0 %v1073_v33 }
 0x17d   : > { %3011 = vmatprep.mubr.f32.mxu0 %v1074_v34 }
 0x17e   : > { %3403 = vmatpush3.bf16.msra.mxu0 %v3986_v10 }
 0x17f   : > { %3405 = vmatprep.subr.bf16.mxu0 %v3996_v13 }
 0x180   : > { %3012 = vmatmul.mubr.f32.gmra.mrb[12].mxu0 %v1075_v35 }
 0x181   : > { %3014 = vmatprep.mubr.f32.mxu0 %v1076_v36 }
 0x182   : > { %3407 = vmatpush3.bf16.msra.mxu0 %v3996_v13 }
 0x184   : > { %3015 = vmatmul.mubr.f32.gmra.mrb[14].mxu0 %v1077_v37 }
 0x185   : > { %3017 = vmatprep.mubr.f32.mxu0 %v1078_v38 }
 0x188   : > { %3018 = vmatmul.mubr.f32.gmra.mrb[16].mxu0 %v1079_v39 }
 0x189   : > { %3020 = vmatprep.mubr.f32.mxu0 %v1080_v40 }
 0x18c   : > { %3021 = vmatmul.mubr.f32.gmra.mrb[18].mxu0 %v1081_v41 }
 0x18d   : > { %3023 = vmatprep.mubr.f32.mxu0 %v1082_v42 }
 0x190   : > { %3024 = vmatmul.mubr.f32.gmra.mrb[20].mxu0 %v1083_v43 }
 0x191   : > { %3026 = vmatprep.mubr.f32.mxu0 %v1084_v44 }
 0x194   : > { %3027 = vmatmul.mubr.f32.gmra.mrb[22].mxu0 %v1085_v45 }
 0x195   : > { %3029 = vmatprep.mubr.f32.mxu0 %v1086_v46 }
 0x198   : > { %3030 = vmatmul.mubr.f32.gmra.mrb[24].mxu0 %v1087_v47 }
 0x199   : > { %3032 = vmatprep.mubr.f32.mxu0 %v1088_v48 }
 0x19c   : > { %3033 = vmatmul.mubr.f32.gmra.mrb[26].mxu0 %v1089_v49 }
 0x19d   : > { %3035 = vmatprep.mubr.f32.mxu0 %v1090_v50 }
 0x1a0   : > { %3036 = vmatmul.mubr.f32.gmra.mrb[28].mxu0 %v1091_v51 }
 0x1a1   : > { %3038 = vmatprep.mubr.f32.mxu0 %v1092_v52 }
 0x1a4   : > { %3039 = vmatmul.mubr.f32.gmra.mrb[30].mxu0 %v1093_v53 }
 0x23b   : > { %v2995_v15 = vpop.f32.mrb[0].mxu0 }
 0x23c   : > { %v1189_v16 = vadd.f32 %v2995_v15, %v4004_v14  ;;  %v1183_v17 = vpop.f32.mrb[1].mxu0 }
 0x23d   : > { %v1184_v18 = vadd.f32 %v4004_v14, %v1183_v17 }
 0x23e   : > { %v1343_v21 = vmax.f32 %v1189_v16, 0.0 }
 0x23f   : > { %v2998_v19 = vpop.f32.mrb[2].mxu0  ;;  %v1342_v20 = vmax.f32 %v1184_v18, 0.0 }
 0x240   : > { %v1199_v22 = vadd.f32 %v2998_v19, %v4004_v14  ;;  %v1193_v23 = vpop.f32.mrb[3].mxu0 }
 0x241   : > { %v1194_v24 = vadd.f32 %v4004_v14, %v1193_v23  ;;  %3073 = vmatprep.mubr.f32.mxu1 %v1342_v20 }
 0x242   : > { %3074 = vmatmul.mubr.f32.vlgmr.msra.gmra.mrb[0].mxu1 %v1343_v21  ;;  %v1345_v27 = vmax.f32 %v1199_v22, 0.0 }
 0x243   : > { %v1344_v25 = vmax.f32 %v1194_v24, 0.0  ;;  %v3001_v26 = vpop.f32.mrb[4].mxu0  ;;  %3415 = vmatpush3.bf16.msra.mxu1 %v3380_v60 }
 0x244   : > { %v1209_v28 = vadd.f32 %v3001_v26, %v4004_v14  ;;  %v1203_v29 = vpop.f32.mrb[5].mxu0  ;;  %3417 = vmatprep.subr.bf16.mxu1 %v3384_v62 }
 0x245   : > { %v1204_v30 = vadd.f32 %v4004_v14, %v1203_v29  ;;  %3076 = vmatprep.mubr.f32.mxu1 %v1344_v25 }
 0x246   : > { %3077 = vmatmul.mubr.f32.gmra.mrb[2].mxu1 %v1345_v27  ;;  %v1347_v33 = vmax.f32 %v1209_v28, 0.0 }
 0x247   : > { %v1346_v31 = vmax.f32 %v1204_v30, 0.0  ;;  %v3004_v32 = vpop.f32.mrb[6].mxu0  ;;  %3419 = vmatpush3.bf16.msra.mxu1 %v3384_v62 }
 0x248   : > { %v1219_v34 = vadd.f32 %v3004_v32, %v4004_v14  ;;  %v1213_v35 = vpop.f32.mrb[7].mxu0  ;;  %3421 = vmatprep.subr.bf16.mxu1 %v3388_v1 }
 0x249   : > { %v1214_v36 = vadd.f32 %v4004_v14, %v1213_v35  ;;  %3079 = vmatprep.mubr.f32.mxu1 %v1346_v31 }
 0x24a   : > { %3080 = vmatmul.mubr.f32.gmra.mrb[4].mxu1 %v1347_v33  ;;  %v1349_v39 = vmax.f32 %v1219_v34, 0.0 }
 0x24b   : > { %v1348_v37 = vmax.f32 %v1214_v36, 0.0  ;;  %v3007_v38 = vpop.f32.mrb[8].mxu0  ;;  %3423 = vmatpush3.bf16.msra.mxu1 %v3388_v1 }
 0x24c   : > { %v1229_v40 = vadd.f32 %v3007_v38, %v4004_v14  ;;  %v1223_v41 = vpop.f32.mrb[9].mxu0  ;;  %3425 = vmatprep.subr.bf16.mxu1 %v3967_v4 }
 0x24d   : > { %v1224_v42 = vadd.f32 %v4004_v14, %v1223_v41  ;;  %3082 = vmatprep.mubr.f32.mxu1 %v1348_v37 }
 0x24e   : > { %3083 = vmatmul.mubr.f32.gmra.mrb[6].mxu1 %v1349_v39  ;;  %v1351_v45 = vmax.f32 %v1229_v40, 0.0 }
 0x24f   : > { %v1350_v43 = vmax.f32 %v1224_v42, 0.0  ;;  %v3010_v44 = vpop.f32.mrb[10].mxu0  ;;  %3427 = vmatpush3.bf16.msra.mxu1 %v3967_v4 }
 0x250   : > { %v1239_v46 = vadd.f32 %v3010_v44, %v4004_v14  ;;  %v1233_v47 = vpop.f32.mrb[11].mxu0  ;;  %3429 = vmatprep.subr.bf16.mxu1 %v3976_v7 }
 0x251   : > { %v1234_v48 = vadd.f32 %v4004_v14, %v1233_v47  ;;  %3085 = vmatprep.mubr.f32.mxu1 %v1350_v43 }
 0x252   : > { %3086 = vmatmul.mubr.f32.gmra.mrb[8].mxu1 %v1351_v45  ;;  %v1353_v51 = vmax.f32 %v1239_v46, 0.0 }
 0x253   : > { %v1352_v49 = vmax.f32 %v1234_v48, 0.0  ;;  %v3013_v50 = vpop.f32.mrb[12].mxu0  ;;  %3431 = vmatpush3.bf16.msra.mxu1 %v3976_v7  ;;  %v1636_v48 = vld [vmem:[%s4738_s8 + $0x70] sm:$0xff] }
 0x254   : > { %v1249_v52 = vadd.f32 %v3013_v50, %v4004_v14  ;;  %v1243_v53 = vpop.f32.mrb[13].mxu0  ;;  %3433 = vmatprep.subr.bf16.mxu1 %v3986_v10 }
 0x255   : > { %v1244_v54 = vadd.f32 %v4004_v14, %v1243_v53  ;;  %3088 = vmatprep.mubr.f32.mxu1 %v1352_v49  ;;  %v1637_v49 = vld [vmem:[%s4738_s8 + $0x78] sm:$0xff] }
 0x256   : > { %3089 = vmatmul.mubr.f32.gmra.mrb[10].mxu1 %v1353_v51  ;;  %v1355_v57 = vmax.f32 %v1249_v52, 0.0  ;;  %v3408_v50 = vpack.c.bf16 %v1637_v49, %v1636_v48 }
 0x257   : > { %v1354_v55 = vmax.f32 %v1244_v54, 0.0  ;;  %v3016_v56 = vpop.f32.mrb[14].mxu0  ;;  %3435 = vmatpush3.bf16.msra.mxu1 %v3986_v10 }
 0x258   : > { %v1259_v58 = vadd.f32 %v3016_v56, %v4004_v14  ;;  %v1253_v59 = vpop.f32.mrb[15].mxu0  ;;  %3437 = vmatprep.subr.bf16.mxu1 %v3996_v13  ;;  %3409 = vmatprep.subr.bf16.mxu0 %v3408_v50 }
 0x259   : > { %v1254_v60 = vadd.f32 %v4004_v14, %v1253_v59  ;;  %3091 = vmatprep.mubr.f32.mxu1 %v1354_v55  ;;  %3411 = vmatpush3.bf16.msra.mxu0 %v3408_v50 }
 0x25a   : > { %3092 = vmatmul.mubr.f32.gmra.mrb[12].mxu1 %v1355_v57  ;;  %v1357_v63 = vmax.f32 %v1259_v58, 0.0 }
 0x25b   : > { %v1356_v61 = vmax.f32 %v1254_v60, 0.0  ;;  %v3019_v62 = vpop.f32.mrb[16].mxu0  ;;  %3439 = vmatpush3.bf16.msra.mxu1 %v3996_v13 }
 0x25c   : > { %v1269_v0 = vadd.f32 %v3019_v62, %v4004_v14  ;;  %v1263_v1 = vpop.f32.mrb[17].mxu0  ;;  %3441 = vmatprep.subr.bf16.mxu1 %v3408_v50 }
 0x25d   : > { %v1264_v2 = vadd.f32 %v4004_v14, %v1263_v1  ;;  %3094 = vmatprep.mubr.f32.mxu1 %v1356_v61 }
 0x25e   : > { %3095 = vmatmul.mubr.f32.gmra.mrb[14].mxu1 %v1357_v63  ;;  %v1359_v5 = vmax.f32 %v1269_v0, 0.0 }
 0x25f   : > { %v1358_v3 = vmax.f32 %v1264_v2, 0.0  ;;  %v3022_v4 = vpop.f32.mrb[18].mxu0  ;;  %3443 = vmatpush3.bf16.msra.mxu1 %v3408_v50 }
 0x260   : > { %v1279_v6 = vadd.f32 %v3022_v4, %v4004_v14  ;;  %v1273_v7 = vpop.f32.mrb[19].mxu0 }
 0x261   : > { %v1274_v8 = vadd.f32 %v4004_v14, %v1273_v7  ;;  %3097 = vmatprep.mubr.f32.mxu1 %v1358_v3 }
 0x262   : > { %3098 = vmatmul.mubr.f32.gmra.mrb[16].mxu1 %v1359_v5  ;;  %v1361_v11 = vmax.f32 %v1279_v6, 0.0 }
 0x263   : > { %v1360_v9 = vmax.f32 %v1274_v8, 0.0  ;;  %v3025_v10 = vpop.f32.mrb[20].mxu0 }
 0x264   : > { %v1289_v12 = vadd.f32 %v3025_v10, %v4004_v14  ;;  %v1283_v13 = vpop.f32.mrb[21].mxu0 }
 0x265   : > { %v1284_v15 = vadd.f32 %v4004_v14, %v1283_v13  ;;  %3100 = vmatprep.mubr.f32.mxu1 %v1360_v9 }
 0x266   : > { %3101 = vmatmul.mubr.f32.gmra.mrb[18].mxu1 %v1361_v11  ;;  %v1363_v18 = vmax.f32 %v1289_v12, 0.0 }
 0x267   : > { %v1362_v16 = vmax.f32 %v1284_v15, 0.0  ;;  %v3028_v17 = vpop.f32.mrb[22].mxu0 }
 0x268   : > { %v1299_v19 = vadd.f32 %v3028_v17, %v4004_v14  ;;  %v1293_v20 = vpop.f32.mrb[23].mxu0 }
 0x269   : > { %v1294_v21 = vadd.f32 %v4004_v14, %v1293_v20  ;;  %3103 = vmatprep.mubr.f32.mxu1 %v1362_v16 }
 0x26a   : > { %3104 = vmatmul.mubr.f32.gmra.mrb[20].mxu1 %v1363_v18  ;;  %v1365_v24 = vmax.f32 %v1299_v19, 0.0 }
 0x26b   : > { %v1364_v22 = vmax.f32 %v1294_v21, 0.0  ;;  %v3031_v23 = vpop.f32.mrb[24].mxu0 }
 0x26c   : > { %v1309_v25 = vadd.f32 %v3031_v23, %v4004_v14  ;;  %v1303_v26 = vpop.f32.mrb[25].mxu0 }
 0x26d   : > { %v1304_v27 = vadd.f32 %v4004_v14, %v1303_v26  ;;  %3106 = vmatprep.mubr.f32.mxu1 %v1364_v22 }
 0x26e   : > { %3107 = vmatmul.mubr.f32.gmra.mrb[22].mxu1 %v1365_v24  ;;  %v1367_v30 = vmax.f32 %v1309_v25, 0.0 }
 0x26f   : > { %v1366_v28 = vmax.f32 %v1304_v27, 0.0  ;;  %v3034_v29 = vpop.f32.mrb[26].mxu0 }
 0x270   : > { %v1319_v31 = vadd.f32 %v3034_v29, %v4004_v14  ;;  %v1313_v32 = vpop.f32.mrb[27].mxu0 }
 0x271   : > { %v1314_v33 = vadd.f32 %v4004_v14, %v1313_v32  ;;  %3109 = vmatprep.mubr.f32.mxu1 %v1366_v28 }
 0x272   : > { %3110 = vmatmul.mubr.f32.gmra.mrb[24].mxu1 %v1367_v30  ;;  %v1369_v36 = vmax.f32 %v1319_v31, 0.0 }
 0x273   : > { %v1368_v34 = vmax.f32 %v1314_v33, 0.0  ;;  %v3037_v35 = vpop.f32.mrb[28].mxu0 }
 0x274   : > { %v1329_v37 = vadd.f32 %v3037_v35, %v4004_v14  ;;  %v1323_v38 = vpop.f32.mrb[29].mxu0 }
 0x275   : > { %v1324_v39 = vadd.f32 %v4004_v14, %v1323_v38  ;;  %3112 = vmatprep.mubr.f32.mxu1 %v1368_v34 }
 0x276   : > { %3113 = vmatmul.mubr.f32.gmra.mrb[26].mxu1 %v1369_v36  ;;  %v1371_v42 = vmax.f32 %v1329_v37, 0.0 }
 0x277   : > { %v1370_v40 = vmax.f32 %v1324_v39, 0.0  ;;  %v3040_v41 = vpop.f32.mrb[30].mxu0 }
 0x278   : > { %v1339_v43 = vadd.f32 %v3040_v41, %v4004_v14  ;;  %v1333_v44 = vpop.f32.mrb[31].mxu0 }
 0x279   : > { %v1334_v45 = vadd.f32 %v4004_v14, %v1333_v44  ;;  %3115 = vmatprep.mubr.f32.mxu1 %v1370_v40  ;;  %v4055_v14 = vld [vmem:[%s4735_s5] ss:$0 sm:$0xff] }
 0x27a   : > { %3116 = vmatmul.mubr.f32.gmra.mrb[28].mxu1 %v1371_v42  ;;  %v1373_v47 = vmax.f32 %v1339_v43, 0.0 }
 0x27b   : > { %v1372_v46 = vmax.f32 %v1334_v45, 0.0 }
 0x27d   : > { %3118 = vmatprep.mubr.f32.mxu1 %v1372_v46 }
 0x27e   : > { %3119 = vmatmul.mubr.f32.gmra.mrb[30].mxu1 %v1373_v47 }
 0x315   : > { %v3075_v51 = vpop.f32.mrb[0].mxu1 }
 0x316   : > { %v1463_v52 = vpop.f32.mrb[1].mxu1  ;;  %v4061_v54 = vadd.f32 %v3075_v51, %v4055_v14 }
 0x317   : > { %v4058_v53 = vadd.f32 %v4055_v14, %v1463_v52 }
 0x319   : > { %v3078_v55 = vpop.f32.mrb[2].mxu1  ;;  %3153 = vmatprep.mubr.f32.mxu0 %v4058_v53 }
 0x31a   : > { %v1473_v56 = vpop.f32.mrb[3].mxu1  ;;  %3154 = vmatmul.mubr.f32.vlgmr.msra.gmra.mrb[32].mxu0 %v4061_v54  ;;  %v4069_v58 = vadd.f32 %v3078_v55, %v4055_v14 }
 0x31b   : > { %v4066_v57 = vadd.f32 %v4055_v14, %v1473_v56 }
 0x31d   : > { %v3081_v59 = vpop.f32.mrb[4].mxu1  ;;  %3156 = vmatprep.mubr.f32.mxu0 %v4066_v57 }
 0x31e   : > { %v1483_v60 = vpop.f32.mrb[5].mxu1  ;;  %3157 = vmatmul.mubr.f32.gmra.mrb[34].mxu0 %v4069_v58  ;;  %v4077_v62 = vadd.f32 %v3081_v59, %v4055_v14 }
 0x31f   : > { %v4074_v61 = vadd.f32 %v4055_v14, %v1483_v60 }
 0x321   : > { %v3084_v63 = vpop.f32.mrb[6].mxu1  ;;  %3159 = vmatprep.mubr.f32.mxu0 %v4074_v61 }
 0x322   : > { %v1493_v0 = vpop.f32.mrb[7].mxu1  ;;  %3160 = vmatmul.mubr.f32.gmra.mrb[36].mxu0 %v4077_v62  ;;  %v4085_v2 = vadd.f32 %v3084_v63, %v4055_v14 }
 0x323   : > { %v4082_v1 = vadd.f32 %v4055_v14, %v1493_v0 }
 0x325   : > { %v3087_v3 = vpop.f32.mrb[8].mxu1  ;;  %3162 = vmatprep.mubr.f32.mxu0 %v4082_v1 }
 0x326   : > { %v1503_v4 = vpop.f32.mrb[9].mxu1  ;;  %3163 = vmatmul.mubr.f32.gmra.mrb[38].mxu0 %v4085_v2  ;;  %v4093_v6 = vadd.f32 %v3087_v3, %v4055_v14 }
 0x327   : > { %v4090_v5 = vadd.f32 %v4055_v14, %v1503_v4 }
 0x329   : > { %v3090_v7 = vpop.f32.mrb[10].mxu1  ;;  %3165 = vmatprep.mubr.f32.mxu0 %v4090_v5 }
 0x32a   : > { %v1513_v8 = vpop.f32.mrb[11].mxu1  ;;  %3166 = vmatmul.mubr.f32.gmra.mrb[40].mxu0 %v4093_v6  ;;  %v4101_v10 = vadd.f32 %v3090_v7, %v4055_v14 }
 0x32b   : > { %v4098_v9 = vadd.f32 %v4055_v14, %v1513_v8 }
 0x32d   : > { %v3093_v11 = vpop.f32.mrb[12].mxu1  ;;  %3168 = vmatprep.mubr.f32.mxu0 %v4098_v9 }
 0x32e   : > { %v1523_v12 = vpop.f32.mrb[13].mxu1  ;;  %3169 = vmatmul.mubr.f32.gmra.mrb[42].mxu0 %v4101_v10  ;;  %v4109_v15 = vadd.f32 %v3093_v11, %v4055_v14 }
 0x32f   : > { %v4106_v13 = vadd.f32 %v4055_v14, %v1523_v12 }
 0x331   : > { %v3096_v16 = vpop.f32.mrb[14].mxu1  ;;  %3171 = vmatprep.mubr.f32.mxu0 %v4106_v13 }
 0x332   : > { %v1533_v17 = vpop.f32.mrb[15].mxu1  ;;  %3172 = vmatmul.mubr.f32.gmra.mrb[44].mxu0 %v4109_v15  ;;  %v4117_v19 = vadd.f32 %v3096_v16, %v4055_v14 }
 0x333   : > { %v4114_v18 = vadd.f32 %v4055_v14, %v1533_v17 }
 0x335   : > { %v3099_v20 = vpop.f32.mrb[16].mxu1  ;;  %3174 = vmatprep.mubr.f32.mxu0 %v4114_v18 }
 0x336   : > { %v1543_v21 = vpop.f32.mrb[17].mxu1  ;;  %3175 = vmatmul.mubr.f32.gmra.mrb[46].mxu0 %v4117_v19  ;;  %v4125_v23 = vadd.f32 %v3099_v20, %v4055_v14 }
 0x337   : > { %v4122_v22 = vadd.f32 %v4055_v14, %v1543_v21 }
 0x339   : > { %v3102_v24 = vpop.f32.mrb[18].mxu1  ;;  %3177 = vmatprep.mubr.f32.mxu0 %v4122_v22 }
 0x33a   : > { %v1553_v25 = vpop.f32.mrb[19].mxu1  ;;  %3178 = vmatmul.mubr.f32.gmra.mrb[48].mxu0 %v4125_v23  ;;  %v4133_v27 = vadd.f32 %v3102_v24, %v4055_v14 }
 0x33b   : > { %v4130_v26 = vadd.f32 %v4055_v14, %v1553_v25 }
 0x33d   : > { %v3105_v28 = vpop.f32.mrb[20].mxu1  ;;  %3180 = vmatprep.mubr.f32.mxu0 %v4130_v26 }
 0x33e   : > { %v1563_v29 = vpop.f32.mrb[21].mxu1  ;;  %3181 = vmatmul.mubr.f32.gmra.mrb[50].mxu0 %v4133_v27  ;;  %v4141_v31 = vadd.f32 %v3105_v28, %v4055_v14 }
 0x33f   : > { %v4138_v30 = vadd.f32 %v4055_v14, %v1563_v29 }
 0x341   : > { %v3108_v32 = vpop.f32.mrb[22].mxu1  ;;  %3183 = vmatprep.mubr.f32.mxu0 %v4138_v30 }
 0x342   : > { %v1573_v33 = vpop.f32.mrb[23].mxu1  ;;  %3184 = vmatmul.mubr.f32.gmra.mrb[52].mxu0 %v4141_v31  ;;  %v4149_v35 = vadd.f32 %v3108_v32, %v4055_v14 }
 0x343   : > { %v4146_v34 = vadd.f32 %v4055_v14, %v1573_v33 }
 0x345   : > { %v3111_v36 = vpop.f32.mrb[24].mxu1  ;;  %3186 = vmatprep.mubr.f32.mxu0 %v4146_v34 }
 0x346   : > { %v1583_v37 = vpop.f32.mrb[25].mxu1  ;;  %3187 = vmatmul.mubr.f32.gmra.mrb[54].mxu0 %v4149_v35  ;;  %v4157_v39 = vadd.f32 %v3111_v36, %v4055_v14 }
 0x347   : > { %v4154_v38 = vadd.f32 %v4055_v14, %v1583_v37 }
 0x349   : > { %v3114_v40 = vpop.f32.mrb[26].mxu1  ;;  %3189 = vmatprep.mubr.f32.mxu0 %v4154_v38 }
 0x34a   : > { %v1593_v41 = vpop.f32.mrb[27].mxu1  ;;  %3190 = vmatmul.mubr.f32.gmra.mrb[56].mxu0 %v4157_v39  ;;  %v4165_v43 = vadd.f32 %v3114_v40, %v4055_v14 }
 0x34b   : > { %v4162_v42 = vadd.f32 %v4055_v14, %v1593_v41 }
 0x34d   : > { %v3117_v44 = vpop.f32.mrb[28].mxu1  ;;  %3192 = vmatprep.mubr.f32.mxu0 %v4162_v42 }
 0x34e   : > { %v1603_v45 = vpop.f32.mrb[29].mxu1  ;;  %3193 = vmatmul.mubr.f32.gmra.mrb[58].mxu0 %v4165_v43  ;;  %v4173_v47 = vadd.f32 %v3117_v44, %v4055_v14 }
 0x34f   : > { %v4170_v46 = vadd.f32 %v4055_v14, %v1603_v45 }
 0x351   : > { %v3120_v48 = vpop.f32.mrb[30].mxu1  ;;  %3195 = vmatprep.mubr.f32.mxu0 %v4170_v46 }
 0x352   : > { %v1613_v49 = vpop.f32.mrb[31].mxu1  ;;  %3196 = vmatmul.mubr.f32.gmra.mrb[60].mxu0 %v4173_v47  ;;  %v4181_v51 = vadd.f32 %v3120_v48, %v4055_v14 }
 0x353   : > { %v4178_v50 = vadd.f32 %v4055_v14, %v1613_v49 }
 0x355   : > { %3198 = vmatprep.mubr.f32.mxu0 %v4178_v50 }
 0x356   : > { %3199 = vmatmul.mubr.f32.gmra.mrb[62].mxu0 %v4181_v51 }
 0x3ed   : > { %v3155_v52 = vpop.f32.mrb[32].mxu0 }
 0x3ee   : > { %v1704_v55 = vpop.f32.mrb[33].mxu0 }
 0x3ef   : > { %v1863_v56 = vadd.f32 %v3155_v52, %v1704_v55 }
 0x3f1   : > { %v3158_v59 = vpop.f32.mrb[34].mxu0 }
 0x3f2   : > { %v1714_v60 = vpop.f32.mrb[35].mxu0 }
 0x3f3   : > { %v1864_v63 = vadd.f32 %v1863_v56, %v1714_v60 }
 0x3f5   : > { %v3161_v0 = vpop.f32.mrb[36].mxu0  ;;  %v1865_v3 = vadd.f32 %v3158_v59, %v1864_v63 }
 0x3f6   : > { %v1724_v4 = vpop.f32.mrb[37].mxu0 }
 0x3f7   : > { %v1866_v7 = vadd.f32 %v1865_v3, %v1724_v4 }
 0x3f9   : > { %v3164_v8 = vpop.f32.mrb[38].mxu0  ;;  %v1867_v11 = vadd.f32 %v3161_v0, %v1866_v7 }
 0x3fa   : > { %v1734_v12 = vpop.f32.mrb[39].mxu0 }
 0x3fb   : > { %v1868_v16 = vadd.f32 %v1867_v11, %v1734_v12 }
 0x3fd   : > { %v3167_v14 = vpop.f32.mrb[40].mxu0  ;;  %v1869_v17 = vadd.f32 %v3164_v8, %v1868_v16 }
 0x3fe   : > { %v1744_v20 = vpop.f32.mrb[41].mxu0 }
 0x3ff   : > { %v1870_v21 = vadd.f32 %v1869_v17, %v1744_v20 }
 0x401   : > { %v3170_v24 = vpop.f32.mrb[42].mxu0  ;;  %v1871_v25 = vadd.f32 %v3167_v14, %v1870_v21 }
 0x402   : > { %v1754_v28 = vpop.f32.mrb[43].mxu0 }
 0x403   : > { %v1872_v29 = vadd.f32 %v1871_v25, %v1754_v28 }
 0x405   : > { %v3173_v32 = vpop.f32.mrb[44].mxu0  ;;  %v1873_v33 = vadd.f32 %v3170_v24, %v1872_v29 }
 0x406   : > { %v1764_v36 = vpop.f32.mrb[45].mxu0 }
 0x407   : > { %v1874_v37 = vadd.f32 %v1873_v33, %v1764_v36 }
 0x409   : > { %v3176_v40 = vpop.f32.mrb[46].mxu0  ;;  %v1875_v41 = vadd.f32 %v3173_v32, %v1874_v37 }
 0x40a   : > { %v1774_v44 = vpop.f32.mrb[47].mxu0 }
 0x40b   : > { %v1876_v45 = vadd.f32 %v1875_v41, %v1774_v44 }
 0x40d   : > { %v3179_v48 = vpop.f32.mrb[48].mxu0  ;;  %v1877_v49 = vadd.f32 %v3176_v40, %v1876_v45 }
 0x40e   : > { %v1784_v52 = vpop.f32.mrb[49].mxu0 }
 0x40f   : > { %v1878_v55 = vadd.f32 %v1877_v49, %v1784_v52 }
 0x411   : > { %v3182_v56 = vpop.f32.mrb[50].mxu0  ;;  %v1879_v59 = vadd.f32 %v3179_v48, %v1878_v55 }
 0x412   : > { %v1794_v60 = vpop.f32.mrb[51].mxu0 }
 0x413   : > { %v1880_v63 = vadd.f32 %v1879_v59, %v1794_v60 }
 0x415   : > { %v3185_v0 = vpop.f32.mrb[52].mxu0  ;;  %v1881_v3 = vadd.f32 %v3182_v56, %v1880_v63 }
 0x416   : > { %v1804_v4 = vpop.f32.mrb[53].mxu0 }
 0x417   : > { %v1882_v7 = vadd.f32 %v1881_v3, %v1804_v4 }
 0x419   : > { %v3188_v8 = vpop.f32.mrb[54].mxu0  ;;  %v1883_v11 = vadd.f32 %v3185_v0, %v1882_v7 }
 0x41a   : > { %v1814_v12 = vpop.f32.mrb[55].mxu0 }
 0x41b   : > { %v1884_v16 = vadd.f32 %v1883_v11, %v1814_v12 }
 0x41d   : > { %v3191_v14 = vpop.f32.mrb[56].mxu0  ;;  %v1885_v17 = vadd.f32 %v3188_v8, %v1884_v16 }
 0x41e   : > { %v1824_v20 = vpop.f32.mrb[57].mxu0 }
 0x41f   : > { %v1886_v21 = vadd.f32 %v1885_v17, %v1824_v20 }
 0x421   : > { %v3194_v24 = vpop.f32.mrb[58].mxu0  ;;  %v1887_v25 = vadd.f32 %v3191_v14, %v1886_v21 }
 0x422   : > { %v1834_v28 = vpop.f32.mrb[59].mxu0 }
 0x423   : > { %v1888_v29 = vadd.f32 %v1887_v25, %v1834_v28 }
 0x425   : > { %v3197_v32 = vpop.f32.mrb[60].mxu0  ;;  %v1889_v33 = vadd.f32 %v3194_v24, %v1888_v29 }
 0x426   : > { %v1844_v36 = vpop.f32.mrb[61].mxu0 }
 0x427   : > { %v1890_v37 = vadd.f32 %v1889_v33, %v1844_v36 }
 0x429   : > { %v3200_v40 = vpop.f32.mrb[62].mxu0  ;;  %v1891_v41 = vadd.f32 %v3197_v32, %v1890_v37 }
 0x42a   : > { %v1854_v44 = vpop.f32.mrb[63].mxu0 }
 0x42b   : > { %v1892_v45 = vadd.f32 %v1891_v41, %v1854_v44 }
 0x42d   : > { %v1893_v48 = vadd.f32 %v3200_v40, %v1892_v45 }
 0x42f   : > { %v1894_v49 = vrot.slane %v1893_v48, 4 }
 0x431   : > { %v1895_v52 = vadd.f32 %v1894_v49, %v1893_v48 }
 0x433   : > { %v1896_v55 = vrot.slane %v1895_v52, 2 }
 0x435   : > { %v1897_v56 = vadd.f32 %v1896_v55, %v1895_v52 }
 0x437   : > { %v1898_v59 = vrot.slane %v1897_v56, 1 }
 0x439   : > { %v1899_v60 = vadd.f32 %v1898_v59, %v1897_v56 }
 0x43b   : > { %v4185_v63 = vmul.f32 0.001953125, %v1899_v60 }
 0x43d   : > { %v4189_v0 = vsub.f32 %v4058_v53, %v4185_v63  ;;  %v4193_v3 = vsub.f32 %v4061_v54, %v4185_v63  ;;  %v4197_v4 = vsub.f32 %v4066_v57, %v4185_v63  ;;  %v4205_v11 = vsub.f32 %v4069_v58, %v4185_v63 }
 0x43e   : > { %v4209_v53 = vsub.f32 %v4074_v61, %v4185_v63  ;;  %v4215_v57 = vsub.f32 %v4077_v62, %v4185_v63  ;;  %v4221_v58 = vsub.f32 %v4082_v1, %v4185_v63  ;;  %v4227_v16 = vsub.f32 %v4085_v2, %v4185_v63 }
 0x43f   : > { %v1934_v7 = vmul.f32 %v4193_v3, %v4193_v3  ;;  %v1933_v8 = vmul.f32 %v4189_v0, %v4189_v0  ;;  %v1935_v54 = vmul.f32 %v4197_v4, %v4197_v4  ;;  %v1936_v12 = vmul.f32 %v4205_v11, %v4205_v11 }
 0x440   : > { %v1937_v61 = vmul.f32 %v4209_v53, %v4209_v53  ;;  %v1938_v62 = vmul.f32 %v4215_v57, %v4215_v57  ;;  %v4233_v14 = vsub.f32 %v4090_v5, %v4185_v63  ;;  %v1939_v1 = vmul.f32 %v4221_v58, %v4221_v58 }
 0x441   : > { %3233 = vmatprep.mubr.f32.mxu1 %v1933_v8  ;;  %v4239_v17 = vsub.f32 %v4093_v6, %v4185_v63  ;;  %v1940_v2 = vmul.f32 %v4227_v16, %v4227_v16  ;;  %v4245_v20 = vsub.f32 %v4098_v9, %v4185_v63  ;;  %v4251_v21 = vsub.f32 %v4101_v10, %v4185_v63 }
 0x442   : > { %3234 = vmatmul.mubr.f32.vlgmr.msra.gmra.mrb[32].mxu1 %v1934_v7  ;;  %v1941_v5 = vmul.f32 %v4233_v14, %v4233_v14  ;;  %v4257_v24 = vsub.f32 %v4106_v13, %v4185_v63  ;;  %v4263_v25 = vsub.f32 %v4109_v15, %v4185_v63  ;;  %v4269_v28 = vsub.f32 %v4114_v18, %v4185_v63 }
 0x443   : > { %3236 = vmatprep.mubr.f32.mxu1 %v1935_v54  ;;  %v1942_v6 = vmul.f32 %v4239_v17, %v4239_v17  ;;  %v1943_v9 = vmul.f32 %v4245_v20, %v4245_v20  ;;  %v1944_v10 = vmul.f32 %v4251_v21, %v4251_v21  ;;  %v4275_v29 = vsub.f32 %v4117_v19, %v4185_v63 }
 0x444   : > { %v1945_v13 = vmul.f32 %v4257_v24, %v4257_v24  ;;  %v1946_v15 = vmul.f32 %v4263_v25, %v4263_v25  ;;  %v4281_v32 = vsub.f32 %v4122_v22, %v4185_v63  ;;  %v1947_v18 = vmul.f32 %v4269_v28, %v4269_v28 }
 0x445   : > { %v4287_v33 = vsub.f32 %v4125_v23, %v4185_v63  ;;  %v1948_v19 = vmul.f32 %v4275_v29, %v4275_v29  ;;  %v4293_v36 = vsub.f32 %v4130_v26, %v4185_v63  ;;  %v4299_v37 = vsub.f32 %v4133_v27, %v4185_v63 }
 0x446   : > { %3237 = vmatmul.mubr.f32.gmra.mrb[34].mxu1 %v1936_v12  ;;  %v1949_v22 = vmul.f32 %v4281_v32, %v4281_v32  ;;  %v4305_v40 = vsub.f32 %v4138_v30, %v4185_v63  ;;  %v4311_v41 = vsub.f32 %v4141_v31, %v4185_v63  ;;  %v4317_v44 = vsub.f32 %v4146_v34, %v4185_v63 }
 0x447   : > { %3239 = vmatprep.mubr.f32.mxu1 %v1937_v61  ;;  %v1950_v23 = vmul.f32 %v4287_v33, %v4287_v33  ;;  %v1951_v26 = vmul.f32 %v4293_v36, %v4293_v36  ;;  %v1952_v27 = vmul.f32 %v4299_v37, %v4299_v37  ;;  %v4323_v45 = vsub.f32 %v4149_v35, %v4185_v63 }
 0x448   : > { %v1953_v30 = vmul.f32 %v4305_v40, %v4305_v40  ;;  %v1954_v31 = vmul.f32 %v4311_v41, %v4311_v41  ;;  %v4329_v48 = vsub.f32 %v4154_v38, %v4185_v63  ;;  %v1955_v34 = vmul.f32 %v4317_v44, %v4317_v44 }
 0x449   : > { %v4335_v49 = vsub.f32 %v4157_v39, %v4185_v63  ;;  %v1956_v35 = vmul.f32 %v4323_v45, %v4323_v45  ;;  %v4341_v52 = vsub.f32 %v4162_v42, %v4185_v63  ;;  %v4347_v55 = vsub.f32 %v4165_v43, %v4185_v63 }
 0x44a   : > { %3240 = vmatmul.mubr.f32.gmra.mrb[36].mxu1 %v1938_v62  ;;  %v1957_v38 = vmul.f32 %v4329_v48, %v4329_v48  ;;  %v4353_v56 = vsub.f32 %v4170_v46, %v4185_v63  ;;  %v4359_v59 = vsub.f32 %v4173_v47, %v4185_v63  ;;  %v4365_v60 = vsub.f32 %v4178_v50, %v4185_v63 }
 0x44b   : > { %3242 = vmatprep.mubr.f32.mxu1 %v1939_v1  ;;  %v1958_v39 = vmul.f32 %v4335_v49, %v4335_v49  ;;  %v1959_v42 = vmul.f32 %v4341_v52, %v4341_v52  ;;  %v1960_v43 = vmul.f32 %v4347_v55, %v4347_v55  ;;  %v4371_v7 = vsub.f32 %v4181_v51, %v4185_v63 }
 0x44c   : > { %v1961_v46 = vmul.f32 %v4353_v56, %v4353_v56  ;;  %v1962_v47 = vmul.f32 %v4359_v59, %v4359_v59  ;;  %v1963_v8 = vmul.f32 %v4365_v60, %v4365_v60 }
 0x44d   : > { %v1964_v50 = vmul.f32 %v4371_v7, %v4371_v7 }
 0x44e   : > { %3243 = vmatmul.mubr.f32.gmra.mrb[38].mxu1 %v1940_v2 }
 0x44f   : > { %3245 = vmatprep.mubr.f32.mxu1 %v1941_v5 }
 0x452   : > { %3246 = vmatmul.mubr.f32.gmra.mrb[40].mxu1 %v1942_v6 }
 0x453   : > { %3248 = vmatprep.mubr.f32.mxu1 %v1943_v9 }
 0x456   : > { %3249 = vmatmul.mubr.f32.gmra.mrb[42].mxu1 %v1944_v10 }
 0x457   : > { %3251 = vmatprep.mubr.f32.mxu1 %v1945_v13 }
 0x45a   : > { %3252 = vmatmul.mubr.f32.gmra.mrb[44].mxu1 %v1946_v15 }
 0x45b   : > { %3254 = vmatprep.mubr.f32.mxu1 %v1947_v18 }
 0x45e   : > { %3255 = vmatmul.mubr.f32.gmra.mrb[46].mxu1 %v1948_v19 }
 0x45f   : > { %3257 = vmatprep.mubr.f32.mxu1 %v1949_v22 }
 0x462   : > { %3258 = vmatmul.mubr.f32.gmra.mrb[48].mxu1 %v1950_v23 }
 0x463   : > { %3260 = vmatprep.mubr.f32.mxu1 %v1951_v26  ;;  %v2373_v26 = vld [vmem:[%s4739_s9 + $0x8] sm:$0xff] }
 0x464   : > { %2438 = vmatprep.mubr.f32.mxu0 %v2373_v26 }
 0x466   : > { %3261 = vmatmul.mubr.f32.gmra.mrb[50].mxu1 %v1952_v27 }
 0x467   : > { %3263 = vmatprep.mubr.f32.mxu1 %v1953_v30 }
 0x46a   : > { %3264 = vmatmul.mubr.f32.gmra.mrb[52].mxu1 %v1954_v31 }
 0x46b   : > { %3266 = vmatprep.mubr.f32.mxu1 %v1955_v34  ;;  %v2444_v34 = vld [vmem:[%s4740_s10] sm:$0xff] }
 0x46e   : > { %3267 = vmatmul.mubr.f32.gmra.mrb[54].mxu1 %v1956_v35  ;;  %v2445_v35 = vld [vmem:[%s4740_s10 + $0x8] sm:$0xff] }
 0x46f   : > { %3269 = vmatprep.mubr.f32.mxu1 %v1957_v38  ;;  %v2446_v38 = vld [vmem:[%s4740_s10 + $0x10] sm:$0xff] }
 0x472   : > { %3270 = vmatmul.mubr.f32.gmra.mrb[56].mxu1 %v1958_v39 }
 0x473   : > { %3272 = vmatprep.mubr.f32.mxu1 %v1959_v42  ;;  %v3624_v42 = vmov 0.0|0.0  }
 0x474   : > { %3476 = vmatprep.subr.bf16.mxu1 %v3624_v42 }
 0x476   : > { %3273 = vmatmul.mubr.f32.gmra.mrb[58].mxu1 %v1960_v43  ;;  %v3477_v43 = vpack.c.bf16 %v2445_v35, %v2444_v34  ;;  %v2454_v34 = vld [vmem:[%s4740_s10 + $0x50] sm:$0xff]  ;;  %v2455_v35 = vld [vmem:[%s4740_s10 + $0x58] sm:$0xff] }
 0x477   : > { %3275 = vmatprep.mubr.f32.mxu1 %v1961_v46  ;;  %v2447_v46 = vld [vmem:[%s4740_s10 + $0x18] sm:$0xff] }
 0x478   : > { %3478 = vmatpush3.bf16.msra.mxu1 %v3477_v43 }
 0x479   : > { %3479 = vmatprep.subr.bf16.mxu1 %v3624_v42 }
 0x47a   : > { %3276 = vmatmul.mubr.f32.gmra.mrb[60].mxu1 %v1962_v47 }
 0x47b   : > { %3278 = vmatprep.mubr.f32.mxu1 %v1963_v8 }
 0x47e   : > { %3279 = vmatmul.mubr.f32.gmra.mrb[62].mxu1 %v1964_v50  ;;  %v3480_v50 = vpack.c.bf16 %v2447_v46, %v2446_v38  ;;  %v3492_v46 = vpack.c.bf16 %v2455_v35, %v2454_v34 }
 0x480   : > { %3481 = vmatpush3.bf16.msra.mxu1 %v3480_v50  ;;  %v2457_v50 = vld [vmem:[%s4740_s10 + $0x68] sm:$0xff] }
 0x481   : > { %3482 = vmatprep.subr.bf16.mxu1 %v3624_v42 }
 0x515   : > { %v3235_v54 = vpop.f32.mrb[32].mxu1 }
 0x516   : > { %v2031_v12 = vpop.f32.mrb[33].mxu1 }
 0x517   : > { %v2190_v61 = vadd.f32 %v3235_v54, %v2031_v12  ;;  %v2448_v12 = vld [vmem:[%s4740_s10 + $0x20] sm:$0xff] }
 0x519   : > { %v3238_v62 = vpop.f32.mrb[34].mxu1 }
 0x51a   : > { %v2041_v1 = vpop.f32.mrb[35].mxu1 }
 0x51b   : > { %v2191_v2 = vadd.f32 %v2190_v61, %v2041_v1  ;;  %v2449_v61 = vld [vmem:[%s4740_s10 + $0x28] sm:$0xff] }
 0x51d   : > { %v3241_v51 = vpop.f32.mrb[36].mxu1  ;;  %v2192_v63 = vadd.f32 %v3238_v62, %v2191_v2 }
 0x51e   : > { %v2051_v5 = vpop.f32.mrb[37].mxu1 }
 0x51f   : > { %v2193_v6 = vadd.f32 %v2192_v63, %v2051_v5  ;;  %v2450_v5 = vld [vmem:[%s4740_s10 + $0x30] sm:$0xff] }
 0x521   : > { %v3244_v9 = vpop.f32.mrb[38].mxu1  ;;  %v2194_v10 = vadd.f32 %v3241_v51, %v2193_v6  ;;  %v3483_v51 = vpack.c.bf16 %v2449_v61, %v2448_v12  ;;  %v2451_v6 = vld [vmem:[%s4740_s10 + $0x38] sm:$0xff] }
 0x522   : > { %v2061_v13 = vpop.f32.mrb[39].mxu1 }
 0x523   : > { %v2195_v15 = vadd.f32 %v2194_v10, %v2061_v13  ;;  %3484 = vmatpush3.bf16.msra.mxu1 %v3483_v51  ;;  %v2459_v51 = vld [vmem:[%s4740_s10 + $0x78] sm:$0xff] }
 0x524   : > { %3485 = vmatprep.subr.bf16.mxu1 %v3624_v42 }
 0x525   : > { %v3247_v18 = vpop.f32.mrb[40].mxu1  ;;  %v2196_v19 = vadd.f32 %v3244_v9, %v2195_v15  ;;  %v3486_v15 = vpack.c.bf16 %v2451_v6, %v2450_v5 }
 0x526   : > { %v2071_v22 = vpop.f32.mrb[41].mxu1 }
 0x527   : > { %v2197_v23 = vadd.f32 %v2196_v19, %v2071_v22  ;;  %v2452_v19 = vld [vmem:[%s4740_s10 + $0x40] sm:$0xff]  ;;  %v2453_v22 = vld [vmem:[%s4740_s10 + $0x48] sm:$0xff]  ;;  %3487 = vmatpush3.bf16.msra.mxu1 %v3486_v15 }
 0x528   : > { %3488 = vmatprep.subr.bf16.mxu1 %v3624_v42 }
 0x529   : > { %v3250_v27 = vpop.f32.mrb[42].mxu1  ;;  %v2198_v30 = vadd.f32 %v3247_v18, %v2197_v23 }
 0x52a   : > { %v2081_v31 = vpop.f32.mrb[43].mxu1 }
 0x52b   : > { %v2199_v39 = vadd.f32 %v2198_v30, %v2081_v31  ;;  %v3489_v30 = vpack.c.bf16 %v2453_v22, %v2452_v19 }
 0x52d   : > { %v3253_v47 = vpop.f32.mrb[44].mxu1  ;;  %v2200_v8 = vadd.f32 %v3250_v27, %v2199_v39  ;;  %3490 = vmatpush3.bf16.msra.mxu1 %v3489_v30 }
 0x52e   : > { %v2091_v54 = vpop.f32.mrb[45].mxu1  ;;  %3491 = vmatprep.subr.bf16.mxu1 %v3624_v42 }
 0x52f   : > { %v2201_v62 = vadd.f32 %v2200_v8, %v2091_v54  ;;  %v2456_v8 = vld [vmem:[%s4740_s10 + $0x60] sm:$0xff] }
 0x531   : > { %v3256_v1 = vpop.f32.mrb[46].mxu1  ;;  %v2202_v2 = vadd.f32 %v3253_v47, %v2201_v62  ;;  %3493 = vmatpush3.bf16.msra.mxu1 %v3492_v46  ;;  %v3495_v62 = vpack.c.bf16 %v2457_v50, %v2456_v8 }
 0x532   : > { %v2101_v63 = vpop.f32.mrb[47].mxu1  ;;  %3494 = vmatprep.subr.bf16.mxu1 %v3624_v42 }
 0x533   : > { %v2203_v9 = vadd.f32 %v2202_v2, %v2101_v63  ;;  %v2458_v2 = vld [vmem:[%s4740_s10 + $0x70] sm:$0xff] }
 0x535   : > { %v3259_v10 = vpop.f32.mrb[48].mxu1  ;;  %v2204_v13 = vadd.f32 %v3256_v1, %v2203_v9  ;;  %3496 = vmatpush3.bf16.msra.mxu1 %v3495_v62  ;;  %v3498_v9 = vpack.c.bf16 %v2459_v51, %v2458_v2 }
 0x536   : > { %v2111_v18 = vpop.f32.mrb[49].mxu1  ;;  %3497 = vmatprep.subr.bf16.mxu1 %v3624_v42 }
 0x537   : > { %v2205_v23 = vadd.f32 %v2204_v13, %v2111_v18 }
 0x539   : > { %v3262_v26 = vpop.f32.mrb[50].mxu1  ;;  %v2206_v27 = vadd.f32 %v3259_v10, %v2205_v23  ;;  %3499 = vmatpush3.bf16.msra.mxu1 %v3498_v9 }
 0x53a   : > { %v2121_v31 = vpop.f32.mrb[51].mxu1 }
 0x53b   : > { %v2207_v38 = vadd.f32 %v2206_v27, %v2121_v31 }
 0x53d   : > { %v3265_v39 = vpop.f32.mrb[52].mxu1  ;;  %v2208_v43 = vadd.f32 %v3262_v26, %v2207_v38 }
 0x53e   : > { %v2131_v47 = vpop.f32.mrb[53].mxu1 }
 0x53f   : > { %v2209_v54 = vadd.f32 %v2208_v43, %v2131_v47 }
 0x541   : > { %v3268_v12 = vpop.f32.mrb[54].mxu1  ;;  %v2210_v61 = vadd.f32 %v3265_v39, %v2209_v54 }
 0x542   : > { %v2141_v1 = vpop.f32.mrb[55].mxu1 }
 0x543   : > { %v2211_v63 = vadd.f32 %v2210_v61, %v2141_v1 }
 0x545   : > { %v3271_v5 = vpop.f32.mrb[56].mxu1  ;;  %v2212_v6 = vadd.f32 %v3268_v12, %v2211_v63 }
 0x546   : > { %v2151_v10 = vpop.f32.mrb[57].mxu1 }
 0x547   : > { %v2213_v13 = vadd.f32 %v2212_v6, %v2151_v10 }
 0x549   : > { %v3274_v15 = vpop.f32.mrb[58].mxu1  ;;  %v2214_v18 = vadd.f32 %v3271_v5, %v2213_v13 }
 0x54a   : > { %v2161_v19 = vpop.f32.mrb[59].mxu1 }
 0x54b   : > { %v2215_v22 = vadd.f32 %v2214_v18, %v2161_v19 }
 0x54d   : > { %v3277_v23 = vpop.f32.mrb[60].mxu1  ;;  %v2216_v26 = vadd.f32 %v3274_v15, %v2215_v22 }
 0x54e   : > { %v2171_v27 = vpop.f32.mrb[61].mxu1 }
 0x54f   : > { %v2217_v30 = vadd.f32 %v2216_v26, %v2171_v27 }
 0x551   : > { %v3280_v31 = vpop.f32.mrb[62].mxu1  ;;  %v2218_v34 = vadd.f32 %v3277_v23, %v2217_v30 }
 0x552   : > { %v2181_v35 = vpop.f32.mrb[63].mxu1 }
 0x553   : > { %v2219_v38 = vadd.f32 %v2218_v34, %v2181_v35  ;;  %v4490_v34 = vld [vmem:[%s4737_s7] ss:$0 sm:$0xff] }
 0x555   : > { %v2220_v39 = vadd.f32 %v3280_v31, %v2219_v38 }
 0x557   : > { %v2221_v43 = vrot.slane %v2220_v39, 4 }
 0x559   : > { %v2222_v46 = vadd.f32 %v2221_v43, %v2220_v39 }
 0x55b   : > { %v2223_v47 = vrot.slane %v2222_v46, 2 }
 0x55d   : > { %v2224_v8 = vadd.f32 %v2223_v47, %v2222_v46 }
 0x55f   : > { %v2225_v42 = vrot.slane %v2224_v8, 1 }
 0x561   : > { %v2226_v50 = vadd.f32 %v2225_v42, %v2224_v8 }
 0x563   : > { %v2227_v54 = vmul.f32 0.001953125, %v2226_v50 }
 0x565   : > { %v2228_v12 = vadd.f32 1e-05, %v2227_v54 }
 0x567   : > { %3567 = vrsqrt.f32 %v2228_v12 }
 0x571   : > { %v3568_v61 = vpop.eup %3567 }
 0x572   : > { %v2230_v62 = vmul.f32 %v3568_v61, %v4189_v0  ;;  %v2231_v1 = vmul.f32 %v3568_v61, %v4193_v3  ;;  %v2232_v2 = vmul.f32 %v3568_v61, %v4197_v4  ;;  %v2233_v51 = vmul.f32 %v3568_v61, %v4205_v11 }
 0x573   : > { %v2234_v63 = vmul.f32 %v3568_v61, %v4209_v53  ;;  %v2235_v5 = vmul.f32 %v3568_v61, %v4215_v57  ;;  %v2236_v6 = vmul.f32 %v3568_v61, %v4221_v58  ;;  %v2237_v9 = vmul.f32 %v3568_v61, %v4227_v16 }
 0x574   : > { %v2238_v10 = vmul.f32 %v3568_v61, %v4233_v14  ;;  %v2239_v13 = vmul.f32 %v3568_v61, %v4239_v17  ;;  %v2240_v0 = vmul.f32 %v3568_v61, %v4245_v20  ;;  %v2241_v3 = vmul.f32 %v3568_v61, %v4251_v21  ;;  %v4451_v14 = vld [vmem:[%s4736_s6] ss:$0 sm:$0xff] }
 0x575   : > { %v2242_v4 = vmul.f32 %v3568_v61, %v4257_v24  ;;  %v2243_v11 = vmul.f32 %v3568_v61, %v4263_v25  ;;  %v2244_v53 = vmul.f32 %v3568_v61, %v4269_v28  ;;  %v2245_v57 = vmul.f32 %v3568_v61, %v4275_v29 }
 0x576   : > { %v2246_v58 = vmul.f32 %v3568_v61, %v4281_v32  ;;  %v2247_v16 = vmul.f32 %v3568_v61, %v4287_v33  ;;  %v2248_v17 = vmul.f32 %v3568_v61, %v4293_v36  ;;  %v2249_v20 = vmul.f32 %v3568_v61, %v4299_v37 }
 0x577   : > { %v2250_v21 = vmul.f32 %v3568_v61, %v4305_v40  ;;  %v2251_v24 = vmul.f32 %v3568_v61, %v4311_v41  ;;  %v2252_v25 = vmul.f32 %v3568_v61, %v4317_v44  ;;  %v2253_v28 = vmul.f32 %v3568_v61, %v4323_v45 }
 0x578   : > { %v2254_v29 = vmul.f32 %v3568_v61, %v4329_v48  ;;  %v2255_v32 = vmul.f32 %v3568_v61, %v4335_v49  ;;  %v2256_v33 = vmul.f32 %v3568_v61, %v4341_v52  ;;  %v2257_v15 = vmul.f32 %v3568_v61, %v4347_v55 }
 0x579   : > { %v2258_v36 = vmul.f32 %v3568_v61, %v4353_v56  ;;  %v2259_v37 = vmul.f32 %v3568_v61, %v4359_v59  ;;  %v2260_v40 = vmul.f32 %v3568_v61, %v4365_v60  ;;  %v4467_v41 = vmul.f32 %v3568_v61, %v4371_v7 }
 0x57a   : > { %v2269_v44 = vmul.f32 %v4451_v14, %v2230_v62  ;;  %v2270_v45 = vmul.f32 %v4451_v14, %v2231_v1  ;;  %v2271_v48 = vmul.f32 %v4451_v14, %v2232_v2  ;;  %v2272_v49 = vmul.f32 %v4451_v14, %v2233_v51 }
 0x57b   : > { %v2273_v52 = vmul.f32 %v4451_v14, %v2234_v63  ;;  %v2274_v55 = vmul.f32 %v4451_v14, %v2235_v5  ;;  %v2275_v56 = vmul.f32 %v4451_v14, %v2236_v6  ;;  %v2276_v59 = vmul.f32 %v4451_v14, %v2237_v9 }
 0x57c   : > { %v2277_v60 = vmul.f32 %v4451_v14, %v2238_v10  ;;  %v2278_v7 = vmul.f32 %v4451_v14, %v2239_v13  ;;  %v2279_v18 = vmul.f32 %v4451_v14, %v2240_v0  ;;  %v2280_v19 = vmul.f32 %v4451_v14, %v2241_v3 }
 0x57d   : > { %v2281_v22 = vmul.f32 %v4451_v14, %v2242_v4  ;;  %v2282_v23 = vmul.f32 %v4451_v14, %v2243_v11  ;;  %v2283_v26 = vmul.f32 %v4451_v14, %v2244_v53  ;;  %v2284_v27 = vmul.f32 %v4451_v14, %v2245_v57 }
 0x57e   : > { %v2285_v30 = vmul.f32 %v4451_v14, %v2246_v58  ;;  %v2286_v31 = vmul.f32 %v4451_v14, %v2247_v16  ;;  %v2287_v35 = vmul.f32 %v4451_v14, %v2248_v17  ;;  %v2288_v38 = vmul.f32 %v4451_v14, %v2249_v20 }
 0x57f   : > { %v2289_v39 = vmul.f32 %v4451_v14, %v2250_v21  ;;  %v2290_v43 = vmul.f32 %v4451_v14, %v2251_v24  ;;  %v2291_v46 = vmul.f32 %v4451_v14, %v2252_v25  ;;  %v2292_v47 = vmul.f32 %v4451_v14, %v2253_v28 }
 0x580   : > { %v2293_v8 = vmul.f32 %v4451_v14, %v2254_v29  ;;  %v2294_v42 = vmul.f32 %v4451_v14, %v2255_v32  ;;  %v2295_v50 = vmul.f32 %v4451_v14, %v2256_v33  ;;  %v2296_v54 = vmul.f32 %v4451_v14, %v2257_v15 }
 0x581   : > { %v2297_v12 = vmul.f32 %v4451_v14, %v2258_v36  ;;  %v2298_v61 = vmul.f32 %v4451_v14, %v2259_v37  ;;  %v2308_v62 = vadd.f32 %v4490_v34, %v2269_v44  ;;  %v2309_v1 = vadd.f32 %v4490_v34, %v2270_v45 }
 0x582   : > { %v4507_v2 = vadd.f32 %v4490_v34, %v2271_v48  ;;  %v4510_v51 = vadd.f32 %v4490_v34, %v2272_v49  ;;  %v4513_v63 = vadd.f32 %v4490_v34, %v2273_v52  ;;  %v4516_v5 = vadd.f32 %v4490_v34, %v2274_v55 }
 0x583   : > { %v4519_v6 = vadd.f32 %v4490_v34, %v2275_v56  ;;  %v4522_v9 = vadd.f32 %v4490_v34, %v2276_v59  ;;  %v4525_v10 = vadd.f32 %v4490_v34, %v2277_v60  ;;  %v4528_v13 = vadd.f32 %v4490_v34, %v2278_v7  ;;  %2340 = vst [vmem:[%s4742_s12] sm:$0xff] %v2308_v62 }
 0x584   : > { %v4531_v0 = vadd.f32 %v4490_v34, %v2279_v18  ;;  %v4534_v3 = vadd.f32 %v4490_v34, %v2280_v19  ;;  %2341 = vst [vmem:[%s4742_s12 + $0x8] sm:$0xff] %v2309_v1  ;;  %2342 = vst [vmem:[%s4742_s12 + $0x10] sm:$0xff] %v4507_v2  ;;  %v4551_v4 = vadd.f32 %v4490_v34, %v2281_v22 }
 0x585   : > { %2343 = vst [vmem:[%s4742_s12 + $0x18] sm:$0xff] %v4510_v51  ;;  %v4554_v11 = vadd.f32 %v4490_v34, %v2282_v23  ;;  %v4557_v53 = vadd.f32 %v4490_v34, %v2283_v26  ;;  %v4560_v57 = vadd.f32 %v4490_v34, %v2284_v27  ;;  %2344 = vst [vmem:[%s4742_s12 + $0x20] sm:$0xff] %v4513_v63 }
 0x586   : > { %2345 = vst [vmem:[%s4742_s12 + $0x28] sm:$0xff] %v4516_v5  ;;  %2346 = vst [vmem:[%s4742_s12 + $0x30] sm:$0xff] %v4519_v6  ;;  %v2299_v58 = vmul.f32 %v4451_v14, %v2260_v40  ;;  %v2324_v16 = vadd.f32 %v4490_v34, %v2285_v30  ;;  %v2325_v17 = vadd.f32 %v4490_v34, %v2286_v31  ;;  %v2372_v31 = vld [vmem:[%s4739_s9] sm:$0xff] }
 0x587   : > { %2347 = vst [vmem:[%s4742_s12 + $0x38] sm:$0xff] %v4522_v9  ;;  %2348 = vst [vmem:[%s4742_s12 + $0x40] sm:$0xff] %v4525_v10  ;;  %v2326_v20 = vadd.f32 %v4490_v34, %v2287_v35  ;;  %v3446_v21 = vpack.c.bf16 %v2309_v1, %v2308_v62  ;;  %v2327_v24 = vadd.f32 %v4490_v34, %v2288_v38 }
 0x588   : > { %2349 = vst [vmem:[%s4742_s12 + $0x48] sm:$0xff] %v4528_v13  ;;  %2350 = vst [vmem:[%s4742_s12 + $0x50] sm:$0xff] %v4531_v0  ;;  %v2328_v25 = vadd.f32 %v4490_v34, %v2289_v39  ;;  %v2329_v28 = vadd.f32 %v4490_v34, %v2290_v43  ;;  %v2300_v29 = vmul.f32 %v4451_v14, %v4467_v41  ;;  %v2640_v43 = vld [vmem:[%s4741_s11] ss:$0 sm:$0xff] }
 0x589   : > { %2351 = vst [vmem:[%s4742_s12 + $0x58] sm:$0xff] %v4534_v3  ;;  %2352 = vst [vmem:[%s4742_s12 + $0x60] sm:$0xff] %v4551_v4  ;;  %v3444_v32 = vpack.c.bf16 %v2325_v17, %v2324_v16  ;;  %v2330_v33 = vadd.f32 %v4490_v34, %v2291_v46  ;;  %v2331_v15 = vadd.f32 %v4490_v34, %v2292_v47 }
 0x58a   : > { %2353 = vst [vmem:[%s4742_s12 + $0x68] sm:$0xff] %v4554_v11  ;;  %2354 = vst [vmem:[%s4742_s12 + $0x70] sm:$0xff] %v4557_v53  ;;  %v2332_v14 = vadd.f32 %v4490_v34, %v2293_v8  ;;  %v3448_v36 = vpack.c.bf16 %v2327_v24, %v2326_v20  ;;  %v2333_v37 = vadd.f32 %v4490_v34, %v2294_v42 }
 0x58b   : > { %2355 = vst [vmem:[%s4742_s12 + $0x78] sm:$0xff] %v4560_v57  ;;  %2356 = vst [vmem:[%s4742_s12 + $0x80] sm:$0xff] %v2324_v16  ;;  %3445 = vmatprep.subr.bf16.mxu0 %v3444_v32  ;;  %v2334_v40 = vadd.f32 %v4490_v34, %v2295_v50  ;;  %v2335_v41 = vadd.f32 %v4490_v34, %v2296_v54  ;;  %v2336_v44 = vadd.f32 %v4490_v34, %v2297_v12 }
 0x58c   : > { %2357 = vst [vmem:[%s4742_s12 + $0x88] sm:$0xff] %v2325_v17  ;;  %2358 = vst [vmem:[%s4742_s12 + $0x90] sm:$0xff] %v2326_v20  ;;  %3447 = vmatpush3.bf16.msra.mxu0 %v3446_v21  ;;  %v2337_v45 = vadd.f32 %v4490_v34, %v2298_v61  ;;  %v2338_v48 = vadd.f32 %v4490_v34, %v2299_v58  ;;  %v2339_v49 = vadd.f32 %v4490_v34, %v2300_v29  ;;  %v3626_v34 = vmov 0.0  }
 0x58d   : > { %2359 = vst [vmem:[%s4742_s12 + $0x98] sm:$0xff] %v2327_v24  ;;  %2360 = vst [vmem:[%s4742_s12 + $0xa0] sm:$0xff] %v2328_v25  ;;  %3449 = vmatprep.subr.bf16.mxu0 %v3448_v36  ;;  %v3450_v52 = vpack.c.bf16 %v4510_v51, %v4507_v2  ;;  %v3452_v55 = vpack.c.bf16 %v2329_v28, %v2328_v25  ;;  %v3454_v56 = vpack.c.bf16 %v4516_v5, %v4513_v63 }
 0x58e   : > { %2361 = vst [vmem:[%s4742_s12 + $0xa8] sm:$0xff] %v2329_v28  ;;  %2362 = vst [vmem:[%s4742_s12 + $0xb0] sm:$0xff] %v2330_v33  ;;  %v3456_v59 = vpack.c.bf16 %v2331_v15, %v2330_v33  ;;  %v3458_v60 = vpack.c.bf16 %v4522_v9, %v4519_v6  ;;  %v3460_v7 = vpack.c.bf16 %v2333_v37, %v2332_v14  ;;  %3313 = vmatprep.mubr.msk.f32.mxu1 %vm3625_vm0, %v3626_v34 }
 0x58f   : > { %2363 = vst [vmem:[%s4742_s12 + $0xb8] sm:$0xff] %v2331_v15  ;;  %2364 = vst [vmem:[%s4742_s12 + $0xc0] sm:$0xff] %v2332_v14  ;;  %v3462_v18 = vpack.c.bf16 %v4528_v13, %v4525_v10  ;;  %v3464_v19 = vpack.c.bf16 %v2335_v41, %v2334_v40  ;;  %v3466_v22 = vpack.c.bf16 %v4534_v3, %v4531_v0 }
 0x590   : > { %2365 = vst [vmem:[%s4742_s12 + $0xc8] sm:$0xff] %v2333_v37  ;;  %2366 = vst [vmem:[%s4742_s12 + $0xd0] sm:$0xff] %v2334_v40  ;;  %3451 = vmatpush3.bf16.msra.mxu0 %v3450_v52  ;;  %v3468_v23 = vpack.c.bf16 %v2337_v45, %v2336_v44  ;;  %v3470_v26 = vpack.c.bf16 %v4554_v11, %v4551_v4  ;;  %v3472_v27 = vpack.c.bf16 %v2339_v49, %v2338_v48 }
 0x591   : > { %2367 = vst [vmem:[%s4742_s12 + $0xd8] sm:$0xff] %v2335_v41  ;;  %2368 = vst [vmem:[%s4742_s12 + $0xe0] sm:$0xff] %v2336_v44  ;;  %3453 = vmatprep.subr.bf16.mxu0 %v3452_v55  ;;  %v3474_v30 = vpack.c.bf16 %v4560_v57, %v4557_v53 }
 0x592   : > { %2369 = vst [vmem:[%s4742_s12 + $0xe8] sm:$0xff] %v2337_v45  ;;  %2370 = vst [vmem:[%s4742_s12 + $0xf0] sm:$0xff] %v2338_v48 }
 0x593   : > { %2371 = vst [vmem:[%s4742_s12 + $0xf8] sm:$0xff] %v2339_v49 }
 0x594   : > { %3455 = vmatpush3.bf16.msra.mxu0 %v3454_v56 }
 0x595   : > { %3457 = vmatprep.subr.bf16.mxu0 %v3456_v59 }
 0x598   : > { %3459 = vmatpush3.bf16.msra.mxu0 %v3458_v60 }
 0x599   : > { %3461 = vmatprep.subr.bf16.mxu0 %v3460_v7 }
 0x59c   : > { %3463 = vmatpush3.bf16.msra.mxu0 %v3462_v18 }
 0x59d   : > { %3465 = vmatprep.subr.bf16.mxu0 %v3464_v19 }
 0x5a0   : > { %3467 = vmatpush3.bf16.msra.mxu0 %v3466_v22 }
 0x5a1   : > { %3469 = vmatprep.subr.bf16.mxu0 %v3468_v23 }
 0x5a4   : > { %3471 = vmatpush3.bf16.msra.mxu0 %v3470_v26 }
 0x5a5   : > { %3473 = vmatprep.subr.bf16.mxu0 %v3472_v27 }
 0x5a8   : > { %3475 = vmatpush3.bf16.msra.mxu0 %v3474_v30 }
 0x5ab   : > { %2439 = vmatmul.mubr.f32.vlgmr.msra.gmra.mrb[64].mxu0 %v2372_v31 }
 0x67e   : > { %v2893_v35 = vpop.f32.mrb[64].mxu0 }
 0x67f   : > { %v2894_v38 = vpop.f32.mrb[65].mxu0 }
 0x680   : > { %v2895_v39 = vadd.f32 %v2894_v38, %v2893_v35 }
 0x682   : > { %3314 = vmatmul.mubr.f32.vlgmr.msra.gmra.mrb[64].mxu1 %v2895_v39 }
 0x755   : > { %v2533_v46 = vpop.f32.mrb[64].mxu1 }
 0x756   : > { %v2534_v47 = vadd.f32 %v2640_v43, %v2533_v46  ;;  %v3315_v8 = vpop.f32.mrb[65].mxu1 }
 0x758   : > { %2538 = vst.msk [vmem:[#allocation4] sm:$0xff] %vm2537_vm1, %v2534_v47 }
 0x759 PF: > { %p3520_p11 = scmp.eq.s32.totalorder %s3714_s28, 1  ;;  %s3627_s18 = smov [#allocation4]  }
 0x75a   : > { %s2549_s19 = sshll.u32 %s3627_s18, 4  ;;  %s2550_s19 = int_to_ptr.vmem [resolvable:$true] %s2549_s19 }
 0x75b   : > { %s3569_s25 = scalar_lea.vmem %s2550_s19, 128  ;;  %p3576_p1 = scmp.lt.s32.totalorder %s2550_s19, %s2550_s19 }
 0x75c   : > { %p3570_p12 = scmp.ne.s32.totalorder %s2550_s19, %s3569_s25  ;;  %p3577_p2 = scmp.lt.s32.totalorder %s3569_s25, %s3569_s25 }
 0x75e   : > { %p3571_p13 = pnand %p3570_p12, %p3520_p11  ;;  %p3578_p3 = por %p3577_p2, %p3576_p1 }
 0x760   : > { %p3572_p0 = pneg %p3571_p13 }
 0x762   : > { %p3579_p4 = pnand %p3578_p3, %p3572_p0 }
 0x764   : > { %3582 = shalt.err (!%p3579_p4)
}
 0x765   : > { %s3583_s21 = scalar_lea.hbm %s4743_s13, 128 }
 0x766   : > { %p3584_p5 = scmp.ne.s32.totalorder %s4743_s13, %s3583_s21  ;;  %p3589_p8 = scmp.lt.u32.totalorder %s3583_s21, %s4743_s13 }
 0x768   : > { %p3585_p6 = pnand %p3584_p5, %p3520_p11 }
 0x76a   : > { %p3586_p7 = pneg %p3585_p6 }
 0x76c   : > { %p3591_p9 = pnand %p3589_p8, %p3586_p7 }
 0x76e   : > { %3594 = shalt.err (!%p3591_p9)
}
 0x76f   : > { %3517 = dma.vmem_to_hbm [thread:$0]  (%p3520_p11), %s2550_s19, 128, %s4743_s13, [#allocation5]  }
 0x770   : > { %3608 = dma.done.wait (%p3520_p11), [#allocation5], 128  }
 0x771   : > { %3610 = vsyncadd (%p3520_p11), [#allocation5], 4294967168 }
 0x772 PF: > { %p22_p10 = scmp.ge.s32.totalorder %s3717_s29, 4   ;;  %s4744_s25 = smov %s3617_s26 }
 0x773   : > { %s4745_s26 = smov %s3726_s15  ;;  %s4746_s27 = smov %s3717_s29 }
 0x774   :  { %24 = sbr.rel (!%p22_p10) target bundleno = 2 (0x2), region = 160 }
 0x77b   :  { %2565 = vsyncpa [#allocation5], 1 }
 0x77c   :  { %2567 = vsyncpa [#allocation5 + $0x1], 1 }

</bundles_post_ra>
